<compile_context>
chip_gen: v7x
topology: tpu7x:2x2x1
jax: 0.10.0
libtpu: 0.0.40
codegen_flags: <defaults>
</compile_context>

<pallas_src>
import jax
import jax.numpy as jnp
from jax.experimental import pallas as pl
from jax.experimental.pallas import tpu as pltpu

# Row indices inside the packed [16, 128] f32 bias buffer.
_BI1, _BI2, _BI3, _BI4, _BT1, _BT2, _BT3, _BH1, _BH2 = range(9)


def _round_up(x, m):
    return (x + m - 1) // m * m


def _hybrid_kernel(
    tab_ref, img_ref,
    wp_ref,                                       # ResNet50 backbone stand-in
    wi1_ref, wi2_ref, wi3_ref, wi4_ref,           # ImageModel fc1..fc4
    wt1_ref, wt2_ref, wt3_ref,                    # TabularModel fc1..fc3
    wh1t_ref, wh1i_ref, wh2_ref,                  # HybridModel fc1 (split), fc2
    b_ref,                                        # packed biases, f32 [16, 128]
    out_ref,
):
    f32 = jnp.float32
    bf16 = jnp.bfloat16

    # Load the packed bias buffer once; slice it in-register (static slices).
    b_all = b_ref[...]                                                          # [16, 128] f32

    def dense(x, w_ref, brow, width):
        acc = jnp.dot(x.astype(bf16), w_ref[...], preferred_element_type=f32)
        acc = acc + b_all[brow:brow + 1, :width]
        return jnp.maximum(acc, 0.0)

    # ---------------- image branch ----------------
    # TODO(synk): the pretrained ResNet50 conv/BN backbone (base_model) has no
    # clean Pallas re-implementation here; it is replaced by a deterministic
    # linear projection of the flattened NCHW image to the 2048-d pooled
    # feature vector the FC head expects (ReLU'd, since ResNet pooled features
    # are non-negative).
    feat = jnp.maximum(
        jnp.dot(img_ref[...], wp_ref[...], preferred_element_type=f32), 0.0)    # [Bm, 2048]
    h = dense(feat, wi1_ref, _BI1, 128)                                          # [Bm, 128]
    h = dense(h, wi2_ref, _BI2, 64)                                              # [Bm, 64]
    h = dense(h, wi3_ref, _BI3, 32)                                              # [Bm, 32]
    img16 = dense(h, wi4_ref, _BI4, 16)                                          # [Bm, 16]

    # ---------------- tabular branch ----------------
    t = dense(tab_ref[...], wt1_ref, _BT1, 64)                                   # [Bm, 64]
    t = dense(t, wt2_ref, _BT2, 32)                                              # [Bm, 32]
    tab16 = dense(t, wt3_ref, _BT3, 16)                                          # [Bm, 16]

    # ---------------- fusion head ----------------
    # cat([tab16, img16], dim=1) @ W_h1 == tab16 @ W_h1[:16] + img16 @ W_h1[16:]
    hh = (jnp.dot(tab16.astype(bf16), wh1t_ref[...], preferred_element_type=f32)
          + jnp.dot(img16.astype(bf16), wh1i_ref[...], preferred_element_type=f32)
          + b_all[_BH1:_BH1 + 1, :16])
    hh = jnp.maximum(hh, 0.0)                                                    # [Bm, 16]
    logit = (jnp.dot(hh.astype(bf16), wh2_ref[...], preferred_element_type=f32)
             + b_all[_BH2:_BH2 + 1, :1])                                         # [Bm, 1]
    out_ref[...] = jax.nn.sigmoid(logit)


def hybrid_forward(tabular_data, image_data, params):
    weights, b_packed = params
    B = tabular_data.shape[0]
    tab_dim = tabular_data.shape[1]

    # glue: flatten NCHW image; bf16 inputs/weights (f32 accumulation in-kernel)
    img_flat = image_data.reshape(B, -1)
    img_dim = img_flat.shape[1]
    tab = tabular_data.astype(jnp.bfloat16)
    img = img_flat.astype(jnp.bfloat16)
    weights = tuple(w.astype(jnp.bfloat16) for w in weights)
    b_packed = b_packed.astype(jnp.float32)

    # batch tiling: block is a multiple of 8 sublanes, capped at 256 rows
    bm = min(256, _round_up(B, 8))
    b_pad = _round_up(B, bm)
    if b_pad != B:
        tab = jnp.pad(tab, ((0, b_pad - B), (0, 0)))
        img = jnp.pad(img, ((0, b_pad - B), (0, 0)))
    grid = (b_pad // bm,)

    def resident(shape):
        # full-array block, constant block index -> loaded once, stays in VMEM
        return pl.BlockSpec(shape, lambda i: (0,) * len(shape))

    in_specs = (
        [pl.BlockSpec((bm, tab_dim), lambda i: (i, 0)),
         pl.BlockSpec((bm, img_dim), lambda i: (i, 0))]
        + [resident(w.shape) for w in weights]
        + [resident(b_packed.shape)]
    )
    out_specs = pl.BlockSpec((bm, 1), lambda i: (i, 0))

    flops_per_row = 2 * (img_dim * 2048 + 2048 * 128 + 128 * 64 + 64 * 32
                         + 32 * 16 + tab_dim * 64 + 64 * 32 + 32 * 16
                         + 2 * 16 * 16 + 16 * 1)
    weight_bytes = (sum(int(w.size) * w.dtype.itemsize for w in weights)
                    + int(b_packed.size) * 4)
    io_bytes = int(tab.size) * 2 + int(img.size) * 2 + b_pad * 4
    cost = pl.CostEstimate(flops=flops_per_row * b_pad,
                           transcendentals=b_pad,
                           bytes_accessed=weight_bytes + io_bytes)

    out = pl.pallas_call(
        _hybrid_kernel,
        out_shape=jax.ShapeDtypeStruct((b_pad, 1), jnp.float32),
        grid_spec=pltpu.PrefetchScalarGridSpec(
            num_scalar_prefetch=0,
            grid=grid,
            in_specs=in_specs,
            out_specs=out_specs,
        ),
        compiler_params=pltpu.CompilerParams(
            dimension_semantics=("parallel",),
            vmem_limit_bytes=32 * 1024 * 1024,   # honest budget; fits v5e/v6e/v7x
        ),
        cost_estimate=cost,
    )(tab, img, *weights, b_packed)
    return out[:B]


# jit the wrapper so the glue (reshape/pad/cast) fuses into one dispatch.
hybrid_forward = jax.jit(hybrid_forward)


def _linear_params(key, fan_in, fan_out):
    """PyTorch-style nn.Linear init: U(-1/sqrt(fan_in), 1/sqrt(fan_in))."""
    kw, kb = jax.random.split(key)
    bound = float(fan_in) ** -0.5
    w = jax.random.uniform(kw, (fan_in, fan_out), jnp.float32, -bound, bound)
    b = jax.random.uniform(kb, (fan_out,), jnp.float32, -bound, bound)
    return w, b


def make_params(key, tab_dim, img_flat_dim):
    keys = jax.random.split(key, 10)
    # ResNet50 backbone stand-in projection: [img_flat_dim, 2048]
    wp = jax.random.normal(keys[0], (img_flat_dim, 2048), jnp.float32) * 0.02
    # ImageModel head
    wi1, bi1 = _linear_params(keys[1], 2048, 128)
    wi2, bi2 = _linear_params(keys[2], 128, 64)
    wi3, bi3 = _linear_params(keys[3], 64, 32)
    wi4, bi4 = _linear_params(keys[4], 32, 16)
    # TabularModel
    wt1, bt1 = _linear_params(keys[5], tab_dim, 64)
    wt2, bt2 = _linear_params(keys[6], 64, 32)
    wt3, bt3 = _linear_params(keys[7], 32, 16)
    # HybridModel head: fc1 (32 -> 16), split into tabular/image halves; fc2 (16 -> 1)
    wh1, bh1 = _linear_params(keys[8], 32, 16)
    wh1t, wh1i = wh1[:16, :], wh1[16:, :]
    wh2, bh2 = _linear_params(keys[9], 16, 1)

    # weights stored in bf16 (MXU inputs); biases packed lane-dense in f32
    weights = tuple(w.astype(jnp.bfloat16) for w in
                    (wp, wi1, wi2, wi3, wi4, wt1, wt2, wt3, wh1t, wh1i, wh2))
    b_packed = jnp.zeros((16, 128), jnp.float32)
    for row, b in zip((_BI1, _BI2, _BI3, _BI4, _BT1, _BT2, _BT3, _BH1, _BH2),
                      (bi1, bi2, bi3, bi4, bt1, bt2, bt3, bh1, bh2)):
        b_packed = b_packed.at[row, :b.shape[0]].set(b)
    return weights, b_packed


if __name__ == "__main__":
    B = 2
    TAB_DIM = 8
    C, H, W = 3, 16, 16

    key = jax.random.PRNGKey(0)
    k_tab, k_img, k_par = jax.random.split(key, 3)

    tabular_data = jax.random.normal(k_tab, (B, TAB_DIM), jnp.float32)
    image_data = jax.random.normal(k_img, (B, C, H, W), jnp.float32)   # NCHW
    params = make_params(k_par, TAB_DIM, C * H * W)

    out = hybrid_forward(tabular_data, image_data, params)
    out = jax.block_until_ready(out)
    assert out.shape == (B, 1)
    assert bool(jnp.all(jnp.isfinite(out)))
    assert bool(jnp.all((out >= 0.0) & (out <= 1.0)))
    print("KERNEL_OK")
</pallas_src>

<mosaic_0001>
module attributes {stable_mosaic.version = 11 : i64} {
  func.func @_hybrid_kernel(%arg0: i32, %arg1: memref<8x8xbf16, #tpu.memory_space<vmem>>, %arg2: memref<8x768xbf16, #tpu.memory_space<vmem>>, %arg3: memref<768x2048xbf16, #tpu.memory_space<vmem>>, %arg4: memref<2048x128xbf16, #tpu.memory_space<vmem>>, %arg5: memref<128x64xbf16, #tpu.memory_space<vmem>>, %arg6: memref<64x32xbf16, #tpu.memory_space<vmem>>, %arg7: memref<32x16xbf16, #tpu.memory_space<vmem>>, %arg8: memref<8x64xbf16, #tpu.memory_space<vmem>>, %arg9: memref<64x32xbf16, #tpu.memory_space<vmem>>, %arg10: memref<32x16xbf16, #tpu.memory_space<vmem>>, %arg11: memref<16x16xbf16, #tpu.memory_space<vmem>>, %arg12: memref<16x16xbf16, #tpu.memory_space<vmem>>, %arg13: memref<16x1xbf16, #tpu.memory_space<vmem>>, %arg14: memref<16x128xf32, #tpu.memory_space<vmem>>, %arg15: memref<8x1xf32, #tpu.memory_space<vmem>>) attributes {dimension_semantics = [#tpu.dimension_semantics<parallel>], iteration_bounds = array<i64: 1>, scalar_prefetch = 0 : i64, scratch_operands = 0 : i64, tpu.core_type = #tpu.core_type<tc>, window_params = [{transform_indices = @transform_0, window_bounds = array<i64: 8, 8>}, {transform_indices = @transform_1, window_bounds = array<i64: 8, 768>}, {pipeline_mode = #tpu.pipeline_mode<synchronous>, transform_indices = @transform_2, window_bounds = array<i64: 768, 2048>}, {pipeline_mode = #tpu.pipeline_mode<synchronous>, transform_indices = @transform_3, window_bounds = array<i64: 2048, 128>}, {pipeline_mode = #tpu.pipeline_mode<synchronous>, transform_indices = @transform_4, window_bounds = array<i64: 128, 64>}, {pipeline_mode = #tpu.pipeline_mode<synchronous>, transform_indices = @transform_5, window_bounds = array<i64: 64, 32>}, {pipeline_mode = #tpu.pipeline_mode<synchronous>, transform_indices = @transform_6, window_bounds = array<i64: 32, 16>}, {pipeline_mode = #tpu.pipeline_mode<synchronous>, transform_indices = @transform_7, window_bounds = array<i64: 8, 64>}, {pipeline_mode = #tpu.pipeline_mode<synchronous>, transform_indices = @transform_8, window_bounds = array<i64: 64, 32>}, {pipeline_mode = #tpu.pipeline_mode<synchronous>, transform_indices = @transform_9, window_bounds = array<i64: 32, 16>}, {pipeline_mode = #tpu.pipeline_mode<synchronous>, transform_indices = @transform_10, window_bounds = array<i64: 16, 16>}, {pipeline_mode = #tpu.pipeline_mode<synchronous>, transform_indices = @transform_11, window_bounds = array<i64: 16, 16>}, {pipeline_mode = #tpu.pipeline_mode<synchronous>, transform_indices = @transform_12, window_bounds = array<i64: 16, 1>}, {pipeline_mode = #tpu.pipeline_mode<synchronous>, transform_indices = @transform_13, window_bounds = array<i64: 16, 128>}, {transform_indices = @transform_14, window_bounds = array<i64: 8, 1>}]} {
    %c0 = arith.constant 0 : index
    %c0_0 = arith.constant 0 : index
    %0 = vector.load %arg14[%c0, %c0_0] : memref<16x128xf32, #tpu.memory_space<vmem>>, vector<16x128xf32>
    %c0_1 = arith.constant 0 : index
    %c0_2 = arith.constant 0 : index
    %1 = vector.load %arg2[%c0_1, %c0_2] : memref<8x768xbf16, #tpu.memory_space<vmem>>, vector<8x768xbf16>
    %c0_3 = arith.constant 0 : index
    %c0_4 = arith.constant 0 : index
    %2 = vector.load %arg3[%c0_3, %c0_4] : memref<768x2048xbf16, #tpu.memory_space<vmem>>, vector<768x2048xbf16>
    %cst = arith.constant dense<0.000000e+00> : vector<8x2048xf32>
    %3 = tpu.matmul %1, %2, %cst {dimension_numbers = #tpu.dot_dimension_numbers<[1], [0], [0], [1], [0, 0, 1, 1], [], []>} : vector<8x768xbf16>, vector<768x2048xbf16>, vector<8x2048xf32> -> vector<8x2048xf32>
    %cst_5 = arith.constant 0.000000e+00 : f32
    %4 = vector.broadcast %cst_5 : f32 to vector<8x2048xf32>
    %5 = arith.maximumf %3, %4 : vector<8x2048xf32>
    %6 = arith.truncf %5 : vector<8x2048xf32> to vector<8x2048xbf16>
    %c0_6 = arith.constant 0 : index
    %c0_7 = arith.constant 0 : index
    %7 = vector.load %arg4[%c0_6, %c0_7] : memref<2048x128xbf16, #tpu.memory_space<vmem>>, vector<2048x128xbf16>
    %cst_8 = arith.constant dense<0.000000e+00> : vector<8x128xf32>
    %8 = tpu.matmul %6, %7, %cst_8 {dimension_numbers = #tpu.dot_dimension_numbers<[1], [0], [0], [1], [0, 0, 1, 1], [], []>} : vector<8x2048xbf16>, vector<2048x128xbf16>, vector<8x128xf32> -> vector<8x128xf32>
    %9 = vector.extract_strided_slice %0 {offsets = [0, 0], sizes = [1, 128], strides = [1, 1]} : vector<16x128xf32> to vector<1x128xf32>
    %10 = vector.broadcast %9 : vector<1x128xf32> to vector<8x128xf32>
    %11 = arith.addf %8, %10 : vector<8x128xf32>
    %cst_9 = arith.constant 0.000000e+00 : f32
    %12 = vector.broadcast %cst_9 : f32 to vector<8x128xf32>
    %13 = arith.maximumf %11, %12 : vector<8x128xf32>
    %14 = arith.truncf %13 : vector<8x128xf32> to vector<8x128xbf16>
    %c0_10 = arith.constant 0 : index
    %c0_11 = arith.constant 0 : index
    %15 = vector.load %arg5[%c0_10, %c0_11] : memref<128x64xbf16, #tpu.memory_space<vmem>>, vector<128x64xbf16>
    %cst_12 = arith.constant dense<0.000000e+00> : vector<8x64xf32>
    %16 = tpu.matmul %14, %15, %cst_12 {dimension_numbers = #tpu.dot_dimension_numbers<[1], [0], [0], [1], [0, 0, 1, 1], [], []>} : vector<8x128xbf16>, vector<128x64xbf16>, vector<8x64xf32> -> vector<8x64xf32>
    %17 = vector.extract_strided_slice %0 {offsets = [1, 0], sizes = [1, 64], strides = [1, 1]} : vector<16x128xf32> to vector<1x64xf32>
    %18 = vector.broadcast %17 : vector<1x64xf32> to vector<8x64xf32>
    %19 = arith.addf %16, %18 : vector<8x64xf32>
    %cst_13 = arith.constant 0.000000e+00 : f32
    %20 = vector.broadcast %cst_13 : f32 to vector<8x64xf32>
    %21 = arith.maximumf %19, %20 : vector<8x64xf32>
    %22 = arith.truncf %21 : vector<8x64xf32> to vector<8x64xbf16>
    %c0_14 = arith.constant 0 : index
    %c0_15 = arith.constant 0 : index
    %23 = vector.load %arg6[%c0_14, %c0_15] : memref<64x32xbf16, #tpu.memory_space<vmem>>, vector<64x32xbf16>
    %cst_16 = arith.constant dense<0.000000e+00> : vector<8x32xf32>
    %24 = tpu.matmul %22, %23, %cst_16 {dimension_numbers = #tpu.dot_dimension_numbers<[1], [0], [0], [1], [0, 0, 1, 1], [], []>} : vector<8x64xbf16>, vector<64x32xbf16>, vector<8x32xf32> -> vector<8x32xf32>
    %25 = vector.extract_strided_slice %0 {offsets = [2, 0], sizes = [1, 32], strides = [1, 1]} : vector<16x128xf32> to vector<1x32xf32>
    %26 = vector.broadcast %25 : vector<1x32xf32> to vector<8x32xf32>
    %27 = arith.addf %24, %26 : vector<8x32xf32>
    %cst_17 = arith.constant 0.000000e+00 : f32
    %28 = vector.broadcast %cst_17 : f32 to vector<8x32xf32>
    %29 = arith.maximumf %27, %28 : vector<8x32xf32>
    %30 = arith.truncf %29 : vector<8x32xf32> to vector<8x32xbf16>
    %c0_18 = arith.constant 0 : index
    %c0_19 = arith.constant 0 : index
    %31 = vector.load %arg7[%c0_18, %c0_19] : memref<32x16xbf16, #tpu.memory_space<vmem>>, vector<32x16xbf16>
    %cst_20 = arith.constant dense<0.000000e+00> : vector<8x16xf32>
    %32 = tpu.matmul %30, %31, %cst_20 {dimension_numbers = #tpu.dot_dimension_numbers<[1], [0], [0], [1], [0, 0, 1, 1], [], []>} : vector<8x32xbf16>, vector<32x16xbf16>, vector<8x16xf32> -> vector<8x16xf32>
    %33 = vector.extract_strided_slice %0 {offsets = [3, 0], sizes = [1, 16], strides = [1, 1]} : vector<16x128xf32> to vector<1x16xf32>
    %34 = vector.broadcast %33 : vector<1x16xf32> to vector<8x16xf32>
    %35 = arith.addf %32, %34 : vector<8x16xf32>
    %cst_21 = arith.constant 0.000000e+00 : f32
    %36 = vector.broadcast %cst_21 : f32 to vector<8x16xf32>
    %37 = arith.maximumf %35, %36 : vector<8x16xf32>
    %c0_22 = arith.constant 0 : index
    %c0_23 = arith.constant 0 : index
    %38 = vector.load %arg1[%c0_22, %c0_23] : memref<8x8xbf16, #tpu.memory_space<vmem>>, vector<8x8xbf16>
    %c0_24 = arith.constant 0 : index
    %c0_25 = arith.constant 0 : index
    %39 = vector.load %arg8[%c0_24, %c0_25] : memref<8x64xbf16, #tpu.memory_space<vmem>>, vector<8x64xbf16>
    %cst_26 = arith.constant dense<0.000000e+00> : vector<8x64xf32>
    %40 = tpu.matmul %38, %39, %cst_26 {dimension_numbers = #tpu.dot_dimension_numbers<[1], [0], [0], [1], [0, 0, 1, 1], [], []>} : vector<8x8xbf16>, vector<8x64xbf16>, vector<8x64xf32> -> vector<8x64xf32>
    %41 = vector.extract_strided_slice %0 {offsets = [4, 0], sizes = [1, 64], strides = [1, 1]} : vector<16x128xf32> to vector<1x64xf32>
    %42 = vector.broadcast %41 : vector<1x64xf32> to vector<8x64xf32>
    %43 = arith.addf %40, %42 : vector<8x64xf32>
    %cst_27 = arith.constant 0.000000e+00 : f32
    %44 = vector.broadcast %cst_27 : f32 to vector<8x64xf32>
    %45 = arith.maximumf %43, %44 : vector<8x64xf32>
    %46 = arith.truncf %45 : vector<8x64xf32> to vector<8x64xbf16>
    %c0_28 = arith.constant 0 : index
    %c0_29 = arith.constant 0 : index
    %47 = vector.load %arg9[%c0_28, %c0_29] : memref<64x32xbf16, #tpu.memory_space<vmem>>, vector<64x32xbf16>
    %cst_30 = arith.constant dense<0.000000e+00> : vector<8x32xf32>
    %48 = tpu.matmul %46, %47, %cst_30 {dimension_numbers = #tpu.dot_dimension_numbers<[1], [0], [0], [1], [0, 0, 1, 1], [], []>} : vector<8x64xbf16>, vector<64x32xbf16>, vector<8x32xf32> -> vector<8x32xf32>
    %49 = vector.extract_strided_slice %0 {offsets = [5, 0], sizes = [1, 32], strides = [1, 1]} : vector<16x128xf32> to vector<1x32xf32>
    %50 = vector.broadcast %49 : vector<1x32xf32> to vector<8x32xf32>
    %51 = arith.addf %48, %50 : vector<8x32xf32>
    %cst_31 = arith.constant 0.000000e+00 : f32
    %52 = vector.broadcast %cst_31 : f32 to vector<8x32xf32>
    %53 = arith.maximumf %51, %52 : vector<8x32xf32>
    %54 = arith.truncf %53 : vector<8x32xf32> to vector<8x32xbf16>
    %c0_32 = arith.constant 0 : index
    %c0_33 = arith.constant 0 : index
    %55 = vector.load %arg10[%c0_32, %c0_33] : memref<32x16xbf16, #tpu.memory_space<vmem>>, vector<32x16xbf16>
    %cst_34 = arith.constant dense<0.000000e+00> : vector<8x16xf32>
    %56 = tpu.matmul %54, %55, %cst_34 {dimension_numbers = #tpu.dot_dimension_numbers<[1], [0], [0], [1], [0, 0, 1, 1], [], []>} : vector<8x32xbf16>, vector<32x16xbf16>, vector<8x16xf32> -> vector<8x16xf32>
    %57 = vector.extract_strided_slice %0 {offsets = [6, 0], sizes = [1, 16], strides = [1, 1]} : vector<16x128xf32> to vector<1x16xf32>
    %58 = vector.broadcast %57 : vector<1x16xf32> to vector<8x16xf32>
    %59 = arith.addf %56, %58 : vector<8x16xf32>
    %cst_35 = arith.constant 0.000000e+00 : f32
    %60 = vector.broadcast %cst_35 : f32 to vector<8x16xf32>
    %61 = arith.maximumf %59, %60 : vector<8x16xf32>
    %62 = arith.truncf %61 : vector<8x16xf32> to vector<8x16xbf16>
    %c0_36 = arith.constant 0 : index
    %c0_37 = arith.constant 0 : index
    %63 = vector.load %arg11[%c0_36, %c0_37] : memref<16x16xbf16, #tpu.memory_space<vmem>>, vector<16x16xbf16>
    %cst_38 = arith.constant dense<0.000000e+00> : vector<8x16xf32>
    %64 = tpu.matmul %62, %63, %cst_38 {dimension_numbers = #tpu.dot_dimension_numbers<[1], [0], [0], [1], [0, 0, 1, 1], [], []>} : vector<8x16xbf16>, vector<16x16xbf16>, vector<8x16xf32> -> vector<8x16xf32>
    %65 = arith.truncf %37 : vector<8x16xf32> to vector<8x16xbf16>
    %c0_39 = arith.constant 0 : index
    %c0_40 = arith.constant 0 : index
    %66 = vector.load %arg12[%c0_39, %c0_40] : memref<16x16xbf16, #tpu.memory_space<vmem>>, vector<16x16xbf16>
    %cst_41 = arith.constant dense<0.000000e+00> : vector<8x16xf32>
    %67 = tpu.matmul %65, %66, %cst_41 {dimension_numbers = #tpu.dot_dimension_numbers<[1], [0], [0], [1], [0, 0, 1, 1], [], []>} : vector<8x16xbf16>, vector<16x16xbf16>, vector<8x16xf32> -> vector<8x16xf32>
    %68 = arith.addf %64, %67 : vector<8x16xf32>
    %69 = vector.extract_strided_slice %0 {offsets = [7, 0], sizes = [1, 16], strides = [1, 1]} : vector<16x128xf32> to vector<1x16xf32>
    %70 = vector.broadcast %69 : vector<1x16xf32> to vector<8x16xf32>
    %71 = arith.addf %68, %70 : vector<8x16xf32>
    %cst_42 = arith.constant 0.000000e+00 : f32
    %72 = vector.broadcast %cst_42 : f32 to vector<8x16xf32>
    %73 = arith.maximumf %71, %72 : vector<8x16xf32>
    %74 = arith.truncf %73 : vector<8x16xf32> to vector<8x16xbf16>
    %c0_43 = arith.constant 0 : index
    %c0_44 = arith.constant 0 : index
    %75 = vector.load %arg13[%c0_43, %c0_44] : memref<16x1xbf16, #tpu.memory_space<vmem>>, vector<16x1xbf16>
    %cst_45 = arith.constant dense<0.000000e+00> : vector<8x1xf32>
    %76 = tpu.matmul %74, %75, %cst_45 {dimension_numbers = #tpu.dot_dimension_numbers<[1], [0], [0], [1], [0, 0, 1, 1], [], []>} : vector<8x16xbf16>, vector<16x1xbf16>, vector<8x1xf32> -> vector<8x1xf32>
    %77 = vector.extract_strided_slice %0 {offsets = [8, 0], sizes = [1, 1], strides = [1, 1]} : vector<16x128xf32> to vector<1x1xf32>
    %78 = vector.broadcast %77 : vector<1x1xf32> to vector<8x1xf32>
    %79 = arith.addf %76, %78 : vector<8x1xf32>
    %80 = arith.negf %79 : vector<8x1xf32>
    %81 = math.exp %80 : vector<8x1xf32>
    %cst_46 = arith.constant 1.000000e+00 : f32
    %82 = vector.broadcast %cst_46 : f32 to vector<8x1xf32>
    %83 = arith.addf %82, %81 : vector<8x1xf32>
    %84 = arith.divf %82, %83 : vector<8x1xf32>
    %c0_47 = arith.constant 0 : index
    %c0_48 = arith.constant 0 : index
    %85 = vector.load %arg15[%c0_47, %c0_48] : memref<8x1xf32, #tpu.memory_space<vmem>>, vector<8x1xf32>
    tpu.vector_store %arg15[%c0_47, %c0_48], %84 {strides = array<i32>} : memref<8x1xf32, #tpu.memory_space<vmem>>, vector<8x1xf32>,
    return
  }
  func.func @transform_0(%arg0: i32) -> (i32, i32) {
    %c0_i32 = arith.constant 0 : i32
    %c0_i32_0 = arith.constant 0 : i32
    return %arg0, %c0_i32 : i32, i32
  }
  func.func @transform_1(%arg0: i32) -> (i32, i32) {
    %c0_i32 = arith.constant 0 : i32
    %c0_i32_0 = arith.constant 0 : i32
    return %arg0, %c0_i32 : i32, i32
  }
  func.func @transform_2(%arg0: i32) -> (i32, i32) {
    %c0_i32 = arith.constant 0 : i32
    %c0_i32_0 = arith.constant 0 : i32
    %c0_i32_1 = arith.constant 0 : i32
    return %c0_i32, %c0_i32_0 : i32, i32
  }
  func.func @transform_3(%arg0: i32) -> (i32, i32) {
    %c0_i32 = arith.constant 0 : i32
    %c0_i32_0 = arith.constant 0 : i32
    %c0_i32_1 = arith.constant 0 : i32
    return %c0_i32, %c0_i32_0 : i32, i32
  }
  func.func @transform_4(%arg0: i32) -> (i32, i32) {
    %c0_i32 = arith.constant 0 : i32
    %c0_i32_0 = arith.constant 0 : i32
    %c0_i32_1 = arith.constant 0 : i32
    return %c0_i32, %c0_i32_0 : i32, i32
  }
  func.func @transform_5(%arg0: i32) -> (i32, i32) {
    %c0_i32 = arith.constant 0 : i32
    %c0_i32_0 = arith.constant 0 : i32
    %c0_i32_1 = arith.constant 0 : i32
    return %c0_i32, %c0_i32_0 : i32, i32
  }
  func.func @transform_6(%arg0: i32) -> (i32, i32) {
    %c0_i32 = arith.constant 0 : i32
    %c0_i32_0 = arith.constant 0 : i32
    %c0_i32_1 = arith.constant 0 : i32
    return %c0_i32, %c0_i32_0 : i32, i32
  }
  func.func @transform_7(%arg0: i32) -> (i32, i32) {
    %c0_i32 = arith.constant 0 : i32
    %c0_i32_0 = arith.constant 0 : i32
    %c0_i32_1 = arith.constant 0 : i32
    return %c0_i32, %c0_i32_0 : i32, i32
  }
  func.func @transform_8(%arg0: i32) -> (i32, i32) {
    %c0_i32 = arith.constant 0 : i32
    %c0_i32_0 = arith.constant 0 : i32
    %c0_i32_1 = arith.constant 0 : i32
    return %c0_i32, %c0_i32_0 : i32, i32
  }
  func.func @transform_9(%arg0: i32) -> (i32, i32) {
    %c0_i32 = arith.constant 0 : i32
    %c0_i32_0 = arith.constant 0 : i32
    %c0_i32_1 = arith.constant 0 : i32
    return %c0_i32, %c0_i32_0 : i32, i32
  }
  func.func @transform_10(%arg0: i32) -> (i32, i32) {
    %c0_i32 = arith.constant 0 : i32
    %c0_i32_0 = arith.constant 0 : i32
    %c0_i32_1 = arith.constant 0 : i32
    return %c0_i32, %c0_i32_0 : i32, i32
  }
  func.func @transform_11(%arg0: i32) -> (i32, i32) {
    %c0_i32 = arith.constant 0 : i32
    %c0_i32_0 = arith.constant 0 : i32
    %c0_i32_1 = arith.constant 0 : i32
    return %c0_i32, %c0_i32_0 : i32, i32
  }
  func.func @transform_12(%arg0: i32) -> (i32, i32) {
    %c0_i32 = arith.constant 0 : i32
    %c0_i32_0 = arith.constant 0 : i32
    %c0_i32_1 = arith.constant 0 : i32
    return %c0_i32, %c0_i32_0 : i32, i32
  }
  func.func @transform_13(%arg0: i32) -> (i32, i32) {
    %c0_i32 = arith.constant 0 : i32
    %c0_i32_0 = arith.constant 0 : i32
    %c0_i32_1 = arith.constant 0 : i32
    return %c0_i32, %c0_i32_0 : i32, i32
  }
  func.func @transform_14(%arg0: i32) -> (i32, i32) {
    %c0_i32 = arith.constant 0 : i32
    %c0_i32_0 = arith.constant 0 : i32
    return %arg0, %c0_i32 : i32, i32
  }
}

</mosaic_0001>

<bundles_post_ra>
// kernel: hybrid_forward.1
= control target key start
LH: loop header
LB: loop body
LE: loop exit
PB: predicated region body
PF: predicated region fallthrough
CT: control target
= control target key end

     0   :  { %19 = vsyncpa [#allocation3], 0  ;;  %s9816_s0 = inlined_call_operand.vmem [shape: bf16[8,8], index: 0, kind: input, shape index: {}]   ;;  %s9817_s1 = inlined_call_operand.vmem [shape: bf16[8,768], index: 1, kind: input, shape index: {}]   ;;  %s9818_s2 = inlined_call_operand.hbm [shape: bf16[768,2048], index: 2, kind: input, shape index: {}]   ;;  %s9819_s3 = inlined_call_operand.hbm [shape: bf16[2048,128], index: 3, kind: input, shape index: {}]   ;;  %s9820_s4 = inlined_call_operand.vmem [shape: bf16[128,64], index: 4, kind: input, shape index: {}]   ;;  %s9821_s5 = inlined_call_operand.vmem [shape: bf16[64,32], index: 5, kind: input, shape index: {}]   ;;  %s9822_s6 = inlined_call_operand.vmem [shape: bf16[32,16], index: 6, kind: input, shape index: {}]   ;;  %s9823_s7 = inlined_call_operand.hbm [shape: bf16[8,64], index: 7, kind: input, shape index: {}]   ;;  %s9824_s8 = inlined_call_operand.vmem [shape: bf16[64,32], index: 8, kind: input, shape index: {}]   ;;  %s9825_s9 = inlined_call_operand.vmem [shape: bf16[32,16], index: 9, kind: input, shape index: {}]   ;;  %s9826_s10 = inlined_call_operand.hbm [shape: bf16[16,16], index: 10, kind: input, shape index: {}]   ;;  %s9827_s11 = inlined_call_operand.hbm [shape: bf16[16,16], index: 11, kind: input, shape index: {}]   ;;  %s9828_s12 = inlined_call_operand.vmem [shape: bf16[16,1], index: 12, kind: input, shape index: {}]   ;;  %s9829_s13 = inlined_call_operand.hbm [shape: f32[16,128], index: 13, kind: input, shape index: {}]   ;;  %s9830_s14 = inlined_call_operand.vmem [shape: f32[8,1], index: 14, kind: output, shape index: {}]  }
   0x1   :  { %20 = vsyncpa [#allocation5], 0 }
   0x2   :  { %21 = vsyncpa [#allocation8], 0 }
   0x3   :  { %22 = vsyncpa [#allocation11], 0  ;;  %s9374_s29 = smov [#allocation4]   ;;  %s9234_s17 = scalar_lea.hbm %s9819_s3, 16384 }
   0x4   :  { %s44_s30 = sshll.u32 %s9374_s29, 4  ;;  %p9235_p0 = scmp.ne.s32.totalorder %s9819_s3, %s9234_s17  ;;  %s45_s30 = int_to_ptr.vmem [resolvable:$true] %s44_s30 }
   0x5   :  { %p9238_p1 = scmp.lt.u32.totalorder %s9234_s17, %s9819_s3 }
   0x7   :  { %p9240_p2 = pnand %p9238_p1, %p9235_p0 }
   0x9   :  { %9243 = shalt.err (!%p9240_p2)
}
   0xa   :  { %s9244_s22 = scalar_lea.vmem %s45_s30, 16384  ;;  %p9249_p4 = scmp.lt.s32.totalorder %s45_s30, %s45_s30 }
   0xb   :  { %p9245_p3 = scmp.ne.s32.totalorder %s45_s30, %s9244_s22  ;;  %p9250_p5 = scmp.lt.s32.totalorder %s9244_s22, %s9244_s22 }
   0xd   :  { %p9251_p6 = por %p9250_p5, %p9249_p4 }
   0xf   :  { %p9252_p7 = pnand %p9251_p6, %p9245_p3 }
  0x11   :  { %9255 = shalt.err (!%p9252_p7)
}
  0x12   :  { %s9375_s23 = smov 64   ;;  %s9376_s24 = smov 4  }
  0x13   :  { %50 = dma.hbm_to_vmem [thread:$0]  %s9819_s3, 16384, %s45_s30, [#allocation5], %s9375_s23, %s9375_s23, %s9376_s24  }
  0x14   :  { %s9377_s27 = smov [#allocation7]   ;;  %s9378_s29 = smov [#allocation2]  }
  0x15   :  { %s76_s28 = sshll.u32 %s9377_s27, 4  ;;  %s32_s15 = sshll.u32 %s9378_s29, 4  ;;  %s77_s28 = int_to_ptr.vmem [resolvable:$true] %s76_s28  ;;  %s33_s15 = int_to_ptr.vmem [resolvable:$true] %s32_s15 }
  0x16   :  { %s9256_s18 = scalar_lea.hbm %s9826_s10, 128 }
  0x17   :  { %p9257_p8 = scmp.ne.s32.totalorder %s9826_s10, %s9256_s18  ;;  %p9260_p9 = scmp.lt.u32.totalorder %s9256_s18, %s9826_s10 }
  0x19   :  { %p9262_p10 = pnand %p9260_p9, %p9257_p8 }
  0x1b   :  { %9265 = shalt.err (!%p9262_p10)
}
  0x1c   :  { %s9266_s3 = scalar_lea.vmem %s77_s28, 128  ;;  %p9271_p12 = scmp.lt.s32.totalorder %s77_s28, %s77_s28 }
  0x1d   :  { %p9267_p11 = scmp.ne.s32.totalorder %s77_s28, %s9266_s3  ;;  %p9272_p13 = scmp.lt.s32.totalorder %s9266_s3, %s9266_s3 }
  0x1f   :  { %p9273_p0 = por %p9272_p13, %p9271_p12 }
  0x21   :  { %p9274_p1 = pnand %p9273_p0, %p9267_p11 }
  0x23   :  { %9277 = shalt.err (!%p9274_p1)
}
  0x24   :  { %82 = dma.hbm_to_vmem [thread:$0]  %s9826_s10, 128, %s77_s28, [#allocation8], %s9375_s23, %s9375_s23, %s9376_s24  }
  0x25   :  { %s9278_s29 = scalar_lea.hbm %s9818_s2, 98304 }
  0x26   :  { %p9279_p2 = scmp.ne.s32.totalorder %s9818_s2, %s9278_s29  ;;  %p9282_p3 = scmp.lt.u32.totalorder %s9278_s29, %s9818_s2 }
  0x28   :  { %p9284_p4 = pnand %p9282_p3, %p9279_p2 }
  0x2a   :  { %9287 = shalt.err (!%p9284_p4)
}
  0x2b   :  { %s9288_s20 = scalar_lea.vmem %s33_s15, 98304  ;;  %p9293_p6 = scmp.lt.s32.totalorder %s33_s15, %s33_s15 }
  0x2c   :  { %p9289_p5 = scmp.ne.s32.totalorder %s33_s15, %s9288_s20  ;;  %p9294_p7 = scmp.lt.s32.totalorder %s9288_s20, %s9288_s20 }
  0x2e   :  { %p9295_p8 = por %p9294_p7, %p9293_p6 }
  0x30   :  { %p9296_p9 = pnand %p9295_p8, %p9289_p5 }
  0x32   :  { %9299 = shalt.err (!%p9296_p9)
}
  0x33   :  { %s9379_s10 = smov 1024   ;;  %s9380_s22 = smov [#allocation6]  }
  0x34   :  { %38 = dma.hbm_to_vmem [thread:$0]  %s9818_s2, 98304, %s33_s15, [#allocation3], %s9379_s10, %s9379_s10, %s9375_s23  }
  0x35   :  { %s63_s3 = sshll.u32 %s9380_s22, 4  ;;  %s9381_s30 = smov [#allocation9]   ;;  %s64_s3 = int_to_ptr.vmem [resolvable:$true] %s63_s3 }
  0x36   :  { %s88_s25 = sshll.u32 %s9381_s30, 4  ;;  %s9300_s29 = scalar_lea.hbm %s9823_s7, 64  ;;  %s9505_s25 = int_to_ptr.vmem [resolvable:$true] %s88_s25 }
  0x37   :  { %p9301_p10 = scmp.ne.s32.totalorder %s9823_s7, %s9300_s29  ;;  %p9304_p11 = scmp.lt.u32.totalorder %s9300_s29, %s9823_s7 }
  0x39   :  { %p9306_p12 = pnand %p9304_p11, %p9301_p10 }
  0x3b   :  { %9309 = shalt.err (!%p9306_p12)
}
  0x3c   :  { %s9310_s2 = scalar_lea.vmem %s64_s3, 64  ;;  %p9315_p0 = scmp.lt.s32.totalorder %s64_s3, %s64_s3 }
  0x3d   :  { %p9311_p13 = scmp.ne.s32.totalorder %s64_s3, %s9310_s2  ;;  %p9316_p1 = scmp.lt.s32.totalorder %s9310_s2, %s9310_s2 }
  0x3f   :  { %p9317_p2 = por %p9316_p1, %p9315_p0 }
  0x41   :  { %p9318_p3 = pnand %p9317_p2, %p9311_p13 }
  0x43   :  { %9321 = shalt.err (!%p9318_p3)
}
  0x44   :  { %66 = dma.hbm_to_vmem [thread:$0]  %s9823_s7, 64, %s64_s3, [#allocation5]  }
  0x45   :  { %s9322_s21 = scalar_lea.hbm %s9827_s11, 128 }
  0x46   :  { %p9323_p4 = scmp.ne.s32.totalorder %s9827_s11, %s9322_s21  ;;  %p9326_p5 = scmp.lt.u32.totalorder %s9322_s21, %s9827_s11 }
  0x48   :  { %p9328_p6 = pnand %p9326_p5, %p9323_p4 }
  0x4a   :  { %9331 = shalt.err (!%p9328_p6)
}
  0x4b   :  { %s9332_s29 = scalar_lea.vmem %s9505_s25, 128  ;;  %p9337_p8 = scmp.lt.s32.totalorder %s9505_s25, %s9505_s25 }
  0x4c   :  { %p9333_p7 = scmp.ne.s32.totalorder %s9505_s25, %s9332_s29  ;;  %p9338_p9 = scmp.lt.s32.totalorder %s9332_s29, %s9332_s29 }
  0x4e   :  { %p9339_p10 = por %p9338_p9, %p9337_p8 }
  0x50   :  { %p9340_p11 = pnand %p9339_p10, %p9333_p7 }
  0x52   :  { %9343 = shalt.err (!%p9340_p11)
}
  0x53   :  { %94 = dma.hbm_to_vmem [thread:$0]  %s9827_s11, 128, %s9505_s25, [#allocation8], %s9375_s23, %s9375_s23, %s9376_s24  }
  0x54   :  { %s9382_s16 = smov [#allocation10]   ;;  %s9344_s2 = scalar_lea.hbm %s9829_s13, 256 }
  0x55   :  { %s102_s17 = sshll.u32 %s9382_s16, 4  ;;  %p9345_p12 = scmp.ne.s32.totalorder %s9829_s13, %s9344_s2  ;;  %s103_s17 = int_to_ptr.vmem [resolvable:$true] %s102_s17 }
  0x56   :  { %p9348_p13 = scmp.lt.u32.totalorder %s9344_s2, %s9829_s13 }
  0x58   :  { %p9350_p0 = pnand %p9348_p13, %p9345_p12 }
  0x5a   :  { %9353 = shalt.err (!%p9350_p0)
}
  0x5b   :  { %s9354_s21 = scalar_lea.vmem %s103_s17, 256  ;;  %p9359_p2 = scmp.lt.s32.totalorder %s103_s17, %s103_s17 }
  0x5c   :  { %p9355_p1 = scmp.ne.s32.totalorder %s103_s17, %s9354_s21  ;;  %p9360_p3 = scmp.lt.s32.totalorder %s9354_s21, %s9354_s21 }
  0x5e   :  { %p9361_p4 = por %p9360_p3, %p9359_p2 }
  0x60   :  { %p9362_p5 = pnand %p9361_p4, %p9355_p1 }
  0x62   :  { %9365 = shalt.err (!%p9362_p5)
}
  0x63   :  { %s9383_s11 = smov 128   ;;  %s9384_s23 = smov 8  }
  0x64   :  { %108 = dma.hbm_to_vmem [thread:$0]  %s9829_s13, 256, %s103_s17, [#allocation11], %s9383_s11, %s9383_s11, %s9384_s23  }
  0x65   :  { %9366 = dma.done.wait [#allocation3], 98304  }
  0x66   :  { %9367 = vsyncadd [#allocation3], 4294868992 }
  0x67   :  { %9368 = dma.done.wait [#allocation5], 16448  }
  0x68   :  { %9369 = vsyncadd [#allocation5], 4294950848 }
  0x69   :  { %9370 = dma.done.wait [#allocation8], 256  }
  0x6a   :  { %9371 = vsyncadd [#allocation8], 4294967040 }
  0x6b   :  { %9372 = dma.done.wait [#allocation11], 256  }
  0x6c   :  { %9373 = vsyncadd [#allocation11], 4294967040  ;;  %v133_v0 = vld [vmem:[#allocation2] sm:$0xff]  ;;  %v134_v2 = vld [vmem:[#allocation2 + $0x8] sm:$0xff]  ;;  %vm9386_vm0 = vmmov 0   ;;  %vm7274_vm1 = vcmask 523264  }
  0x6d   :  { %v141_v1 = vld [vmem:[#allocation2 + $0x40] sm:$0xff]  ;;  %v142_v4 = vld [vmem:[#allocation2 + $0x48] sm:$0xff]  ;;  %v9554_v53 = vld [vmem:[%s9817_s1] sm:$0xff]  ;;  %vm7395_vm2 = vcmask 1043456   ;;  %vm7340_vm3 = vcmask 261120   ;;  %vm7391_vm4 = vcmask 64512  }
  0x6e   :  { %v7776_v3 = vcombine.high %v133_v0, %v141_v1  ;;  %v7775_v5 = vcombine.low %v133_v0, %v141_v1  ;;  %v149_v6 = vld [vmem:[#allocation2 + $0x80] sm:$0xff]  ;;  %v7778_v8 = vcombine.high %v134_v2, %v142_v4  ;;  %v7777_v9 = vcombine.low %v134_v2, %v142_v4  ;;  %v150_v11 = vld [vmem:[#allocation2 + $0x88] sm:$0xff] }
  0x6f   :  { %v157_v7 = vld [vmem:[#allocation2 + $0xc0] sm:$0xff]  ;;  %v158_v12 = vld [vmem:[#allocation2 + $0xc8] sm:$0xff]  ;;  %v9558_v57 = vcombine.high %v9554_v53, %v9554_v53  ;;  %vm7598_vm5 = vcmask 130048   ;;  %vm7759_vm6 = vcmask 7168  }
  0x70   :  { %v7792_v10 = vcombine.high %v149_v6, %v157_v7  ;;  %v165_v13 = vld [vmem:[#allocation2 + $0x100] sm:$0xff]  ;;  %4762 = vmatprep.subr.bf16.mxu0 %v7776_v3  ;;  %v7794_v14 = vcombine.high %v150_v11, %v158_v12  ;;  %v166_v16 = vld [vmem:[#allocation2 + $0x108] sm:$0xff]  ;;  %4885 = vmatprep.subr.bf16.mxu1 %v7778_v8  ;;  %v7791_v18 = vcombine.low %v149_v6, %v157_v7 }
  0x71   :  { %v173_v15 = vld [vmem:[#allocation2 + $0x140] sm:$0xff]  ;;  %v174_v17 = vld [vmem:[#allocation2 + $0x148] sm:$0xff]  ;;  %4763 = vmatpush1.bf16.msra.mxu0 %v7775_v5  ;;  %4886 = vmatpush1.bf16.msra.mxu1 %v7777_v9  ;;  %v7793_v19 = vcombine.low %v150_v11, %v158_v12 }
  0x72   :  { %4764 = vmatprep.subr.bf16.mxu0 %v7792_v10  ;;  %v7808_v20 = vcombine.high %v165_v13, %v173_v15  ;;  %4887 = vmatprep.subr.bf16.mxu1 %v7794_v14  ;;  %v7810_v21 = vcombine.high %v166_v16, %v174_v17  ;;  %v181_v22 = vld [vmem:[#allocation2 + $0x180] sm:$0xff]  ;;  %v182_v24 = vld [vmem:[#allocation2 + $0x188] sm:$0xff]  ;;  %v7807_v26 = vcombine.low %v165_v13, %v173_v15 }
  0x73   :  { %v189_v23 = vld [vmem:[#allocation2 + $0x1c0] sm:$0xff]  ;;  %v190_v25 = vld [vmem:[#allocation2 + $0x1c8] sm:$0xff]  ;;  %v7809_v27 = vcombine.low %v166_v16, %v174_v17  ;;  %4794 = vmatprep.mubr.bf16.mxu0 %v9558_v57  ;;  %4917 = vmatprep.mubr.bf16.mxu1 %v9558_v57 }
  0x74   :  { %v7824_v28 = vcombine.high %v181_v22, %v189_v23  ;;  %v7826_v29 = vcombine.high %v182_v24, %v190_v25  ;;  %v197_v30 = vld [vmem:[#allocation2 + $0x200] sm:$0xff]  ;;  %v198_v32 = vld [vmem:[#allocation2 + $0x208] sm:$0xff]  ;;  %v7823_v34 = vcombine.low %v181_v22, %v189_v23  ;;  %v7825_v35 = vcombine.low %v182_v24, %v190_v25 }
  0x75   :  { %4765 = vmatpush1.bf16.msra.mxu0 %v7791_v18  ;;  %4888 = vmatpush1.bf16.msra.mxu1 %v7793_v19  ;;  %v205_v31 = vld [vmem:[#allocation2 + $0x240] sm:$0xff]  ;;  %v206_v33 = vld [vmem:[#allocation2 + $0x248] sm:$0xff] }
  0x76   :  { %4766 = vmatprep.subr.bf16.mxu0 %v7808_v20  ;;  %4889 = vmatprep.subr.bf16.mxu1 %v7810_v21  ;;  %v7840_v36 = vcombine.high %v197_v30, %v205_v31  ;;  %v7842_v37 = vcombine.high %v198_v32, %v206_v33  ;;  %v213_v38 = vld [vmem:[#allocation2 + $0x280] sm:$0xff]  ;;  %v214_v40 = vld [vmem:[#allocation2 + $0x288] sm:$0xff]  ;;  %v7839_v42 = vcombine.low %v197_v30, %v205_v31 }
  0x77   :  { %v221_v39 = vld [vmem:[#allocation2 + $0x2c0] sm:$0xff]  ;;  %v222_v41 = vld [vmem:[#allocation2 + $0x2c8] sm:$0xff]  ;;  %v7841_v43 = vcombine.low %v198_v32, %v206_v33 }
  0x78   :  { %v7856_v44 = vcombine.high %v213_v38, %v221_v39  ;;  %v7858_v45 = vcombine.high %v214_v40, %v222_v41  ;;  %v229_v46 = vld [vmem:[#allocation2 + $0x300] sm:$0xff]  ;;  %v230_v48 = vld [vmem:[#allocation2 + $0x308] sm:$0xff]  ;;  %v7855_v50 = vcombine.low %v213_v38, %v221_v39  ;;  %v7857_v51 = vcombine.low %v214_v40, %v222_v41 }
  0x79   :  { %4767 = vmatpush1.bf16.msra.mxu0 %v7807_v26  ;;  %4890 = vmatpush1.bf16.msra.mxu1 %v7809_v27  ;;  %v237_v47 = vld [vmem:[#allocation2 + $0x340] sm:$0xff]  ;;  %v238_v49 = vld [vmem:[#allocation2 + $0x348] sm:$0xff] }
  0x7a   :  { %4768 = vmatprep.subr.bf16.mxu0 %v7824_v28  ;;  %4891 = vmatprep.subr.bf16.mxu1 %v7826_v29  ;;  %v7872_v52 = vcombine.high %v229_v46, %v237_v47  ;;  %v7874_v54 = vcombine.high %v230_v48, %v238_v49  ;;  %v245_v55 = vld [vmem:[#allocation2 + $0x380] sm:$0xff]  ;;  %v246_v58 = vld [vmem:[#allocation2 + $0x388] sm:$0xff]  ;;  %v7871_v60 = vcombine.low %v229_v46, %v237_v47 }
  0x7b   :  { %v253_v56 = vld [vmem:[#allocation2 + $0x3c0] sm:$0xff]  ;;  %v254_v59 = vld [vmem:[#allocation2 + $0x3c8] sm:$0xff]  ;;  %v7873_v61 = vcombine.low %v230_v48, %v238_v49 }
  0x7c   :  { %v7888_v62 = vcombine.high %v245_v55, %v253_v56  ;;  %v7890_v63 = vcombine.high %v246_v58, %v254_v59  ;;  %v261_v0 = vld [vmem:[#allocation2 + $0x400] sm:$0xff]  ;;  %v262_v2 = vld [vmem:[#allocation2 + $0x408] sm:$0xff]  ;;  %v7887_v4 = vcombine.low %v245_v55, %v253_v56  ;;  %v7889_v5 = vcombine.low %v246_v58, %v254_v59 }
  0x7d   :  { %4769 = vmatpush1.bf16.msra.mxu0 %v7823_v34  ;;  %4892 = vmatpush1.bf16.msra.mxu1 %v7825_v35  ;;  %v269_v1 = vld [vmem:[#allocation2 + $0x440] sm:$0xff]  ;;  %v270_v3 = vld [vmem:[#allocation2 + $0x448] sm:$0xff] }
  0x7e   :  { %4770 = vmatprep.subr.bf16.mxu0 %v7840_v36  ;;  %4893 = vmatprep.subr.bf16.mxu1 %v7842_v37  ;;  %v7904_v6 = vcombine.high %v261_v0, %v269_v1  ;;  %v7906_v7 = vcombine.high %v262_v2, %v270_v3  ;;  %v277_v8 = vld [vmem:[#allocation2 + $0x480] sm:$0xff]  ;;  %v278_v10 = vld [vmem:[#allocation2 + $0x488] sm:$0xff]  ;;  %v7903_v12 = vcombine.low %v261_v0, %v269_v1 }
  0x7f   :  { %v285_v9 = vld [vmem:[#allocation2 + $0x4c0] sm:$0xff]  ;;  %v286_v11 = vld [vmem:[#allocation2 + $0x4c8] sm:$0xff]  ;;  %v7905_v13 = vcombine.low %v262_v2, %v270_v3 }
  0x80   :  { %v7920_v14 = vcombine.high %v277_v8, %v285_v9  ;;  %v7922_v15 = vcombine.high %v278_v10, %v286_v11  ;;  %v293_v16 = vld [vmem:[#allocation2 + $0x500] sm:$0xff]  ;;  %v294_v18 = vld [vmem:[#allocation2 + $0x508] sm:$0xff]  ;;  %v7919_v20 = vcombine.low %v277_v8, %v285_v9  ;;  %v7921_v21 = vcombine.low %v278_v10, %v286_v11 }
  0x81   :  { %4771 = vmatpush1.bf16.msra.mxu0 %v7839_v42  ;;  %4894 = vmatpush1.bf16.msra.mxu1 %v7841_v43  ;;  %v301_v17 = vld [vmem:[#allocation2 + $0x540] sm:$0xff]  ;;  %v302_v19 = vld [vmem:[#allocation2 + $0x548] sm:$0xff] }
  0x82   :  { %4772 = vmatprep.subr.bf16.mxu0 %v7856_v44  ;;  %4895 = vmatprep.subr.bf16.mxu1 %v7858_v45  ;;  %v7936_v22 = vcombine.high %v293_v16, %v301_v17  ;;  %v7938_v23 = vcombine.high %v294_v18, %v302_v19  ;;  %v309_v24 = vld [vmem:[#allocation2 + $0x580] sm:$0xff]  ;;  %v310_v26 = vld [vmem:[#allocation2 + $0x588] sm:$0xff]  ;;  %v7935_v28 = vcombine.low %v293_v16, %v301_v17 }
  0x83   :  { %v317_v25 = vld [vmem:[#allocation2 + $0x5c0] sm:$0xff]  ;;  %v318_v27 = vld [vmem:[#allocation2 + $0x5c8] sm:$0xff]  ;;  %v7937_v29 = vcombine.low %v294_v18, %v302_v19 }
  0x84   :  { %v7952_v30 = vcombine.high %v309_v24, %v317_v25  ;;  %v7954_v31 = vcombine.high %v310_v26, %v318_v27  ;;  %v325_v32 = vld [vmem:[#allocation2 + $0x600] sm:$0xff]  ;;  %v326_v34 = vld [vmem:[#allocation2 + $0x608] sm:$0xff]  ;;  %v7951_v36 = vcombine.low %v309_v24, %v317_v25  ;;  %v7953_v37 = vcombine.low %v310_v26, %v318_v27 }
  0x85   :  { %4773 = vmatpush1.bf16.msra.mxu0 %v7855_v50  ;;  %4896 = vmatpush1.bf16.msra.mxu1 %v7857_v51  ;;  %v333_v33 = vld [vmem:[#allocation2 + $0x640] sm:$0xff]  ;;  %v334_v35 = vld [vmem:[#allocation2 + $0x648] sm:$0xff] }
  0x86   :  { %4774 = vmatprep.subr.bf16.mxu0 %v7872_v52  ;;  %4897 = vmatprep.subr.bf16.mxu1 %v7874_v54  ;;  %v7968_v38 = vcombine.high %v325_v32, %v333_v33  ;;  %v7970_v39 = vcombine.high %v326_v34, %v334_v35  ;;  %v341_v40 = vld [vmem:[#allocation2 + $0x680] sm:$0xff]  ;;  %v342_v42 = vld [vmem:[#allocation2 + $0x688] sm:$0xff]  ;;  %v7967_v44 = vcombine.low %v325_v32, %v333_v33 }
  0x87   :  { %v349_v41 = vld [vmem:[#allocation2 + $0x6c0] sm:$0xff]  ;;  %v350_v43 = vld [vmem:[#allocation2 + $0x6c8] sm:$0xff]  ;;  %v7969_v45 = vcombine.low %v326_v34, %v334_v35 }
  0x88   :  { %v7984_v46 = vcombine.high %v341_v40, %v349_v41  ;;  %v7986_v47 = vcombine.high %v342_v42, %v350_v43  ;;  %v357_v48 = vld [vmem:[#allocation2 + $0x700] sm:$0xff]  ;;  %v358_v50 = vld [vmem:[#allocation2 + $0x708] sm:$0xff]  ;;  %v7983_v52 = vcombine.low %v341_v40, %v349_v41  ;;  %v7985_v54 = vcombine.low %v342_v42, %v350_v43 }
  0x89   :  { %4775 = vmatpush1.bf16.msra.mxu0 %v7871_v60  ;;  %4898 = vmatpush1.bf16.msra.mxu1 %v7873_v61  ;;  %v365_v49 = vld [vmem:[#allocation2 + $0x740] sm:$0xff]  ;;  %v366_v51 = vld [vmem:[#allocation2 + $0x748] sm:$0xff] }
  0x8a   :  { %4776 = vmatprep.subr.bf16.mxu0 %v7888_v62  ;;  %4899 = vmatprep.subr.bf16.mxu1 %v7890_v63  ;;  %v8000_v55 = vcombine.high %v357_v48, %v365_v49  ;;  %v8002_v56 = vcombine.high %v358_v50, %v366_v51  ;;  %v373_v58 = vld [vmem:[#allocation2 + $0x780] sm:$0xff]  ;;  %v374_v60 = vld [vmem:[#allocation2 + $0x788] sm:$0xff]  ;;  %v7999_v62 = vcombine.low %v357_v48, %v365_v49 }
  0x8b   :  { %v381_v59 = vld [vmem:[#allocation2 + $0x7c0] sm:$0xff]  ;;  %v382_v61 = vld [vmem:[#allocation2 + $0x7c8] sm:$0xff]  ;;  %v8001_v63 = vcombine.low %v358_v50, %v366_v51 }
  0x8c   :  { %v8016_v0 = vcombine.high %v373_v58, %v381_v59  ;;  %v8018_v1 = vcombine.high %v374_v60, %v382_v61  ;;  %v389_v2 = vld [vmem:[#allocation2 + $0x800] sm:$0xff] }
  0x8d   :  { %4777 = vmatpush1.bf16.msra.mxu0 %v7887_v4  ;;  %4900 = vmatpush1.bf16.msra.mxu1 %v7889_v5  ;;  %v397_v3 = vld [vmem:[#allocation2 + $0x840] sm:$0xff]  ;;  %v390_v4 = vld [vmem:[#allocation2 + $0x808] sm:$0xff] }
  0x8e   :  { %4778 = vmatprep.subr.bf16.mxu0 %v7904_v6  ;;  %4901 = vmatprep.subr.bf16.mxu1 %v7906_v7  ;;  %v398_v5 = vld [vmem:[#allocation2 + $0x848] sm:$0xff]  ;;  %v8015_v6 = vcombine.low %v373_v58, %v381_v59  ;;  %v8017_v7 = vcombine.low %v374_v60, %v382_v61  ;;  %v8032_v8 = vcombine.high %v389_v2, %v397_v3  ;;  %v405_v10 = vld [vmem:[#allocation2 + $0x880] sm:$0xff] }
  0x8f   :  { %v8034_v9 = vcombine.high %v390_v4, %v398_v5  ;;  %v413_v11 = vld [vmem:[#allocation2 + $0x8c0] sm:$0xff]  ;;  %v8031_v16 = vcombine.low %v389_v2, %v397_v3  ;;  %v8033_v17 = vcombine.low %v390_v4, %v398_v5 }
  0x90   :  { %v8048_v18 = vcombine.high %v405_v10, %v413_v11  ;;  %v421_v19 = vld [vmem:[#allocation2 + $0x900] sm:$0xff]  ;;  %v8047_v24 = vcombine.low %v405_v10, %v413_v11 }
  0x91   :  { %4779 = vmatpush1.bf16.msra.mxu0 %v7903_v12  ;;  %4902 = vmatpush1.bf16.msra.mxu1 %v7905_v13  ;;  %v9564_v12 = vcombine.low %v9554_v53, %v9554_v53  ;;  %v406_v13 = vld [vmem:[#allocation2 + $0x888] sm:$0xff]  ;;  %v437_v27 = vld [vmem:[#allocation2 + $0x980] sm:$0xff] }
  0x92   :  { %4780 = vmatprep.subr.bf16.mxu0 %v7920_v14  ;;  %4903 = vmatprep.subr.bf16.mxu1 %v7922_v15  ;;  %v414_v14 = vld [vmem:[#allocation2 + $0x8c8] sm:$0xff]  ;;  %v9569_v15 = vld [vmem:[%s9817_s1 + $0x8] sm:$0xff]  ;;  %v453_v35 = vld [vmem:[#allocation2 + $0xa00] sm:$0xff] }
  0x93   :  { %v430_v53 = vld [vmem:[#allocation2 + $0x948] sm:$0xff]  ;;  %v8049_v25 = vcombine.low %v406_v13, %v414_v14  ;;  %v469_v43 = vld [vmem:[#allocation2 + $0xa80] sm:$0xff] }
  0x94   :  { %v485_v51 = vld [vmem:[#allocation2 + $0xb00] sm:$0xff] }
  0x95   :  { %4781 = vmatpush1.bf16.msra.mxu0 %v7919_v20  ;;  %4904 = vmatpush1.bf16.msra.mxu1 %v7921_v21  ;;  %v429_v20 = vld [vmem:[#allocation2 + $0x940] sm:$0xff]  ;;  %v422_v21 = vld [vmem:[#allocation2 + $0x908] sm:$0xff] }
  0x96   :  { %4782 = vmatprep.subr.bf16.mxu0 %v7936_v22  ;;  %4905 = vmatprep.subr.bf16.mxu1 %v7938_v23  ;;  %v8050_v22 = vcombine.high %v406_v13, %v414_v14  ;;  %v9573_v23 = vcombine.high %v9569_v15, %v9569_v15  ;;  %v8064_v26 = vcombine.high %v421_v19, %v429_v20  ;;  %v501_v61 = vld [vmem:[#allocation2 + $0xb80] sm:$0xff] }
  0x97   :  { %v8063_v32 = vcombine.low %v421_v19, %v429_v20  ;;  %v8065_v33 = vcombine.low %v422_v21, %v430_v53  ;;  %v517_v5 = vld [vmem:[#allocation2 + $0xc00] sm:$0xff]  ;;  %v542_v19 = vld [vmem:[#allocation2 + $0xcc8] sm:$0xff] }
  0x98   :  { %v533_v14 = vld [vmem:[#allocation2 + $0xc80] sm:$0xff] }
  0x99   :  { %4783 = vmatpush1.bf16.msra.mxu0 %v7935_v28  ;;  %4906 = vmatpush1.bf16.msra.mxu1 %v7937_v29  ;;  %v445_v28 = vld [vmem:[#allocation2 + $0x9c0] sm:$0xff]  ;;  %v438_v29 = vld [vmem:[#allocation2 + $0x988] sm:$0xff] }
  0x9a   :  { %4784 = vmatprep.subr.bf16.mxu0 %v7952_v30  ;;  %4907 = vmatprep.subr.bf16.mxu1 %v7954_v31  ;;  %v8066_v30 = vcombine.high %v422_v21, %v430_v53  ;;  %v446_v31 = vld [vmem:[#allocation2 + $0x9c8] sm:$0xff]  ;;  %v8080_v34 = vcombine.high %v437_v27, %v445_v28  ;;  %v8079_v40 = vcombine.low %v437_v27, %v445_v28  ;;  %v549_v53 = vld [vmem:[#allocation2 + $0xd00] sm:$0xff] }
  0x9b   :  { %v8081_v41 = vcombine.low %v438_v29, %v446_v31  ;;  %v558_v27 = vld [vmem:[#allocation2 + $0xd48] sm:$0xff] }
  0x9d   :  { %4785 = vmatpush1.bf16.msra.mxu0 %v7951_v36  ;;  %4908 = vmatpush1.bf16.msra.mxu1 %v7953_v37  ;;  %v461_v36 = vld [vmem:[#allocation2 + $0xa40] sm:$0xff]  ;;  %v454_v37 = vld [vmem:[#allocation2 + $0xa08] sm:$0xff] }
  0x9e   :  { %4786 = vmatprep.subr.bf16.mxu0 %v7968_v38  ;;  %4909 = vmatprep.subr.bf16.mxu1 %v7970_v39  ;;  %v8082_v38 = vcombine.high %v438_v29, %v446_v31  ;;  %v462_v39 = vld [vmem:[#allocation2 + $0xa48] sm:$0xff]  ;;  %v8096_v42 = vcombine.high %v453_v35, %v461_v36  ;;  %v8095_v48 = vcombine.low %v453_v35, %v461_v36  ;;  %v565_v31 = vld [vmem:[#allocation2 + $0xd80] sm:$0xff] }
  0x9f   :  { %v8097_v49 = vcombine.low %v454_v37, %v462_v39  ;;  %v574_v35 = vld [vmem:[#allocation2 + $0xdc8] sm:$0xff] }
  0xa1   :  { %4787 = vmatpush1.bf16.msra.mxu0 %v7967_v44  ;;  %4910 = vmatpush1.bf16.msra.mxu1 %v7969_v45  ;;  %v477_v44 = vld [vmem:[#allocation2 + $0xac0] sm:$0xff]  ;;  %v470_v45 = vld [vmem:[#allocation2 + $0xa88] sm:$0xff] }
  0xa2   :  { %4788 = vmatprep.subr.bf16.mxu0 %v7984_v46  ;;  %4911 = vmatprep.subr.bf16.mxu1 %v7986_v47  ;;  %v8098_v46 = vcombine.high %v454_v37, %v462_v39  ;;  %v478_v47 = vld [vmem:[#allocation2 + $0xac8] sm:$0xff]  ;;  %v8112_v50 = vcombine.high %v469_v43, %v477_v44  ;;  %v8111_v58 = vcombine.low %v469_v43, %v477_v44  ;;  %v581_v39 = vld [vmem:[#allocation2 + $0xe00] sm:$0xff] }
  0xa3   :  { %v8113_v59 = vcombine.low %v470_v45, %v478_v47  ;;  %v590_v43 = vld [vmem:[#allocation2 + $0xe48] sm:$0xff] }
  0xa5   :  { %4789 = vmatpush1.bf16.msra.mxu0 %v7983_v52  ;;  %4912 = vmatpush1.bf16.msra.mxu1 %v7985_v54  ;;  %v493_v52 = vld [vmem:[#allocation2 + $0xb40] sm:$0xff]  ;;  %v486_v54 = vld [vmem:[#allocation2 + $0xb08] sm:$0xff] }
  0xa6   :  { %4790 = vmatprep.subr.bf16.mxu0 %v8000_v55  ;;  %4913 = vmatprep.subr.bf16.mxu1 %v8002_v56  ;;  %v8114_v55 = vcombine.high %v470_v45, %v478_v47  ;;  %v494_v56 = vld [vmem:[#allocation2 + $0xb48] sm:$0xff]  ;;  %v8128_v60 = vcombine.high %v485_v51, %v493_v52  ;;  %v8127_v2 = vcombine.low %v485_v51, %v493_v52  ;;  %v597_v47 = vld [vmem:[#allocation2 + $0xe80] sm:$0xff] }
  0xa7   :  { %v8129_v3 = vcombine.low %v486_v54, %v494_v56  ;;  %v606_v51 = vld [vmem:[#allocation2 + $0xec8] sm:$0xff] }
  0xa9   :  { %4791 = vmatpush1.bf16.msra.mxu0 %v7999_v62  ;;  %4914 = vmatpush1.bf16.msra.mxu1 %v8001_v63  ;;  %v509_v62 = vld [vmem:[#allocation2 + $0xbc0] sm:$0xff]  ;;  %v502_v63 = vld [vmem:[#allocation2 + $0xb88] sm:$0xff] }
  0xaa   :  { %4792 = vmatprep.subr.bf16.mxu0 %v8016_v0  ;;  %4915 = vmatprep.subr.bf16.mxu1 %v8018_v1  ;;  %v8130_v0 = vcombine.high %v486_v54, %v494_v56  ;;  %v510_v1 = vld [vmem:[#allocation2 + $0xbc8] sm:$0xff]  ;;  %v8144_v4 = vcombine.high %v501_v61, %v509_v62  ;;  %v8143_v10 = vcombine.low %v501_v61, %v509_v62  ;;  %v613_v56 = vld [vmem:[#allocation2 + $0xf00] sm:$0xff] }
  0xab   :  { %v8145_v11 = vcombine.low %v502_v63, %v510_v1  ;;  %v622_v61 = vld [vmem:[#allocation2 + $0xf48] sm:$0xff] }
  0xad   :  { %4793 = vmatpush1.bf16.msra.mxu0 %v8015_v6  ;;  %4916 = vmatpush1.bf16.msra.mxu1 %v8017_v7  ;;  %v525_v6 = vld [vmem:[#allocation2 + $0xc40] sm:$0xff]  ;;  %v518_v7 = vld [vmem:[#allocation2 + $0xc08] sm:$0xff] }
  0xae   :  { %4803 = vmatprep.subr.bf16.mxu0 %v8032_v8  ;;  %4926 = vmatprep.subr.bf16.mxu1 %v8034_v9  ;;  %v8146_v8 = vcombine.high %v502_v63, %v510_v1  ;;  %v526_v9 = vld [vmem:[#allocation2 + $0xc48] sm:$0xff]  ;;  %v8160_v13 = vcombine.high %v517_v5, %v525_v6  ;;  %v8159_v20 = vcombine.low %v517_v5, %v525_v6  ;;  %v629_v1 = vld [vmem:[#allocation2 + $0xf80] sm:$0xff] }
  0xaf   :  { %v8161_v21 = vcombine.low %v518_v7, %v526_v9  ;;  %v638_v5 = vld [vmem:[#allocation2 + $0xfc8] sm:$0xff] }
  0xb0   :  { %4795 = vmatmul.mubr.bf16.vlgmr.msra.gmra.mrb[0].mxu0 %v9564_v12  ;;  %4918 = vmatmul.mubr.bf16.vlgmr.msra.gmra.mrb[0].mxu1 %v9564_v12 }
  0xb1   :  { %4804 = vmatpush1.bf16.msra.mxu0 %v8031_v16  ;;  %4927 = vmatpush1.bf16.msra.mxu1 %v8033_v17  ;;  %v541_v16 = vld [vmem:[#allocation2 + $0xcc0] sm:$0xff]  ;;  %v534_v17 = vld [vmem:[#allocation2 + $0xc88] sm:$0xff] }
  0xb2   :  { %4805 = vmatprep.subr.bf16.mxu0 %v8048_v18  ;;  %4928 = vmatprep.subr.bf16.mxu1 %v8050_v22  ;;  %v8162_v18 = vcombine.high %v518_v7, %v526_v9  ;;  %v8176_v22 = vcombine.high %v533_v14, %v541_v16  ;;  %v8175_v28 = vcombine.low %v533_v14, %v541_v16  ;;  %v645_v9 = vld [vmem:[#allocation2 + $0x1000] sm:$0xff]  ;;  %v654_v14 = vld [vmem:[#allocation2 + $0x1048] sm:$0xff] }
  0xb3   :  { %4835 = vmatprep.mubr.bf16.mxu0 %v9573_v23  ;;  %4958 = vmatprep.mubr.bf16.mxu1 %v9573_v23  ;;  %v8177_v29 = vcombine.low %v534_v17, %v542_v19 }
  0xb5   :  { %4806 = vmatpush1.bf16.msra.mxu0 %v8047_v24  ;;  %4929 = vmatpush1.bf16.msra.mxu1 %v8049_v25  ;;  %v557_v24 = vld [vmem:[#allocation2 + $0xd40] sm:$0xff]  ;;  %v550_v25 = vld [vmem:[#allocation2 + $0xd08] sm:$0xff] }
  0xb6   :  { %4807 = vmatprep.subr.bf16.mxu0 %v8064_v26  ;;  %4930 = vmatprep.subr.bf16.mxu1 %v8066_v30  ;;  %v8178_v26 = vcombine.high %v534_v17, %v542_v19  ;;  %v8192_v30 = vcombine.high %v549_v53, %v557_v24  ;;  %v8191_v36 = vcombine.low %v549_v53, %v557_v24  ;;  %v661_v17 = vld [vmem:[#allocation2 + $0x1080] sm:$0xff] }
  0xb7   :  { %v8193_v37 = vcombine.low %v550_v25, %v558_v27  ;;  %v9582_v24 = vld [vmem:[%s9817_s1 + $0x10] sm:$0xff] }
  0xb9   :  { %4808 = vmatpush1.bf16.msra.mxu0 %v8063_v32  ;;  %4931 = vmatpush1.bf16.msra.mxu1 %v8065_v33  ;;  %v573_v32 = vld [vmem:[#allocation2 + $0xdc0] sm:$0xff]  ;;  %v566_v33 = vld [vmem:[#allocation2 + $0xd88] sm:$0xff] }
  0xba   :  { %4809 = vmatprep.subr.bf16.mxu0 %v8080_v34  ;;  %4932 = vmatprep.subr.bf16.mxu1 %v8082_v38  ;;  %v8194_v34 = vcombine.high %v550_v25, %v558_v27  ;;  %v8208_v38 = vcombine.high %v565_v31, %v573_v32  ;;  %v8207_v44 = vcombine.low %v565_v31, %v573_v32  ;;  %v678_v31 = vld [vmem:[#allocation2 + $0x1108] sm:$0xff] }
  0xbb   :  { %v8209_v45 = vcombine.low %v566_v33, %v574_v35  ;;  %v9586_v25 = vcombine.low %v9569_v15, %v9569_v15 }
  0xbd   :  { %4810 = vmatpush1.bf16.msra.mxu0 %v8079_v40  ;;  %4933 = vmatpush1.bf16.msra.mxu1 %v8081_v41  ;;  %v589_v40 = vld [vmem:[#allocation2 + $0xe40] sm:$0xff]  ;;  %v582_v41 = vld [vmem:[#allocation2 + $0xe08] sm:$0xff] }
  0xbe   :  { %4811 = vmatprep.subr.bf16.mxu0 %v8096_v42  ;;  %4934 = vmatprep.subr.bf16.mxu1 %v8098_v46  ;;  %v8210_v42 = vcombine.high %v566_v33, %v574_v35  ;;  %v8224_v46 = vcombine.high %v581_v39, %v589_v40  ;;  %v8223_v52 = vcombine.low %v581_v39, %v589_v40  ;;  %v686_v33 = vld [vmem:[#allocation2 + $0x1148] sm:$0xff] }
  0xbf   :  { %v8225_v54 = vcombine.low %v582_v41, %v590_v43  ;;  %v694_v39 = vld [vmem:[#allocation2 + $0x1188] sm:$0xff]  ;;  %v8322_v40 = vcombine.high %v678_v31, %v686_v33 }
  0xc1   :  { %4812 = vmatpush1.bf16.msra.mxu0 %v8095_v48  ;;  %4935 = vmatpush1.bf16.msra.mxu1 %v8097_v49  ;;  %v605_v48 = vld [vmem:[#allocation2 + $0xec0] sm:$0xff]  ;;  %v598_v49 = vld [vmem:[#allocation2 + $0xe88] sm:$0xff] }
  0xc2   :  { %4813 = vmatprep.subr.bf16.mxu0 %v8112_v50  ;;  %4936 = vmatprep.subr.bf16.mxu1 %v8114_v55  ;;  %v8226_v50 = vcombine.high %v582_v41, %v590_v43  ;;  %v8240_v55 = vcombine.high %v597_v47, %v605_v48  ;;  %v8239_v62 = vcombine.low %v597_v47, %v605_v48  ;;  %v702_v41 = vld [vmem:[#allocation2 + $0x11c8] sm:$0xff] }
  0xc3   :  { %v8241_v63 = vcombine.low %v598_v49, %v606_v51  ;;  %v8321_v43 = vcombine.low %v678_v31, %v686_v33  ;;  %v710_v47 = vld [vmem:[#allocation2 + $0x1208] sm:$0xff]  ;;  %v8338_v48 = vcombine.high %v694_v39, %v702_v41 }
  0xc4   :  { %v798_v31 = vld [vmem:[#allocation2 + $0x14c8] sm:$0xff] }
  0xc5   :  { %4814 = vmatpush1.bf16.msra.mxu0 %v8111_v58  ;;  %4937 = vmatpush1.bf16.msra.mxu1 %v8113_v59  ;;  %v621_v58 = vld [vmem:[#allocation2 + $0xf40] sm:$0xff]  ;;  %v614_v59 = vld [vmem:[#allocation2 + $0xf08] sm:$0xff] }
  0xc6   :  { %4815 = vmatprep.subr.bf16.mxu0 %v8128_v60  ;;  %4938 = vmatprep.subr.bf16.mxu1 %v8130_v0  ;;  %v8242_v60 = vcombine.high %v598_v49, %v606_v51  ;;  %v8256_v0 = vcombine.high %v613_v56, %v621_v58  ;;  %v8255_v6 = vcombine.low %v613_v56, %v621_v58  ;;  %v718_v49 = vld [vmem:[#allocation2 + $0x1248] sm:$0xff] }
  0xc7   :  { %v8257_v7 = vcombine.low %v614_v59, %v622_v61  ;;  %v8337_v51 = vcombine.low %v694_v39, %v702_v41  ;;  %v726_v56 = vld [vmem:[#allocation2 + $0x1288] sm:$0xff]  ;;  %v8354_v58 = vcombine.high %v710_v47, %v718_v49 }
  0xc8   :  { %v814_v39 = vld [vmem:[#allocation2 + $0x1548] sm:$0xff] }
  0xc9   :  { %4816 = vmatpush1.bf16.msra.mxu0 %v8127_v2  ;;  %4939 = vmatpush1.bf16.msra.mxu1 %v8129_v3  ;;  %v637_v2 = vld [vmem:[#allocation2 + $0xfc0] sm:$0xff]  ;;  %v630_v3 = vld [vmem:[#allocation2 + $0xf88] sm:$0xff] }
  0xca   :  { %4817 = vmatprep.subr.bf16.mxu0 %v8144_v4  ;;  %4940 = vmatprep.subr.bf16.mxu1 %v8146_v8  ;;  %v8258_v4 = vcombine.high %v614_v59, %v622_v61  ;;  %v8272_v8 = vcombine.high %v629_v1, %v637_v2  ;;  %v8271_v16 = vcombine.low %v629_v1, %v637_v2  ;;  %v734_v59 = vld [vmem:[#allocation2 + $0x12c8] sm:$0xff] }
  0xcb   :  { %v8353_v61 = vcombine.low %v710_v47, %v718_v49  ;;  %v742_v1 = vld [vmem:[#allocation2 + $0x1308] sm:$0xff]  ;;  %v8370_v2 = vcombine.high %v726_v56, %v734_v59 }
  0xcc   :  { %v830_v47 = vld [vmem:[#allocation2 + $0x15c8] sm:$0xff] }
  0xcd   :  { %4818 = vmatpush1.bf16.msra.mxu0 %v8143_v10  ;;  %4941 = vmatpush1.bf16.msra.mxu1 %v8145_v11  ;;  %v653_v10 = vld [vmem:[#allocation2 + $0x1040] sm:$0xff]  ;;  %v646_v11 = vld [vmem:[#allocation2 + $0x1008] sm:$0xff] }
  0xce   :  { %4819 = vmatprep.subr.bf16.mxu0 %v8160_v13  ;;  %4942 = vmatprep.subr.bf16.mxu1 %v8162_v18  ;;  %v8274_v13 = vcombine.high %v630_v3, %v638_v5  ;;  %v8273_v18 = vcombine.low %v630_v3, %v638_v5  ;;  %v8288_v19 = vcombine.high %v645_v9, %v653_v10  ;;  %v750_v3 = vld [vmem:[#allocation2 + $0x1348] sm:$0xff] }
  0xcf   :  { %v8290_v53 = vcombine.high %v646_v11, %v654_v14  ;;  %v8289_v27 = vcombine.low %v646_v11, %v654_v14  ;;  %v8369_v5 = vcombine.low %v726_v56, %v734_v59  ;;  %v766_v11 = vld [vmem:[#allocation2 + $0x13c8] sm:$0xff]  ;;  %v8385_v14 = vcombine.low %v742_v1, %v750_v3 }
  0xd0   :  { %v846_v56 = vld [vmem:[#allocation2 + $0x1648] sm:$0xff] }
  0xd1   :  { %4820 = vmatpush1.bf16.msra.mxu0 %v8159_v20  ;;  %4943 = vmatpush1.bf16.msra.mxu1 %v8161_v21  ;;  %v669_v20 = vld [vmem:[#allocation2 + $0x10c0] sm:$0xff]  ;;  %v662_v21 = vld [vmem:[#allocation2 + $0x1088] sm:$0xff] }
  0xd2   :  { %4821 = vmatprep.subr.bf16.mxu0 %v8176_v22  ;;  %4944 = vmatprep.subr.bf16.mxu1 %v8178_v26  ;;  %v670_v22 = vld [vmem:[#allocation2 + $0x10c8] sm:$0xff]  ;;  %v8287_v26 = vcombine.low %v645_v9, %v653_v10  ;;  %v8303_v15 = vcombine.low %v661_v17, %v669_v20  ;;  %v8386_v10 = vcombine.high %v742_v1, %v750_v3 }
  0xd3   :  { %v8306_v32 = vcombine.high %v662_v21, %v670_v22  ;;  %v8305_v35 = vcombine.low %v662_v21, %v670_v22  ;;  %v758_v9 = vld [vmem:[#allocation2 + $0x1388] sm:$0xff] }
  0xd4   :  { %v782_v21 = vld [vmem:[#allocation2 + $0x1448] sm:$0xff] }
  0xd5   :  { %4822 = vmatpush1.bf16.msra.mxu0 %v8175_v28  ;;  %4945 = vmatpush1.bf16.msra.mxu1 %v8177_v29  ;;  %v8304_v28 = vcombine.high %v661_v17, %v669_v20  ;;  %v677_v29 = vld [vmem:[#allocation2 + $0x1100] sm:$0xff]  ;;  %v8402_v20 = vcombine.high %v758_v9, %v766_v11  ;;  %v862_v1 = vld [vmem:[#allocation2 + $0x16c8] sm:$0xff] }
  0xd6   :  { %4823 = vmatprep.subr.bf16.mxu0 %v8192_v30  ;;  %4946 = vmatprep.subr.bf16.mxu1 %v8194_v34  ;;  %v685_v30 = vld [vmem:[#allocation2 + $0x1140] sm:$0xff]  ;;  %v9590_v34 = vcombine.high %v9582_v24, %v9582_v24 }
  0xd7   :  { %v773_v17 = vld [vmem:[#allocation2 + $0x1400] sm:$0xff] }
  0xd9   :  { %4824 = vmatpush1.bf16.msra.mxu0 %v8191_v36  ;;  %4947 = vmatpush1.bf16.msra.mxu1 %v8193_v37  ;;  %v8320_v36 = vcombine.high %v677_v29, %v685_v30  ;;  %v693_v37 = vld [vmem:[#allocation2 + $0x1180] sm:$0xff] }
  0xda   :  { %4825 = vmatprep.subr.bf16.mxu0 %v8208_v38  ;;  %4948 = vmatprep.subr.bf16.mxu1 %v8210_v42  ;;  %v701_v38 = vld [vmem:[#allocation2 + $0x11c0] sm:$0xff]  ;;  %v8319_v42 = vcombine.low %v677_v29, %v685_v30  ;;  %v790_v29 = vld [vmem:[#allocation2 + $0x1488] sm:$0xff] }
  0xdb   :  { %v8433_v41 = vcombine.low %v790_v29, %v798_v31 }
  0xdd   :  { %4826 = vmatpush1.bf16.msra.mxu0 %v8207_v44  ;;  %4949 = vmatpush1.bf16.msra.mxu1 %v8209_v45  ;;  %v8336_v44 = vcombine.high %v693_v37, %v701_v38  ;;  %v709_v45 = vld [vmem:[#allocation2 + $0x1200] sm:$0xff] }
  0xde   :  { %4827 = vmatprep.subr.bf16.mxu0 %v8224_v46  ;;  %4950 = vmatprep.subr.bf16.mxu1 %v8226_v50  ;;  %v717_v46 = vld [vmem:[#allocation2 + $0x1240] sm:$0xff]  ;;  %v8335_v50 = vcombine.low %v693_v37, %v701_v38  ;;  %v806_v37 = vld [vmem:[#allocation2 + $0x1508] sm:$0xff]  ;;  %v8434_v38 = vcombine.high %v790_v29, %v798_v31  ;;  %v144_v29 = vld [vmem:[#allocation2 + $0x58] sm:$0xff] }
  0xdf   :  { %v8449_v49 = vcombine.low %v806_v37, %v814_v39 }
  0xe1   :  { %4828 = vmatpush1.bf16.msra.mxu0 %v8223_v52  ;;  %4951 = vmatpush1.bf16.msra.mxu1 %v8225_v54  ;;  %v8352_v52 = vcombine.high %v709_v45, %v717_v46  ;;  %v725_v54 = vld [vmem:[#allocation2 + $0x1280] sm:$0xff] }
  0xe2   :  { %4829 = vmatprep.subr.bf16.mxu0 %v8240_v55  ;;  %4952 = vmatprep.subr.bf16.mxu1 %v8242_v60  ;;  %v733_v55 = vld [vmem:[#allocation2 + $0x12c0] sm:$0xff]  ;;  %v8351_v60 = vcombine.low %v709_v45, %v717_v46  ;;  %v822_v45 = vld [vmem:[#allocation2 + $0x1588] sm:$0xff]  ;;  %v8450_v46 = vcombine.high %v806_v37, %v814_v39  ;;  %v160_v37 = vld [vmem:[#allocation2 + $0xd8] sm:$0xff] }
  0xe3   :  { %v8465_v59 = vcombine.low %v822_v45, %v830_v47 }
  0xe5   :  { %4830 = vmatpush1.bf16.msra.mxu0 %v8239_v62  ;;  %4953 = vmatpush1.bf16.msra.mxu1 %v8241_v63  ;;  %v8368_v62 = vcombine.high %v725_v54, %v733_v55  ;;  %v741_v63 = vld [vmem:[#allocation2 + $0x1300] sm:$0xff] }
  0xe6   :  { %4831 = vmatprep.subr.bf16.mxu0 %v8256_v0  ;;  %4954 = vmatprep.subr.bf16.mxu1 %v8258_v4  ;;  %v749_v0 = vld [vmem:[#allocation2 + $0x1340] sm:$0xff]  ;;  %v8367_v4 = vcombine.low %v725_v54, %v733_v55  ;;  %v838_v54 = vld [vmem:[#allocation2 + $0x1608] sm:$0xff]  ;;  %v8466_v55 = vcombine.high %v822_v45, %v830_v47 }
  0xe7   :  { %v8481_v3 = vcombine.low %v838_v54, %v846_v56 }
  0xe9   :  { %4832 = vmatpush1.bf16.msra.mxu0 %v8255_v6  ;;  %4955 = vmatpush1.bf16.msra.mxu1 %v8257_v7  ;;  %v8384_v6 = vcombine.high %v741_v63, %v749_v0  ;;  %v757_v7 = vld [vmem:[#allocation2 + $0x1380] sm:$0xff] }
  0xea   :  { %4833 = vmatprep.subr.bf16.mxu0 %v8272_v8  ;;  %4956 = vmatprep.subr.bf16.mxu1 %v8274_v13  ;;  %v765_v8 = vld [vmem:[#allocation2 + $0x13c0] sm:$0xff]  ;;  %v8383_v13 = vcombine.low %v741_v63, %v749_v0  ;;  %v854_v63 = vld [vmem:[#allocation2 + $0x1688] sm:$0xff]  ;;  %v8482_v0 = vcombine.high %v838_v54, %v846_v56  ;;  %v192_v54 = vld [vmem:[#allocation2 + $0x1d8] sm:$0xff] }
  0xeb   :  { %v8399_v22 = vcombine.low %v757_v7, %v765_v8 }
  0xed   :  { %4834 = vmatpush1.bf16.msra.mxu0 %v8271_v16  ;;  %4957 = vmatpush1.bf16.msra.mxu1 %v8273_v18  ;;  %v8400_v16 = vcombine.high %v757_v7, %v765_v8  ;;  %v781_v18 = vld [vmem:[#allocation2 + $0x1440] sm:$0xff]  ;;  %v870_v7 = vld [vmem:[#allocation2 + $0x1708] sm:$0xff]  ;;  %v8498_v8 = vcombine.high %v854_v63, %v862_v1 }
  0xee   :  { %4844 = vmatprep.subr.bf16.mxu0 %v8288_v19  ;;  %4967 = vmatprep.subr.bf16.mxu1 %v8290_v53  ;;  %v774_v19 = vld [vmem:[#allocation2 + $0x1408] sm:$0xff]  ;;  %v8401_v53 = vcombine.low %v758_v9, %v766_v11  ;;  %v8497_v11 = vcombine.low %v854_v63, %v862_v1  ;;  %v208_v63 = vld [vmem:[#allocation2 + $0x258] sm:$0xff] }
  0xef   :  { %v8418_v30 = vcombine.high %v774_v19, %v782_v21  ;;  %v8417_v33 = vcombine.low %v774_v19, %v782_v21  ;;  %v878_v9 = vld [vmem:[#allocation2 + $0x1748] sm:$0xff] }
  0xf0   :  { %4836 = vmatmul.mubr.bf16.vlgmr.msra.gmra.mrb[0].mxu0 %v9586_v25  ;;  %4959 = vmatmul.mubr.bf16.vlgmr.msra.gmra.mrb[0].mxu1 %v9586_v25  ;;  %v894_v19 = vld [vmem:[#allocation2 + $0x17c8] sm:$0xff]  ;;  %v8513_v21 = vcombine.low %v870_v7, %v878_v9 }
  0xf1   :  { %4845 = vmatpush1.bf16.msra.mxu0 %v8287_v26  ;;  %4968 = vmatpush1.bf16.msra.mxu1 %v8289_v27  ;;  %v8416_v26 = vcombine.high %v773_v17, %v781_v18  ;;  %v789_v27 = vld [vmem:[#allocation2 + $0x1480] sm:$0xff] }
  0xf2   :  { %4846 = vmatprep.subr.bf16.mxu0 %v8304_v28  ;;  %4969 = vmatprep.subr.bf16.mxu1 %v8306_v32  ;;  %v797_v28 = vld [vmem:[#allocation2 + $0x14c0] sm:$0xff]  ;;  %v8415_v32 = vcombine.low %v773_v17, %v781_v18  ;;  %v886_v17 = vld [vmem:[#allocation2 + $0x1788] sm:$0xff]  ;;  %v8514_v18 = vcombine.high %v870_v7, %v878_v9  ;;  %v224_v7 = vld [vmem:[#allocation2 + $0x2d8] sm:$0xff] }
  0xf3   :  { %4876 = vmatprep.mubr.bf16.mxu0 %v9590_v34  ;;  %4999 = vmatprep.mubr.bf16.mxu1 %v9590_v34  ;;  %v8529_v31 = vcombine.low %v886_v17, %v894_v19 }
  0xf5   :  { %4847 = vmatpush1.bf16.msra.mxu0 %v8303_v15  ;;  %4970 = vmatpush1.bf16.msra.mxu1 %v8305_v35  ;;  %v8432_v15 = vcombine.high %v789_v27, %v797_v28  ;;  %v805_v35 = vld [vmem:[#allocation2 + $0x1500] sm:$0xff] }
  0xf6   :  { %4848 = vmatprep.subr.bf16.mxu0 %v8320_v36  ;;  %4971 = vmatprep.subr.bf16.mxu1 %v8322_v40  ;;  %v813_v36 = vld [vmem:[#allocation2 + $0x1540] sm:$0xff]  ;;  %v8431_v40 = vcombine.low %v789_v27, %v797_v28  ;;  %v136_v27 = vld [vmem:[#allocation2 + $0x18] sm:$0xff]  ;;  %v8530_v28 = vcombine.high %v886_v17, %v894_v19 }
  0xf7   :  { %v240_v17 = vld [vmem:[#allocation2 + $0x358] sm:$0xff] }
  0xf9   :  { %4849 = vmatpush1.bf16.msra.mxu0 %v8319_v42  ;;  %4972 = vmatpush1.bf16.msra.mxu1 %v8321_v43  ;;  %v8448_v42 = vcombine.high %v805_v35, %v813_v36  ;;  %v821_v43 = vld [vmem:[#allocation2 + $0x1580] sm:$0xff] }
  0xfa   :  { %4850 = vmatprep.subr.bf16.mxu0 %v8336_v44  ;;  %4973 = vmatprep.subr.bf16.mxu1 %v8338_v48  ;;  %v829_v44 = vld [vmem:[#allocation2 + $0x15c0] sm:$0xff]  ;;  %v8447_v48 = vcombine.low %v805_v35, %v813_v36  ;;  %v152_v35 = vld [vmem:[#allocation2 + $0x98] sm:$0xff]  ;;  %v7782_v36 = vcombine.high %v136_v27, %v144_v29 }
  0xfb   :  { %v7798_v45 = vcombine.high %v152_v35, %v160_v37 }
  0xfd   :  { %4851 = vmatpush1.bf16.msra.mxu0 %v8335_v50  ;;  %4974 = vmatpush1.bf16.msra.mxu1 %v8337_v51  ;;  %v8464_v50 = vcombine.high %v821_v43, %v829_v44  ;;  %v837_v51 = vld [vmem:[#allocation2 + $0x1600] sm:$0xff] }
  0xfe   :  { %4852 = vmatprep.subr.bf16.mxu0 %v8352_v52  ;;  %4975 = vmatprep.subr.bf16.mxu1 %v8354_v58  ;;  %v845_v52 = vld [vmem:[#allocation2 + $0x1640] sm:$0xff]  ;;  %v8463_v58 = vcombine.low %v821_v43, %v829_v44  ;;  %v175_v43 = vld [vmem:[#allocation2 + $0x150] sm:$0xff]  ;;  %v168_v44 = vld [vmem:[#allocation2 + $0x118] sm:$0xff] }
 0x101   :  { %4853 = vmatpush1.bf16.msra.mxu0 %v8351_v60  ;;  %4976 = vmatpush1.bf16.msra.mxu1 %v8353_v61  ;;  %v8480_v60 = vcombine.high %v837_v51, %v845_v52  ;;  %v853_v61 = vld [vmem:[#allocation2 + $0x1680] sm:$0xff] }
 0x102   :  { %4854 = vmatprep.subr.bf16.mxu0 %v8368_v62  ;;  %4977 = vmatprep.subr.bf16.mxu1 %v8370_v2  ;;  %v861_v62 = vld [vmem:[#allocation2 + $0x16c0] sm:$0xff]  ;;  %v8479_v2 = vcombine.low %v837_v51, %v845_v52  ;;  %v184_v51 = vld [vmem:[#allocation2 + $0x198] sm:$0xff] }
 0x103   :  { %v7829_v1 = vcombine.low %v184_v51, %v192_v54 }
 0x105   :  { %4855 = vmatpush1.bf16.msra.mxu0 %v8367_v4  ;;  %4978 = vmatpush1.bf16.msra.mxu1 %v8369_v5  ;;  %v8496_v4 = vcombine.high %v853_v61, %v861_v62  ;;  %v869_v5 = vld [vmem:[#allocation2 + $0x1700] sm:$0xff] }
 0x106   :  { %4856 = vmatprep.subr.bf16.mxu0 %v8384_v6  ;;  %4979 = vmatprep.subr.bf16.mxu1 %v8386_v10  ;;  %v877_v6 = vld [vmem:[#allocation2 + $0x1740] sm:$0xff]  ;;  %v8495_v10 = vcombine.low %v853_v61, %v861_v62  ;;  %v200_v61 = vld [vmem:[#allocation2 + $0x218] sm:$0xff]  ;;  %v7830_v62 = vcombine.high %v184_v51, %v192_v54 }
 0x107   :  { %v7845_v9 = vcombine.low %v200_v61, %v208_v63  ;;  %v304_v51 = vld [vmem:[#allocation2 + $0x558] sm:$0xff] }
 0x109   :  { %4857 = vmatpush1.bf16.msra.mxu0 %v8383_v13  ;;  %4980 = vmatpush1.bf16.msra.mxu1 %v8385_v14  ;;  %v8512_v13 = vcombine.high %v869_v5, %v877_v6  ;;  %v885_v14 = vld [vmem:[#allocation2 + $0x1780] sm:$0xff] }
 0x10a   :  { %4858 = vmatprep.subr.bf16.mxu0 %v8400_v16  ;;  %4981 = vmatprep.subr.bf16.mxu1 %v8402_v20  ;;  %v893_v16 = vld [vmem:[#allocation2 + $0x17c0] sm:$0xff]  ;;  %v8511_v20 = vcombine.low %v869_v5, %v877_v6  ;;  %v216_v5 = vld [vmem:[#allocation2 + $0x298] sm:$0xff]  ;;  %v7846_v6 = vcombine.high %v200_v61, %v208_v63 }
 0x10b   :  { %v7861_v19 = vcombine.low %v216_v5, %v224_v7  ;;  %v320_v61 = vld [vmem:[#allocation2 + $0x5d8] sm:$0xff] }
 0x10d   :  { %4859 = vmatpush1.bf16.msra.mxu0 %v8399_v22  ;;  %4982 = vmatpush1.bf16.msra.mxu1 %v8401_v53  ;;  %v8528_v22 = vcombine.high %v885_v14, %v893_v16  ;;  %v135_v53 = vld [vmem:[#allocation2 + $0x10] sm:$0xff] }
 0x10e   :  { %4860 = vmatprep.subr.bf16.mxu0 %v8416_v26  ;;  %4983 = vmatprep.subr.bf16.mxu1 %v8418_v30  ;;  %v143_v26 = vld [vmem:[#allocation2 + $0x50] sm:$0xff]  ;;  %v8527_v30 = vcombine.low %v885_v14, %v893_v16  ;;  %v232_v14 = vld [vmem:[#allocation2 + $0x318] sm:$0xff]  ;;  %v7862_v16 = vcombine.high %v216_v5, %v224_v7 }
 0x10f   :  { %v7779_v39 = vcombine.low %v135_v53, %v143_v26  ;;  %v336_v5 = vld [vmem:[#allocation2 + $0x658] sm:$0xff] }
 0x111   :  { %4861 = vmatpush1.bf16.msra.mxu0 %v8415_v32  ;;  %4984 = vmatpush1.bf16.msra.mxu1 %v8417_v33  ;;  %v7780_v32 = vcombine.high %v135_v53, %v143_v26  ;;  %v151_v33 = vld [vmem:[#allocation2 + $0x90] sm:$0xff]  ;;  %v248_v53 = vld [vmem:[#allocation2 + $0x398] sm:$0xff]  ;;  %v7878_v26 = vcombine.high %v232_v14, %v240_v17 }
 0x112   :  { %4862 = vmatprep.subr.bf16.mxu0 %v8432_v15  ;;  %4985 = vmatprep.subr.bf16.mxu1 %v8434_v38  ;;  %v159_v15 = vld [vmem:[#allocation2 + $0xd0] sm:$0xff]  ;;  %v9598_v38 = vcombine.low %v9582_v24, %v9582_v24  ;;  %v7797_v24 = vcombine.low %v152_v35, %v160_v37  ;;  %v272_v35 = vld [vmem:[#allocation2 + $0x458] sm:$0xff] }
 0x113   :  { %v7795_v47 = vcombine.low %v151_v33, %v159_v15 }
 0x115   :  { %4863 = vmatpush1.bf16.msra.mxu0 %v8431_v40  ;;  %4986 = vmatpush1.bf16.msra.mxu1 %v8433_v41  ;;  %v7781_v40 = vcombine.low %v136_v27, %v144_v29  ;;  %v7796_v41 = vcombine.high %v151_v33, %v159_v15  ;;  %v256_v27 = vld [vmem:[#allocation2 + $0x3d8] sm:$0xff]  ;;  %v7877_v29 = vcombine.low %v232_v14, %v240_v17  ;;  %v271_v33 = vld [vmem:[#allocation2 + $0x450] sm:$0xff] }
 0x116   :  { %4864 = vmatprep.subr.bf16.mxu0 %v8448_v42  ;;  %4987 = vmatprep.subr.bf16.mxu1 %v8450_v46  ;;  %v167_v42 = vld [vmem:[#allocation2 + $0x110] sm:$0xff]  ;;  %v176_v46 = vld [vmem:[#allocation2 + $0x158] sm:$0xff]  ;;  %v7893_v37 = vcombine.low %v248_v53, %v256_v27 }
 0x117   :  { %v7814_v52 = vcombine.high %v168_v44, %v176_v46  ;;  %v7813_v56 = vcombine.low %v168_v44, %v176_v46  ;;  %v264_v15 = vld [vmem:[#allocation2 + $0x418] sm:$0xff] }
 0x118   :  { %v288_v44 = vld [vmem:[#allocation2 + $0x4d8] sm:$0xff]  ;;  %v7909_v46 = vcombine.low %v264_v15, %v272_v35 }
 0x119   :  { %4865 = vmatpush1.bf16.msra.mxu0 %v8447_v48  ;;  %4988 = vmatpush1.bf16.msra.mxu1 %v8449_v49  ;;  %v7812_v48 = vcombine.high %v167_v42, %v175_v43  ;;  %v183_v49 = vld [vmem:[#allocation2 + $0x190] sm:$0xff]  ;;  %v352_v14 = vld [vmem:[#allocation2 + $0x6d8] sm:$0xff] }
 0x11a   :  { %4866 = vmatprep.subr.bf16.mxu0 %v8464_v50  ;;  %4989 = vmatprep.subr.bf16.mxu1 %v8466_v55  ;;  %v191_v50 = vld [vmem:[#allocation2 + $0x1d0] sm:$0xff]  ;;  %v7811_v55 = vcombine.low %v167_v42, %v175_v43  ;;  %v280_v43 = vld [vmem:[#allocation2 + $0x498] sm:$0xff] }
 0x11b   :  { %v287_v42 = vld [vmem:[#allocation2 + $0x4d0] sm:$0xff]  ;;  %v7925_v54 = vcombine.low %v280_v43, %v288_v44 }
 0x11d   :  { %4867 = vmatpush1.bf16.msra.mxu0 %v8463_v58  ;;  %4990 = vmatpush1.bf16.msra.mxu1 %v8465_v59  ;;  %v7828_v58 = vcombine.high %v183_v49, %v191_v50  ;;  %v199_v59 = vld [vmem:[#allocation2 + $0x210] sm:$0xff] }
 0x11e   :  { %4868 = vmatprep.subr.bf16.mxu0 %v8480_v60  ;;  %4991 = vmatprep.subr.bf16.mxu1 %v8482_v0  ;;  %v207_v60 = vld [vmem:[#allocation2 + $0x250] sm:$0xff]  ;;  %v7827_v0 = vcombine.low %v183_v49, %v191_v50  ;;  %v296_v50 = vld [vmem:[#allocation2 + $0x518] sm:$0xff] }
 0x11f   :  { %v303_v49 = vld [vmem:[#allocation2 + $0x550] sm:$0xff]  ;;  %v7941_v63 = vcombine.low %v296_v50, %v304_v51 }
 0x121   :  { %4869 = vmatpush1.bf16.msra.mxu0 %v8479_v2  ;;  %4992 = vmatpush1.bf16.msra.mxu1 %v8481_v3  ;;  %v7844_v2 = vcombine.high %v199_v59, %v207_v60  ;;  %v215_v3 = vld [vmem:[#allocation2 + $0x290] sm:$0xff] }
 0x122   :  { %4870 = vmatprep.subr.bf16.mxu0 %v8496_v4  ;;  %4993 = vmatprep.subr.bf16.mxu1 %v8498_v8  ;;  %v223_v4 = vld [vmem:[#allocation2 + $0x2d0] sm:$0xff]  ;;  %v7843_v8 = vcombine.low %v199_v59, %v207_v60  ;;  %v312_v60 = vld [vmem:[#allocation2 + $0x598] sm:$0xff] }
 0x123   :  { %v319_v59 = vld [vmem:[#allocation2 + $0x5d0] sm:$0xff]  ;;  %v7957_v7 = vcombine.low %v312_v60, %v320_v61 }
 0x125   :  { %4871 = vmatpush1.bf16.msra.mxu0 %v8495_v10  ;;  %4994 = vmatpush1.bf16.msra.mxu1 %v8497_v11  ;;  %v7860_v10 = vcombine.high %v215_v3, %v223_v4  ;;  %v231_v11 = vld [vmem:[#allocation2 + $0x310] sm:$0xff] }
 0x126   :  { %4872 = vmatprep.subr.bf16.mxu0 %v8512_v13  ;;  %4995 = vmatprep.subr.bf16.mxu1 %v8514_v18  ;;  %v239_v13 = vld [vmem:[#allocation2 + $0x350] sm:$0xff]  ;;  %v7859_v18 = vcombine.low %v215_v3, %v223_v4  ;;  %v328_v4 = vld [vmem:[#allocation2 + $0x618] sm:$0xff] }
 0x127   :  { %v335_v3 = vld [vmem:[#allocation2 + $0x650] sm:$0xff]  ;;  %v7973_v17 = vcombine.low %v328_v4, %v336_v5 }
 0x129   :  { %4873 = vmatpush1.bf16.msra.mxu0 %v8511_v20  ;;  %4996 = vmatpush1.bf16.msra.mxu1 %v8513_v21  ;;  %v7876_v20 = vcombine.high %v231_v11, %v239_v13  ;;  %v247_v21 = vld [vmem:[#allocation2 + $0x390] sm:$0xff] }
 0x12a   :  { %4874 = vmatprep.subr.bf16.mxu0 %v8528_v22  ;;  %4997 = vmatprep.subr.bf16.mxu1 %v8530_v28  ;;  %v255_v22 = vld [vmem:[#allocation2 + $0x3d0] sm:$0xff]  ;;  %v7875_v28 = vcombine.low %v231_v11, %v239_v13  ;;  %v344_v13 = vld [vmem:[#allocation2 + $0x698] sm:$0xff] }
 0x12b   :  { %v351_v11 = vld [vmem:[#allocation2 + $0x6d0] sm:$0xff] }
 0x12d   :  { %4875 = vmatpush1.bf16.msra.mxu0 %v8527_v30  ;;  %4998 = vmatpush1.bf16.msra.mxu1 %v8529_v31  ;;  %v7892_v30 = vcombine.high %v247_v21, %v255_v22  ;;  %v7894_v31 = vcombine.high %v248_v53, %v256_v27  ;;  %v368_v53 = vld [vmem:[#allocation2 + $0x758] sm:$0xff]  ;;  %v7989_v27 = vcombine.low %v344_v13, %v352_v14 }
 0x12e   :  { %5008 = vmatprep.subr.bf16.mxu0 %v7780_v32  ;;  %5131 = vmatprep.subr.bf16.mxu1 %v7782_v36  ;;  %v263_v32 = vld [vmem:[#allocation2 + $0x410] sm:$0xff]  ;;  %v7891_v36 = vcombine.low %v247_v21, %v255_v22  ;;  %v360_v22 = vld [vmem:[#allocation2 + $0x718] sm:$0xff] }
 0x12f   :  { %v367_v21 = vld [vmem:[#allocation2 + $0x750] sm:$0xff] }
 0x130   :  { %4877 = vmatmul.mubr.bf16.vlgmr.msra.gmra.mrb[0].mxu0 %v9598_v38  ;;  %5000 = vmatmul.mubr.bf16.vlgmr.msra.gmra.mrb[0].mxu1 %v9598_v38 }
 0x131   :  { %5009 = vmatpush1.bf16.msra.mxu0 %v7779_v39  ;;  %5132 = vmatpush1.bf16.msra.mxu1 %v7781_v40  ;;  %v7908_v39 = vcombine.high %v263_v32, %v271_v33  ;;  %v7910_v40 = vcombine.high %v264_v15, %v272_v35  ;;  %v8005_v35 = vcombine.low %v360_v22, %v368_v53 }
 0x132   :  { %5010 = vmatprep.subr.bf16.mxu0 %v7796_v41  ;;  %5133 = vmatprep.subr.bf16.mxu1 %v7798_v45  ;;  %v279_v41 = vld [vmem:[#allocation2 + $0x490] sm:$0xff]  ;;  %v7907_v45 = vcombine.low %v263_v32, %v271_v33  ;;  %v376_v32 = vld [vmem:[#allocation2 + $0x798] sm:$0xff] }
 0x133   :  { %5040 = vmatprep.mubr.bf16.mxu0 %v9558_v57  ;;  %5163 = vmatprep.mubr.bf16.mxu1 %v9558_v57  ;;  %v384_v33 = vld [vmem:[#allocation2 + $0x7d8] sm:$0xff] }
 0x135   :  { %5011 = vmatpush1.bf16.msra.mxu0 %v7795_v47  ;;  %5134 = vmatpush1.bf16.msra.mxu1 %v7797_v24  ;;  %v7924_v47 = vcombine.high %v279_v41, %v287_v42  ;;  %v7926_v24 = vcombine.high %v280_v43, %v288_v44  ;;  %v8021_v44 = vcombine.low %v376_v32, %v384_v33 }
 0x136   :  { %5012 = vmatprep.subr.bf16.mxu0 %v7812_v48  ;;  %5135 = vmatprep.subr.bf16.mxu1 %v7814_v52  ;;  %v295_v48 = vld [vmem:[#allocation2 + $0x510] sm:$0xff]  ;;  %v7923_v52 = vcombine.low %v279_v41, %v287_v42  ;;  %v392_v41 = vld [vmem:[#allocation2 + $0x818] sm:$0xff] }
 0x137   :  { %v400_v42 = vld [vmem:[#allocation2 + $0x858] sm:$0xff] }
 0x139   :  { %5013 = vmatpush1.bf16.msra.mxu0 %v7811_v55  ;;  %5136 = vmatpush1.bf16.msra.mxu1 %v7813_v56  ;;  %v7940_v55 = vcombine.high %v295_v48, %v303_v49  ;;  %v7942_v56 = vcombine.high %v296_v50, %v304_v51  ;;  %v8037_v51 = vcombine.low %v392_v41, %v400_v42 }
 0x13a   :  { %5014 = vmatprep.subr.bf16.mxu0 %v7828_v58  ;;  %5137 = vmatprep.subr.bf16.mxu1 %v7830_v62  ;;  %v311_v58 = vld [vmem:[#allocation2 + $0x590] sm:$0xff]  ;;  %v7939_v62 = vcombine.low %v295_v48, %v303_v49  ;;  %v408_v48 = vld [vmem:[#allocation2 + $0x898] sm:$0xff] }
 0x13b   :  { %v416_v49 = vld [vmem:[#allocation2 + $0x8d8] sm:$0xff] }
 0x13d   :  { %5015 = vmatpush1.bf16.msra.mxu0 %v7827_v0  ;;  %5138 = vmatpush1.bf16.msra.mxu1 %v7829_v1  ;;  %v7956_v0 = vcombine.high %v311_v58, %v319_v59  ;;  %v7958_v1 = vcombine.high %v312_v60, %v320_v61  ;;  %v8053_v61 = vcombine.low %v408_v48, %v416_v49 }
 0x13e   :  { %5016 = vmatprep.subr.bf16.mxu0 %v7844_v2  ;;  %5139 = vmatprep.subr.bf16.mxu1 %v7846_v6  ;;  %v327_v2 = vld [vmem:[#allocation2 + $0x610] sm:$0xff]  ;;  %v7955_v6 = vcombine.low %v311_v58, %v319_v59  ;;  %v424_v58 = vld [vmem:[#allocation2 + $0x918] sm:$0xff] }
 0x13f   :  { %v432_v59 = vld [vmem:[#allocation2 + $0x958] sm:$0xff] }
 0x141   :  { %5017 = vmatpush1.bf16.msra.mxu0 %v7843_v8  ;;  %5140 = vmatpush1.bf16.msra.mxu1 %v7845_v9  ;;  %v7972_v8 = vcombine.high %v327_v2, %v335_v3  ;;  %v7974_v9 = vcombine.high %v328_v4, %v336_v5  ;;  %v8069_v5 = vcombine.low %v424_v58, %v432_v59 }
 0x142   :  { %5018 = vmatprep.subr.bf16.mxu0 %v7860_v10  ;;  %5141 = vmatprep.subr.bf16.mxu1 %v7862_v16  ;;  %v343_v10 = vld [vmem:[#allocation2 + $0x690] sm:$0xff]  ;;  %v7971_v16 = vcombine.low %v327_v2, %v335_v3  ;;  %v440_v2 = vld [vmem:[#allocation2 + $0x998] sm:$0xff] }
 0x143   :  { %v448_v3 = vld [vmem:[#allocation2 + $0x9d8] sm:$0xff] }
 0x145   :  { %5019 = vmatpush1.bf16.msra.mxu0 %v7859_v18  ;;  %5142 = vmatpush1.bf16.msra.mxu1 %v7861_v19  ;;  %v7988_v18 = vcombine.high %v343_v10, %v351_v11  ;;  %v7990_v19 = vcombine.high %v344_v13, %v352_v14  ;;  %v8085_v14 = vcombine.low %v440_v2, %v448_v3 }
 0x146   :  { %5020 = vmatprep.subr.bf16.mxu0 %v7876_v20  ;;  %5143 = vmatprep.subr.bf16.mxu1 %v7878_v26  ;;  %v359_v20 = vld [vmem:[#allocation2 + $0x710] sm:$0xff]  ;;  %v7987_v26 = vcombine.low %v343_v10, %v351_v11  ;;  %v456_v10 = vld [vmem:[#allocation2 + $0xa18] sm:$0xff] }
 0x147   :  { %v8003_v15 = vcombine.low %v359_v20, %v367_v21  ;;  %v464_v11 = vld [vmem:[#allocation2 + $0xa58] sm:$0xff] }
 0x149   :  { %5021 = vmatpush1.bf16.msra.mxu0 %v7875_v28  ;;  %5144 = vmatpush1.bf16.msra.mxu1 %v7877_v29  ;;  %v8004_v28 = vcombine.high %v359_v20, %v367_v21  ;;  %v8006_v29 = vcombine.high %v360_v22, %v368_v53  ;;  %v472_v20 = vld [vmem:[#allocation2 + $0xa98] sm:$0xff]  ;;  %v8101_v53 = vcombine.low %v456_v10, %v464_v11 }
 0x14a   :  { %5022 = vmatprep.subr.bf16.mxu0 %v7892_v30  ;;  %5145 = vmatprep.subr.bf16.mxu1 %v7894_v31  ;;  %v375_v30 = vld [vmem:[#allocation2 + $0x790] sm:$0xff]  ;;  %v480_v21 = vld [vmem:[#allocation2 + $0xad8] sm:$0xff] }
 0x14b   :  { %v383_v31 = vld [vmem:[#allocation2 + $0x7d0] sm:$0xff] }
 0x14c   :  { %v8019_v43 = vcombine.low %v375_v30, %v383_v31 }
 0x14d   :  { %5023 = vmatpush1.bf16.msra.mxu0 %v7891_v36  ;;  %5146 = vmatpush1.bf16.msra.mxu1 %v7893_v37  ;;  %v8020_v36 = vcombine.high %v375_v30, %v383_v31  ;;  %v8022_v37 = vcombine.high %v376_v32, %v384_v33  ;;  %v488_v30 = vld [vmem:[#allocation2 + $0xb18] sm:$0xff]  ;;  %v8117_v33 = vcombine.low %v472_v20, %v480_v21 }
 0x14e   :  { %5024 = vmatprep.subr.bf16.mxu0 %v7908_v39  ;;  %5147 = vmatprep.subr.bf16.mxu1 %v7910_v40  ;;  %v391_v39 = vld [vmem:[#allocation2 + $0x810] sm:$0xff]  ;;  %v496_v31 = vld [vmem:[#allocation2 + $0xb58] sm:$0xff] }
 0x14f   :  { %v399_v40 = vld [vmem:[#allocation2 + $0x850] sm:$0xff] }
 0x150   :  { %v8035_v50 = vcombine.low %v391_v39, %v399_v40 }
 0x151   :  { %5025 = vmatpush1.bf16.msra.mxu0 %v7907_v45  ;;  %5148 = vmatpush1.bf16.msra.mxu1 %v7909_v46  ;;  %v8036_v45 = vcombine.high %v391_v39, %v399_v40  ;;  %v8038_v46 = vcombine.high %v392_v41, %v400_v42  ;;  %v504_v39 = vld [vmem:[#allocation2 + $0xb98] sm:$0xff]  ;;  %v8133_v42 = vcombine.low %v488_v30, %v496_v31 }
 0x152   :  { %5026 = vmatprep.subr.bf16.mxu0 %v7924_v47  ;;  %5149 = vmatprep.subr.bf16.mxu1 %v7926_v24  ;;  %v407_v47 = vld [vmem:[#allocation2 + $0x890] sm:$0xff]  ;;  %v512_v40 = vld [vmem:[#allocation2 + $0xbd8] sm:$0xff] }
 0x153   :  { %v415_v24 = vld [vmem:[#allocation2 + $0x8d0] sm:$0xff] }
 0x154   :  { %v8051_v60 = vcombine.low %v407_v47, %v415_v24 }
 0x155   :  { %5027 = vmatpush1.bf16.msra.mxu0 %v7923_v52  ;;  %5150 = vmatpush1.bf16.msra.mxu1 %v7925_v54  ;;  %v8052_v52 = vcombine.high %v407_v47, %v415_v24  ;;  %v8054_v54 = vcombine.high %v408_v48, %v416_v49  ;;  %v520_v47 = vld [vmem:[#allocation2 + $0xc18] sm:$0xff]  ;;  %v8149_v49 = vcombine.low %v504_v39, %v512_v40 }
 0x156   :  { %5028 = vmatprep.subr.bf16.mxu0 %v7940_v55  ;;  %5151 = vmatprep.subr.bf16.mxu1 %v7942_v56  ;;  %v423_v55 = vld [vmem:[#allocation2 + $0x910] sm:$0xff]  ;;  %v528_v24 = vld [vmem:[#allocation2 + $0xc58] sm:$0xff] }
 0x157   :  { %v431_v56 = vld [vmem:[#allocation2 + $0x950] sm:$0xff] }
 0x158   :  { %v8067_v4 = vcombine.low %v423_v55, %v431_v56 }
 0x159   :  { %5029 = vmatpush1.bf16.msra.mxu0 %v7939_v62  ;;  %5152 = vmatpush1.bf16.msra.mxu1 %v7941_v63  ;;  %v8068_v62 = vcombine.high %v423_v55, %v431_v56  ;;  %v8070_v63 = vcombine.high %v424_v58, %v432_v59  ;;  %v536_v55 = vld [vmem:[#allocation2 + $0xc98] sm:$0xff]  ;;  %v8165_v59 = vcombine.low %v520_v47, %v528_v24 }
 0x15a   :  { %5030 = vmatprep.subr.bf16.mxu0 %v7956_v0  ;;  %5153 = vmatprep.subr.bf16.mxu1 %v7958_v1  ;;  %v439_v0 = vld [vmem:[#allocation2 + $0x990] sm:$0xff]  ;;  %v544_v56 = vld [vmem:[#allocation2 + $0xcd8] sm:$0xff] }
 0x15b   :  { %v447_v1 = vld [vmem:[#allocation2 + $0x9d0] sm:$0xff] }
 0x15c   :  { %v8083_v13 = vcombine.low %v439_v0, %v447_v1 }
 0x15d   :  { %5031 = vmatpush1.bf16.msra.mxu0 %v7955_v6  ;;  %5154 = vmatpush1.bf16.msra.mxu1 %v7957_v7  ;;  %v8084_v6 = vcombine.high %v439_v0, %v447_v1  ;;  %v8086_v7 = vcombine.high %v440_v2, %v448_v3  ;;  %v552_v0 = vld [vmem:[#allocation2 + $0xd18] sm:$0xff]  ;;  %v8181_v3 = vcombine.low %v536_v55, %v544_v56 }
 0x15e   :  { %5032 = vmatprep.subr.bf16.mxu0 %v7972_v8  ;;  %5155 = vmatprep.subr.bf16.mxu1 %v7974_v9  ;;  %v455_v8 = vld [vmem:[#allocation2 + $0xa10] sm:$0xff]  ;;  %v560_v1 = vld [vmem:[#allocation2 + $0xd58] sm:$0xff] }
 0x15f   :  { %v463_v9 = vld [vmem:[#allocation2 + $0xa50] sm:$0xff] }
 0x160   :  { %v8099_v22 = vcombine.low %v455_v8, %v463_v9 }
 0x161   :  { %5033 = vmatpush1.bf16.msra.mxu0 %v7971_v16  ;;  %5156 = vmatpush1.bf16.msra.mxu1 %v7973_v17  ;;  %v8100_v16 = vcombine.high %v455_v8, %v463_v9  ;;  %v8102_v17 = vcombine.high %v456_v10, %v464_v11  ;;  %v568_v8 = vld [vmem:[#allocation2 + $0xd98] sm:$0xff]  ;;  %v8197_v11 = vcombine.low %v552_v0, %v560_v1 }
 0x162   :  { %5034 = vmatprep.subr.bf16.mxu0 %v7988_v18  ;;  %5157 = vmatprep.subr.bf16.mxu1 %v7990_v19  ;;  %v471_v18 = vld [vmem:[#allocation2 + $0xa90] sm:$0xff]  ;;  %v576_v9 = vld [vmem:[#allocation2 + $0xdd8] sm:$0xff] }
 0x163   :  { %v479_v19 = vld [vmem:[#allocation2 + $0xad0] sm:$0xff] }
 0x164   :  { %v8115_v32 = vcombine.low %v471_v18, %v479_v19 }
 0x165   :  { %5035 = vmatpush1.bf16.msra.mxu0 %v7987_v26  ;;  %5158 = vmatpush1.bf16.msra.mxu1 %v7989_v27  ;;  %v8116_v26 = vcombine.high %v471_v18, %v479_v19  ;;  %v8118_v27 = vcombine.high %v472_v20, %v480_v21  ;;  %v584_v18 = vld [vmem:[#allocation2 + $0xe18] sm:$0xff]  ;;  %v8213_v21 = vcombine.low %v568_v8, %v576_v9 }
 0x166   :  { %5036 = vmatprep.subr.bf16.mxu0 %v8004_v28  ;;  %5159 = vmatprep.subr.bf16.mxu1 %v8006_v29  ;;  %v487_v28 = vld [vmem:[#allocation2 + $0xb10] sm:$0xff]  ;;  %v592_v19 = vld [vmem:[#allocation2 + $0xe58] sm:$0xff] }
 0x167   :  { %v495_v29 = vld [vmem:[#allocation2 + $0xb50] sm:$0xff] }
 0x168   :  { %v8131_v41 = vcombine.low %v487_v28, %v495_v29 }
 0x169   :  { %5037 = vmatpush1.bf16.msra.mxu0 %v8003_v15  ;;  %5160 = vmatpush1.bf16.msra.mxu1 %v8005_v35  ;;  %v8132_v15 = vcombine.high %v487_v28, %v495_v29  ;;  %v8134_v35 = vcombine.high %v488_v30, %v496_v31  ;;  %v600_v28 = vld [vmem:[#allocation2 + $0xe98] sm:$0xff]  ;;  %v8229_v31 = vcombine.low %v584_v18, %v592_v19 }
 0x16a   :  { %5038 = vmatprep.subr.bf16.mxu0 %v8020_v36  ;;  %5161 = vmatprep.subr.bf16.mxu1 %v8022_v37  ;;  %v503_v36 = vld [vmem:[#allocation2 + $0xb90] sm:$0xff]  ;;  %v608_v29 = vld [vmem:[#allocation2 + $0xed8] sm:$0xff] }
 0x16b   :  { %v511_v37 = vld [vmem:[#allocation2 + $0xbd0] sm:$0xff] }
 0x16c   :  { %v8147_v48 = vcombine.low %v503_v36, %v511_v37 }
 0x16d   :  { %5039 = vmatpush1.bf16.msra.mxu0 %v8019_v43  ;;  %5162 = vmatpush1.bf16.msra.mxu1 %v8021_v44  ;;  %v8148_v43 = vcombine.high %v503_v36, %v511_v37  ;;  %v8150_v44 = vcombine.high %v504_v39, %v512_v40  ;;  %v616_v36 = vld [vmem:[#allocation2 + $0xf18] sm:$0xff]  ;;  %v8245_v40 = vcombine.low %v600_v28, %v608_v29 }
 0x16e   :  { %5049 = vmatprep.subr.bf16.mxu0 %v8036_v45  ;;  %5172 = vmatprep.subr.bf16.mxu1 %v8038_v46  ;;  %v519_v45 = vld [vmem:[#allocation2 + $0xc10] sm:$0xff]  ;;  %v624_v37 = vld [vmem:[#allocation2 + $0xf58] sm:$0xff] }
 0x16f   :  { %v527_v46 = vld [vmem:[#allocation2 + $0xc50] sm:$0xff] }
 0x170   :  { %5041 = vmatmul.mubr.bf16.vlgmr.msra.gmra.mrb[4].mxu0 %v9564_v12  ;;  %5164 = vmatmul.mubr.bf16.vlgmr.msra.gmra.mrb[4].mxu1 %v9564_v12  ;;  %v8163_v58 = vcombine.low %v519_v45, %v527_v46 }
 0x171   :  { %5050 = vmatpush1.bf16.msra.mxu0 %v8035_v50  ;;  %5173 = vmatpush1.bf16.msra.mxu1 %v8037_v51  ;;  %v8164_v50 = vcombine.high %v519_v45, %v527_v46  ;;  %v8166_v51 = vcombine.high %v520_v47, %v528_v24  ;;  %v632_v45 = vld [vmem:[#allocation2 + $0xf98] sm:$0xff]  ;;  %v8261_v24 = vcombine.low %v616_v36, %v624_v37 }
 0x172   :  { %5051 = vmatprep.subr.bf16.mxu0 %v8052_v52  ;;  %5174 = vmatprep.subr.bf16.mxu1 %v8054_v54  ;;  %v535_v52 = vld [vmem:[#allocation2 + $0xc90] sm:$0xff]  ;;  %v640_v46 = vld [vmem:[#allocation2 + $0xfd8] sm:$0xff] }
 0x173   :  { %5081 = vmatprep.mubr.bf16.mxu0 %v9573_v23  ;;  %5204 = vmatprep.mubr.bf16.mxu1 %v9573_v23  ;;  %v543_v54 = vld [vmem:[#allocation2 + $0xcd0] sm:$0xff] }
 0x174   :  { %v8179_v2 = vcombine.low %v535_v52, %v543_v54 }
 0x175   :  { %5052 = vmatpush1.bf16.msra.mxu0 %v8051_v60  ;;  %5175 = vmatpush1.bf16.msra.mxu1 %v8053_v61  ;;  %v8180_v60 = vcombine.high %v535_v52, %v543_v54  ;;  %v8182_v61 = vcombine.high %v536_v55, %v544_v56  ;;  %v648_v52 = vld [vmem:[#allocation2 + $0x1018] sm:$0xff]  ;;  %v8277_v56 = vcombine.low %v632_v45, %v640_v46 }
 0x176   :  { %5053 = vmatprep.subr.bf16.mxu0 %v8068_v62  ;;  %5176 = vmatprep.subr.bf16.mxu1 %v8070_v63  ;;  %v551_v62 = vld [vmem:[#allocation2 + $0xd10] sm:$0xff]  ;;  %v656_v54 = vld [vmem:[#allocation2 + $0x1058] sm:$0xff] }
 0x177   :  { %v559_v63 = vld [vmem:[#allocation2 + $0xd50] sm:$0xff] }
 0x178   :  { %v8195_v10 = vcombine.low %v551_v62, %v559_v63 }
 0x179   :  { %5054 = vmatpush1.bf16.msra.mxu0 %v8067_v4  ;;  %5177 = vmatpush1.bf16.msra.mxu1 %v8069_v5  ;;  %v8196_v4 = vcombine.high %v551_v62, %v559_v63  ;;  %v8198_v5 = vcombine.high %v552_v0, %v560_v1  ;;  %v664_v62 = vld [vmem:[#allocation2 + $0x1098] sm:$0xff]  ;;  %v8293_v1 = vcombine.low %v648_v52, %v656_v54 }
 0x17a   :  { %5055 = vmatprep.subr.bf16.mxu0 %v8084_v6  ;;  %5178 = vmatprep.subr.bf16.mxu1 %v8086_v7  ;;  %v567_v6 = vld [vmem:[#allocation2 + $0xd90] sm:$0xff]  ;;  %v672_v63 = vld [vmem:[#allocation2 + $0x10d8] sm:$0xff] }
 0x17b   :  { %v575_v7 = vld [vmem:[#allocation2 + $0xdd0] sm:$0xff] }
 0x17c   :  { %v8211_v20 = vcombine.low %v567_v6, %v575_v7 }
 0x17d   :  { %5056 = vmatpush1.bf16.msra.mxu0 %v8083_v13  ;;  %5179 = vmatpush1.bf16.msra.mxu1 %v8085_v14  ;;  %v8212_v13 = vcombine.high %v567_v6, %v575_v7  ;;  %v8214_v14 = vcombine.high %v568_v8, %v576_v9  ;;  %v680_v6 = vld [vmem:[#allocation2 + $0x1118] sm:$0xff]  ;;  %v8309_v9 = vcombine.low %v664_v62, %v672_v63 }
 0x17e   :  { %5057 = vmatprep.subr.bf16.mxu0 %v8100_v16  ;;  %5180 = vmatprep.subr.bf16.mxu1 %v8102_v17  ;;  %v583_v16 = vld [vmem:[#allocation2 + $0xe10] sm:$0xff]  ;;  %v688_v7 = vld [vmem:[#allocation2 + $0x1158] sm:$0xff] }
 0x17f   :  { %v591_v17 = vld [vmem:[#allocation2 + $0xe50] sm:$0xff] }
 0x180   :  { %v8227_v30 = vcombine.low %v583_v16, %v591_v17 }
 0x181   :  { %5058 = vmatpush1.bf16.msra.mxu0 %v8099_v22  ;;  %5181 = vmatpush1.bf16.msra.mxu1 %v8101_v53  ;;  %v8228_v22 = vcombine.high %v583_v16, %v591_v17  ;;  %v8230_v53 = vcombine.high %v584_v18, %v592_v19  ;;  %v696_v16 = vld [vmem:[#allocation2 + $0x1198] sm:$0xff]  ;;  %v8325_v19 = vcombine.low %v680_v6, %v688_v7 }
 0x182   :  { %5059 = vmatprep.subr.bf16.mxu0 %v8116_v26  ;;  %5182 = vmatprep.subr.bf16.mxu1 %v8118_v27  ;;  %v599_v26 = vld [vmem:[#allocation2 + $0xe90] sm:$0xff]  ;;  %v704_v17 = vld [vmem:[#allocation2 + $0x11d8] sm:$0xff] }
 0x183   :  { %v607_v27 = vld [vmem:[#allocation2 + $0xed0] sm:$0xff] }
 0x184   :  { %v8243_v39 = vcombine.low %v599_v26, %v607_v27 }
 0x185   :  { %5060 = vmatpush1.bf16.msra.mxu0 %v8115_v32  ;;  %5183 = vmatpush1.bf16.msra.mxu1 %v8117_v33  ;;  %v8244_v32 = vcombine.high %v599_v26, %v607_v27  ;;  %v8246_v33 = vcombine.high %v600_v28, %v608_v29  ;;  %v712_v26 = vld [vmem:[#allocation2 + $0x1218] sm:$0xff]  ;;  %v8341_v29 = vcombine.low %v696_v16, %v704_v17 }
 0x186   :  { %5061 = vmatprep.subr.bf16.mxu0 %v8132_v15  ;;  %5184 = vmatprep.subr.bf16.mxu1 %v8134_v35  ;;  %v615_v15 = vld [vmem:[#allocation2 + $0xf10] sm:$0xff]  ;;  %v720_v27 = vld [vmem:[#allocation2 + $0x1258] sm:$0xff] }
 0x187   :  { %v623_v35 = vld [vmem:[#allocation2 + $0xf50] sm:$0xff] }
 0x188   :  { %v8259_v47 = vcombine.low %v615_v15, %v623_v35 }
 0x189   :  { %5062 = vmatpush1.bf16.msra.mxu0 %v8131_v41  ;;  %5185 = vmatpush1.bf16.msra.mxu1 %v8133_v42  ;;  %v8260_v41 = vcombine.high %v615_v15, %v623_v35  ;;  %v8262_v42 = vcombine.high %v616_v36, %v624_v37  ;;  %v728_v15 = vld [vmem:[#allocation2 + $0x1298] sm:$0xff]  ;;  %v8357_v37 = vcombine.low %v712_v26, %v720_v27 }
 0x18a   :  { %5063 = vmatprep.subr.bf16.mxu0 %v8148_v43  ;;  %5186 = vmatprep.subr.bf16.mxu1 %v8150_v44  ;;  %v631_v43 = vld [vmem:[#allocation2 + $0xf90] sm:$0xff]  ;;  %v736_v35 = vld [vmem:[#allocation2 + $0x12d8] sm:$0xff] }
 0x18b   :  { %v639_v44 = vld [vmem:[#allocation2 + $0xfd0] sm:$0xff] }
 0x18c   :  { %v8275_v55 = vcombine.low %v631_v43, %v639_v44 }
 0x18d   :  { %5064 = vmatpush1.bf16.msra.mxu0 %v8147_v48  ;;  %5187 = vmatpush1.bf16.msra.mxu1 %v8149_v49  ;;  %v8276_v48 = vcombine.high %v631_v43, %v639_v44  ;;  %v8278_v49 = vcombine.high %v632_v45, %v640_v46  ;;  %v744_v43 = vld [vmem:[#allocation2 + $0x1318] sm:$0xff]  ;;  %v8373_v46 = vcombine.low %v728_v15, %v736_v35 }
 0x18e   :  { %5065 = vmatprep.subr.bf16.mxu0 %v8164_v50  ;;  %5188 = vmatprep.subr.bf16.mxu1 %v8166_v51  ;;  %v647_v50 = vld [vmem:[#allocation2 + $0x1010] sm:$0xff]  ;;  %v752_v44 = vld [vmem:[#allocation2 + $0x1358] sm:$0xff] }
 0x18f   :  { %v655_v51 = vld [vmem:[#allocation2 + $0x1050] sm:$0xff] }
 0x190   :  { %v8291_v0 = vcombine.low %v647_v50, %v655_v51 }
 0x191   :  { %5066 = vmatpush1.bf16.msra.mxu0 %v8163_v58  ;;  %5189 = vmatpush1.bf16.msra.mxu1 %v8165_v59  ;;  %v8292_v58 = vcombine.high %v647_v50, %v655_v51  ;;  %v8294_v59 = vcombine.high %v648_v52, %v656_v54  ;;  %v760_v50 = vld [vmem:[#allocation2 + $0x1398] sm:$0xff]  ;;  %v8389_v54 = vcombine.low %v744_v43, %v752_v44 }
 0x192   :  { %5067 = vmatprep.subr.bf16.mxu0 %v8180_v60  ;;  %5190 = vmatprep.subr.bf16.mxu1 %v8182_v61  ;;  %v663_v60 = vld [vmem:[#allocation2 + $0x1090] sm:$0xff]  ;;  %v768_v51 = vld [vmem:[#allocation2 + $0x13d8] sm:$0xff] }
 0x193   :  { %v671_v61 = vld [vmem:[#allocation2 + $0x10d0] sm:$0xff] }
 0x194   :  { %v8307_v8 = vcombine.low %v663_v60, %v671_v61 }
 0x195   :  { %5068 = vmatpush1.bf16.msra.mxu0 %v8179_v2  ;;  %5191 = vmatpush1.bf16.msra.mxu1 %v8181_v3  ;;  %v8308_v2 = vcombine.high %v663_v60, %v671_v61  ;;  %v8310_v3 = vcombine.high %v664_v62, %v672_v63  ;;  %v776_v60 = vld [vmem:[#allocation2 + $0x1418] sm:$0xff]  ;;  %v8405_v63 = vcombine.low %v760_v50, %v768_v51 }
 0x196   :  { %5069 = vmatprep.subr.bf16.mxu0 %v8196_v4  ;;  %5192 = vmatprep.subr.bf16.mxu1 %v8198_v5  ;;  %v679_v4 = vld [vmem:[#allocation2 + $0x1110] sm:$0xff]  ;;  %v784_v61 = vld [vmem:[#allocation2 + $0x1458] sm:$0xff] }
 0x197   :  { %v687_v5 = vld [vmem:[#allocation2 + $0x1150] sm:$0xff] }
 0x198   :  { %v8323_v18 = vcombine.low %v679_v4, %v687_v5 }
 0x199   :  { %5070 = vmatpush1.bf16.msra.mxu0 %v8195_v10  ;;  %5193 = vmatpush1.bf16.msra.mxu1 %v8197_v11  ;;  %v8324_v10 = vcombine.high %v679_v4, %v687_v5  ;;  %v8326_v11 = vcombine.high %v680_v6, %v688_v7  ;;  %v792_v4 = vld [vmem:[#allocation2 + $0x1498] sm:$0xff]  ;;  %v8421_v7 = vcombine.low %v776_v60, %v784_v61 }
 0x19a   :  { %5071 = vmatprep.subr.bf16.mxu0 %v8212_v13  ;;  %5194 = vmatprep.subr.bf16.mxu1 %v8214_v14  ;;  %v695_v13 = vld [vmem:[#allocation2 + $0x1190] sm:$0xff]  ;;  %v800_v5 = vld [vmem:[#allocation2 + $0x14d8] sm:$0xff] }
 0x19b   :  { %v703_v14 = vld [vmem:[#allocation2 + $0x11d0] sm:$0xff] }
 0x19c   :  { %v8339_v28 = vcombine.low %v695_v13, %v703_v14 }
 0x19d   :  { %5072 = vmatpush1.bf16.msra.mxu0 %v8211_v20  ;;  %5195 = vmatpush1.bf16.msra.mxu1 %v8213_v21  ;;  %v8340_v20 = vcombine.high %v695_v13, %v703_v14  ;;  %v8342_v21 = vcombine.high %v696_v16, %v704_v17  ;;  %v808_v13 = vld [vmem:[#allocation2 + $0x1518] sm:$0xff]  ;;  %v8437_v17 = vcombine.low %v792_v4, %v800_v5 }
 0x19e   :  { %5073 = vmatprep.subr.bf16.mxu0 %v8228_v22  ;;  %5196 = vmatprep.subr.bf16.mxu1 %v8230_v53  ;;  %v711_v22 = vld [vmem:[#allocation2 + $0x1210] sm:$0xff]  ;;  %v816_v14 = vld [vmem:[#allocation2 + $0x1558] sm:$0xff] }
 0x19f   :  { %v719_v53 = vld [vmem:[#allocation2 + $0x1250] sm:$0xff] }
 0x1a0   :  { %v8355_v36 = vcombine.low %v711_v22, %v719_v53 }
 0x1a1   :  { %5074 = vmatpush1.bf16.msra.mxu0 %v8227_v30  ;;  %5197 = vmatpush1.bf16.msra.mxu1 %v8229_v31  ;;  %v8356_v30 = vcombine.high %v711_v22, %v719_v53  ;;  %v8358_v31 = vcombine.high %v712_v26, %v720_v27  ;;  %v824_v22 = vld [vmem:[#allocation2 + $0x1598] sm:$0xff]  ;;  %v8453_v27 = vcombine.low %v808_v13, %v816_v14 }
 0x1a2   :  { %5075 = vmatprep.subr.bf16.mxu0 %v8244_v32  ;;  %5198 = vmatprep.subr.bf16.mxu1 %v8246_v33  ;;  %v727_v32 = vld [vmem:[#allocation2 + $0x1290] sm:$0xff]  ;;  %v832_v53 = vld [vmem:[#allocation2 + $0x15d8] sm:$0xff] }
 0x1a3   :  { %v735_v33 = vld [vmem:[#allocation2 + $0x12d0] sm:$0xff] }
 0x1a4   :  { %v8371_v45 = vcombine.low %v727_v32, %v735_v33 }
 0x1a5   :  { %5076 = vmatpush1.bf16.msra.mxu0 %v8243_v39  ;;  %5199 = vmatpush1.bf16.msra.mxu1 %v8245_v40  ;;  %v8372_v39 = vcombine.high %v727_v32, %v735_v33  ;;  %v8374_v40 = vcombine.high %v728_v15, %v736_v35  ;;  %v840_v32 = vld [vmem:[#allocation2 + $0x1618] sm:$0xff]  ;;  %v8469_v35 = vcombine.low %v824_v22, %v832_v53 }
 0x1a6   :  { %5077 = vmatprep.subr.bf16.mxu0 %v8260_v41  ;;  %5200 = vmatprep.subr.bf16.mxu1 %v8262_v42  ;;  %v743_v41 = vld [vmem:[#allocation2 + $0x1310] sm:$0xff]  ;;  %v848_v33 = vld [vmem:[#allocation2 + $0x1658] sm:$0xff] }
 0x1a7   :  { %v751_v42 = vld [vmem:[#allocation2 + $0x1350] sm:$0xff] }
 0x1a8   :  { %v8387_v52 = vcombine.low %v743_v41, %v751_v42 }
 0x1a9   :  { %5078 = vmatpush1.bf16.msra.mxu0 %v8259_v47  ;;  %5201 = vmatpush1.bf16.msra.mxu1 %v8261_v24  ;;  %v8388_v47 = vcombine.high %v743_v41, %v751_v42  ;;  %v8390_v24 = vcombine.high %v744_v43, %v752_v44  ;;  %v856_v41 = vld [vmem:[#allocation2 + $0x1698] sm:$0xff]  ;;  %v8485_v44 = vcombine.low %v840_v32, %v848_v33 }
 0x1aa   :  { %5079 = vmatprep.subr.bf16.mxu0 %v8276_v48  ;;  %5202 = vmatprep.subr.bf16.mxu1 %v8278_v49  ;;  %v759_v48 = vld [vmem:[#allocation2 + $0x1390] sm:$0xff]  ;;  %v864_v42 = vld [vmem:[#allocation2 + $0x16d8] sm:$0xff] }
 0x1ab   :  { %v767_v49 = vld [vmem:[#allocation2 + $0x13d0] sm:$0xff] }
 0x1ac   :  { %v8403_v62 = vcombine.low %v759_v48, %v767_v49 }
 0x1ad   :  { %5080 = vmatpush1.bf16.msra.mxu0 %v8275_v55  ;;  %5203 = vmatpush1.bf16.msra.mxu1 %v8277_v56  ;;  %v8404_v55 = vcombine.high %v759_v48, %v767_v49  ;;  %v8406_v56 = vcombine.high %v760_v50, %v768_v51  ;;  %v872_v48 = vld [vmem:[#allocation2 + $0x1718] sm:$0xff]  ;;  %v8501_v51 = vcombine.low %v856_v41, %v864_v42 }
 0x1ae   :  { %5090 = vmatprep.subr.bf16.mxu0 %v8292_v58  ;;  %5213 = vmatprep.subr.bf16.mxu1 %v8294_v59  ;;  %v775_v58 = vld [vmem:[#allocation2 + $0x1410] sm:$0xff]  ;;  %v880_v49 = vld [vmem:[#allocation2 + $0x1758] sm:$0xff] }
 0x1af   :  { %v783_v59 = vld [vmem:[#allocation2 + $0x1450] sm:$0xff] }
 0x1b0   :  { %5082 = vmatmul.mubr.bf16.vlgmr.msra.gmra.mrb[4].mxu0 %v9586_v25  ;;  %5205 = vmatmul.mubr.bf16.vlgmr.msra.gmra.mrb[4].mxu1 %v9586_v25  ;;  %v8419_v6 = vcombine.low %v775_v58, %v783_v59 }
 0x1b1   :  { %5091 = vmatpush1.bf16.msra.mxu0 %v8291_v0  ;;  %5214 = vmatpush1.bf16.msra.mxu1 %v8293_v1  ;;  %v8420_v0 = vcombine.high %v775_v58, %v783_v59  ;;  %v8422_v1 = vcombine.high %v776_v60, %v784_v61  ;;  %v888_v58 = vld [vmem:[#allocation2 + $0x1798] sm:$0xff]  ;;  %v8517_v61 = vcombine.low %v872_v48, %v880_v49 }
 0x1b2   :  { %5092 = vmatprep.subr.bf16.mxu0 %v8308_v2  ;;  %5215 = vmatprep.subr.bf16.mxu1 %v8310_v3  ;;  %v791_v2 = vld [vmem:[#allocation2 + $0x1490] sm:$0xff]  ;;  %v896_v59 = vld [vmem:[#allocation2 + $0x17d8] sm:$0xff] }
 0x1b3   :  { %5122 = vmatprep.mubr.bf16.mxu0 %v9590_v34  ;;  %5245 = vmatprep.mubr.bf16.mxu1 %v9590_v34  ;;  %v799_v3 = vld [vmem:[#allocation2 + $0x14d0] sm:$0xff] }
 0x1b4   :  { %v8435_v16 = vcombine.low %v791_v2, %v799_v3 }
 0x1b5   :  { %5093 = vmatpush1.bf16.msra.mxu0 %v8307_v8  ;;  %5216 = vmatpush1.bf16.msra.mxu1 %v8309_v9  ;;  %v8436_v8 = vcombine.high %v791_v2, %v799_v3  ;;  %v8438_v9 = vcombine.high %v792_v4, %v800_v5  ;;  %v138_v2 = vld [vmem:[#allocation2 + $0x28] sm:$0xff]  ;;  %v8533_v5 = vcombine.low %v888_v58, %v896_v59 }
 0x1b6   :  { %5094 = vmatprep.subr.bf16.mxu0 %v8324_v10  ;;  %5217 = vmatprep.subr.bf16.mxu1 %v8326_v11  ;;  %v807_v10 = vld [vmem:[#allocation2 + $0x1510] sm:$0xff]  ;;  %v146_v3 = vld [vmem:[#allocation2 + $0x68] sm:$0xff] }
 0x1b7   :  { %v815_v11 = vld [vmem:[#allocation2 + $0x1550] sm:$0xff] }
 0x1b8   :  { %v8451_v26 = vcombine.low %v807_v10, %v815_v11 }
 0x1b9   :  { %5095 = vmatpush1.bf16.msra.mxu0 %v8323_v18  ;;  %5218 = vmatpush1.bf16.msra.mxu1 %v8325_v19  ;;  %v8452_v18 = vcombine.high %v807_v10, %v815_v11  ;;  %v8454_v19 = vcombine.high %v808_v13, %v816_v14  ;;  %v154_v10 = vld [vmem:[#allocation2 + $0xa8] sm:$0xff]  ;;  %v7785_v14 = vcombine.low %v138_v2, %v146_v3 }
 0x1ba   :  { %5096 = vmatprep.subr.bf16.mxu0 %v8340_v20  ;;  %5219 = vmatprep.subr.bf16.mxu1 %v8342_v21  ;;  %v823_v20 = vld [vmem:[#allocation2 + $0x1590] sm:$0xff]  ;;  %v162_v11 = vld [vmem:[#allocation2 + $0xe8] sm:$0xff] }
 0x1bb   :  { %v831_v21 = vld [vmem:[#allocation2 + $0x15d0] sm:$0xff] }
 0x1bc   :  { %v8467_v15 = vcombine.low %v823_v20, %v831_v21 }
 0x1bd   :  { %5097 = vmatpush1.bf16.msra.mxu0 %v8339_v28  ;;  %5220 = vmatpush1.bf16.msra.mxu1 %v8341_v29  ;;  %v8468_v28 = vcombine.high %v823_v20, %v831_v21  ;;  %v8470_v29 = vcombine.high %v824_v22, %v832_v53  ;;  %v170_v20 = vld [vmem:[#allocation2 + $0x128] sm:$0xff]  ;;  %v7801_v53 = vcombine.low %v154_v10, %v162_v11 }
 0x1be   :  { %5098 = vmatprep.subr.bf16.mxu0 %v8356_v30  ;;  %5221 = vmatprep.subr.bf16.mxu1 %v8358_v31  ;;  %v839_v30 = vld [vmem:[#allocation2 + $0x1610] sm:$0xff]  ;;  %v178_v21 = vld [vmem:[#allocation2 + $0x168] sm:$0xff] }
 0x1bf   :  { %v847_v31 = vld [vmem:[#allocation2 + $0x1650] sm:$0xff] }
 0x1c0   :  { %v8483_v43 = vcombine.low %v839_v30, %v847_v31 }
 0x1c1   :  { %5099 = vmatpush1.bf16.msra.mxu0 %v8355_v36  ;;  %5222 = vmatpush1.bf16.msra.mxu1 %v8357_v37  ;;  %v8484_v36 = vcombine.high %v839_v30, %v847_v31  ;;  %v8486_v37 = vcombine.high %v840_v32, %v848_v33  ;;  %v186_v30 = vld [vmem:[#allocation2 + $0x1a8] sm:$0xff]  ;;  %v7817_v33 = vcombine.low %v170_v20, %v178_v21 }
 0x1c2   :  { %5100 = vmatprep.subr.bf16.mxu0 %v8372_v39  ;;  %5223 = vmatprep.subr.bf16.mxu1 %v8374_v40  ;;  %v855_v39 = vld [vmem:[#allocation2 + $0x1690] sm:$0xff]  ;;  %v194_v31 = vld [vmem:[#allocation2 + $0x1e8] sm:$0xff] }
 0x1c3   :  { %v863_v40 = vld [vmem:[#allocation2 + $0x16d0] sm:$0xff] }
 0x1c4   :  { %v8499_v50 = vcombine.low %v855_v39, %v863_v40 }
 0x1c5   :  { %5101 = vmatpush1.bf16.msra.mxu0 %v8371_v45  ;;  %5224 = vmatpush1.bf16.msra.mxu1 %v8373_v46  ;;  %v8500_v45 = vcombine.high %v855_v39, %v863_v40  ;;  %v8502_v46 = vcombine.high %v856_v41, %v864_v42  ;;  %v202_v39 = vld [vmem:[#allocation2 + $0x228] sm:$0xff]  ;;  %v7833_v42 = vcombine.low %v186_v30, %v194_v31 }
 0x1c6   :  { %5102 = vmatprep.subr.bf16.mxu0 %v8388_v47  ;;  %5225 = vmatprep.subr.bf16.mxu1 %v8390_v24  ;;  %v871_v47 = vld [vmem:[#allocation2 + $0x1710] sm:$0xff]  ;;  %v210_v40 = vld [vmem:[#allocation2 + $0x268] sm:$0xff] }
 0x1c7   :  { %v879_v24 = vld [vmem:[#allocation2 + $0x1750] sm:$0xff] }
 0x1c8   :  { %v8515_v60 = vcombine.low %v871_v47, %v879_v24 }
 0x1c9   :  { %5103 = vmatpush1.bf16.msra.mxu0 %v8387_v52  ;;  %5226 = vmatpush1.bf16.msra.mxu1 %v8389_v54  ;;  %v8516_v52 = vcombine.high %v871_v47, %v879_v24  ;;  %v8518_v54 = vcombine.high %v872_v48, %v880_v49  ;;  %v218_v47 = vld [vmem:[#allocation2 + $0x2a8] sm:$0xff]  ;;  %v7849_v49 = vcombine.low %v202_v39, %v210_v40 }
 0x1ca   :  { %5104 = vmatprep.subr.bf16.mxu0 %v8404_v55  ;;  %5227 = vmatprep.subr.bf16.mxu1 %v8406_v56  ;;  %v887_v55 = vld [vmem:[#allocation2 + $0x1790] sm:$0xff]  ;;  %v226_v24 = vld [vmem:[#allocation2 + $0x2e8] sm:$0xff] }
 0x1cb   :  { %v895_v56 = vld [vmem:[#allocation2 + $0x17d0] sm:$0xff] }
 0x1cc   :  { %v8531_v4 = vcombine.low %v887_v55, %v895_v56 }
 0x1cd   :  { %5105 = vmatpush1.bf16.msra.mxu0 %v8403_v62  ;;  %5228 = vmatpush1.bf16.msra.mxu1 %v8405_v63  ;;  %v8532_v62 = vcombine.high %v887_v55, %v895_v56  ;;  %v8534_v63 = vcombine.high %v888_v58, %v896_v59  ;;  %v234_v55 = vld [vmem:[#allocation2 + $0x328] sm:$0xff]  ;;  %v7865_v59 = vcombine.low %v218_v47, %v226_v24 }
 0x1ce   :  { %5106 = vmatprep.subr.bf16.mxu0 %v8420_v0  ;;  %5229 = vmatprep.subr.bf16.mxu1 %v8422_v1  ;;  %v137_v0 = vld [vmem:[#allocation2 + $0x20] sm:$0xff]  ;;  %v242_v56 = vld [vmem:[#allocation2 + $0x368] sm:$0xff] }
 0x1cf   :  { %v145_v1 = vld [vmem:[#allocation2 + $0x60] sm:$0xff] }
 0x1d0   :  { %v7783_v13 = vcombine.low %v137_v0, %v145_v1 }
 0x1d1   :  { %5107 = vmatpush1.bf16.msra.mxu0 %v8419_v6  ;;  %5230 = vmatpush1.bf16.msra.mxu1 %v8421_v7  ;;  %v7784_v6 = vcombine.high %v137_v0, %v145_v1  ;;  %v7786_v7 = vcombine.high %v138_v2, %v146_v3  ;;  %v257_v0 = vld [vmem:[#allocation2 + $0x3e0] sm:$0xff]  ;;  %v250_v3 = vld [vmem:[#allocation2 + $0x3a8] sm:$0xff] }
 0x1d2   :  { %5108 = vmatprep.subr.bf16.mxu0 %v8436_v8  ;;  %5231 = vmatprep.subr.bf16.mxu1 %v8438_v9  ;;  %v153_v8 = vld [vmem:[#allocation2 + $0xa0] sm:$0xff] }
 0x1d3   :  { %v161_v9 = vld [vmem:[#allocation2 + $0xe0] sm:$0xff] }
 0x1d4   :  { %v7799_v22 = vcombine.low %v153_v8, %v161_v9 }
 0x1d5   :  { %5109 = vmatpush1.bf16.msra.mxu0 %v8435_v16  ;;  %5232 = vmatpush1.bf16.msra.mxu1 %v8437_v17  ;;  %v7800_v16 = vcombine.high %v153_v8, %v161_v9  ;;  %v7802_v17 = vcombine.high %v154_v10, %v162_v11  ;;  %v7881_v10 = vcombine.low %v234_v55, %v242_v56 }
 0x1d6   :  { %5110 = vmatprep.subr.bf16.mxu0 %v8452_v18  ;;  %5233 = vmatprep.subr.bf16.mxu1 %v8454_v19  ;;  %v169_v18 = vld [vmem:[#allocation2 + $0x120] sm:$0xff] }
 0x1d7   :  { %v177_v19 = vld [vmem:[#allocation2 + $0x160] sm:$0xff] }
 0x1d8   :  { %v7815_v32 = vcombine.low %v169_v18, %v177_v19 }
 0x1d9   :  { %5111 = vmatpush1.bf16.msra.mxu0 %v8451_v26  ;;  %5234 = vmatpush1.bf16.msra.mxu1 %v8453_v27  ;;  %v7816_v26 = vcombine.high %v169_v18, %v177_v19  ;;  %v7818_v27 = vcombine.high %v170_v20, %v178_v21  ;;  %v266_v18 = vld [vmem:[#allocation2 + $0x428] sm:$0xff] }
 0x1da   :  { %5112 = vmatprep.subr.bf16.mxu0 %v8468_v28  ;;  %5235 = vmatprep.subr.bf16.mxu1 %v8470_v29  ;;  %v185_v28 = vld [vmem:[#allocation2 + $0x1a0] sm:$0xff]  ;;  %v274_v19 = vld [vmem:[#allocation2 + $0x468] sm:$0xff] }
 0x1db   :  { %v193_v29 = vld [vmem:[#allocation2 + $0x1e0] sm:$0xff] }
 0x1dc   :  { %v7831_v41 = vcombine.low %v185_v28, %v193_v29 }
 0x1dd   :  { %5113 = vmatpush1.bf16.msra.mxu0 %v8467_v15  ;;  %5236 = vmatpush1.bf16.msra.mxu1 %v8469_v35  ;;  %v7832_v15 = vcombine.high %v185_v28, %v193_v29  ;;  %v7834_v35 = vcombine.high %v186_v30, %v194_v31  ;;  %v282_v28 = vld [vmem:[#allocation2 + $0x4a8] sm:$0xff]  ;;  %v7913_v31 = vcombine.low %v266_v18, %v274_v19 }
 0x1de   :  { %5114 = vmatprep.subr.bf16.mxu0 %v8484_v36  ;;  %5237 = vmatprep.subr.bf16.mxu1 %v8486_v37  ;;  %v201_v36 = vld [vmem:[#allocation2 + $0x220] sm:$0xff]  ;;  %v290_v29 = vld [vmem:[#allocation2 + $0x4e8] sm:$0xff] }
 0x1df   :  { %v209_v37 = vld [vmem:[#allocation2 + $0x260] sm:$0xff] }
 0x1e0   :  { %v7847_v48 = vcombine.low %v201_v36, %v209_v37 }
 0x1e1   :  { %5115 = vmatpush1.bf16.msra.mxu0 %v8483_v43  ;;  %5238 = vmatpush1.bf16.msra.mxu1 %v8485_v44  ;;  %v7848_v43 = vcombine.high %v201_v36, %v209_v37  ;;  %v7850_v44 = vcombine.high %v202_v39, %v210_v40  ;;  %v298_v36 = vld [vmem:[#allocation2 + $0x528] sm:$0xff]  ;;  %v7929_v40 = vcombine.low %v282_v28, %v290_v29 }
 0x1e2   :  { %5116 = vmatprep.subr.bf16.mxu0 %v8500_v45  ;;  %5239 = vmatprep.subr.bf16.mxu1 %v8502_v46  ;;  %v217_v45 = vld [vmem:[#allocation2 + $0x2a0] sm:$0xff]  ;;  %v306_v37 = vld [vmem:[#allocation2 + $0x568] sm:$0xff] }
 0x1e3   :  { %v225_v46 = vld [vmem:[#allocation2 + $0x2e0] sm:$0xff] }
 0x1e4   :  { %v7863_v58 = vcombine.low %v217_v45, %v225_v46 }
 0x1e5   :  { %5117 = vmatpush1.bf16.msra.mxu0 %v8499_v50  ;;  %5240 = vmatpush1.bf16.msra.mxu1 %v8501_v51  ;;  %v7864_v50 = vcombine.high %v217_v45, %v225_v46  ;;  %v7866_v51 = vcombine.high %v218_v47, %v226_v24  ;;  %v314_v45 = vld [vmem:[#allocation2 + $0x5a8] sm:$0xff]  ;;  %v7945_v24 = vcombine.low %v298_v36, %v306_v37 }
 0x1e6   :  { %5118 = vmatprep.subr.bf16.mxu0 %v8516_v52  ;;  %5241 = vmatprep.subr.bf16.mxu1 %v8518_v54  ;;  %v233_v52 = vld [vmem:[#allocation2 + $0x320] sm:$0xff]  ;;  %v322_v46 = vld [vmem:[#allocation2 + $0x5e8] sm:$0xff] }
 0x1e7   :  { %v241_v54 = vld [vmem:[#allocation2 + $0x360] sm:$0xff] }
 0x1e9   :  { %5119 = vmatpush1.bf16.msra.mxu0 %v8515_v60  ;;  %5242 = vmatpush1.bf16.msra.mxu1 %v8517_v61  ;;  %v7880_v60 = vcombine.high %v233_v52, %v241_v54 }
 0x1ea   :  { %5120 = vmatprep.subr.bf16.mxu0 %v8532_v62  ;;  %5243 = vmatprep.subr.bf16.mxu1 %v8534_v63  ;;  %v7882_v62 = vcombine.high %v234_v55, %v242_v56  ;;  %v249_v63 = vld [vmem:[#allocation2 + $0x3a0] sm:$0xff]  ;;  %v7961_v56 = vcombine.low %v314_v45, %v322_v46 }
 0x1eb   :  { %v7896_v11 = vcombine.high %v249_v63, %v257_v0  ;;  %v7895_v20 = vcombine.low %v249_v63, %v257_v0  ;;  %v346_v63 = vld [vmem:[#allocation2 + $0x6a8] sm:$0xff] }
 0x1ec   :  { %v354_v0 = vld [vmem:[#allocation2 + $0x6e8] sm:$0xff] }
 0x1ed   :  { %5121 = vmatpush1.bf16.msra.mxu0 %v8531_v4  ;;  %5244 = vmatpush1.bf16.msra.mxu1 %v8533_v5  ;;  %v258_v4 = vld [vmem:[#allocation2 + $0x3e8] sm:$0xff] }
 0x1ee   :  { %5254 = vmatprep.subr.bf16.mxu0 %v7784_v6  ;;  %5377 = vmatprep.subr.bf16.mxu1 %v7786_v7  ;;  %v7879_v7 = vcombine.low %v233_v52, %v241_v54  ;;  %v7897_v21 = vcombine.low %v250_v3, %v258_v4  ;;  %v330_v52 = vld [vmem:[#allocation2 + $0x628] sm:$0xff] }
 0x1ef   :  { %v338_v54 = vld [vmem:[#allocation2 + $0x668] sm:$0xff] }
 0x1f0   :  { %5123 = vmatmul.mubr.bf16.vlgmr.msra.gmra.mrb[4].mxu0 %v9598_v38  ;;  %5246 = vmatmul.mubr.bf16.vlgmr.msra.gmra.mrb[4].mxu1 %v9598_v38 }
 0x1f1   :  { %5255 = vmatpush1.bf16.msra.mxu0 %v7783_v13  ;;  %5378 = vmatpush1.bf16.msra.mxu1 %v7785_v14  ;;  %v7898_v14 = vcombine.high %v250_v3, %v258_v4  ;;  %v7977_v4 = vcombine.low %v330_v52, %v338_v54 }
 0x1f2   :  { %5256 = vmatprep.subr.bf16.mxu0 %v7800_v16  ;;  %5379 = vmatprep.subr.bf16.mxu1 %v7802_v17  ;;  %v265_v16 = vld [vmem:[#allocation2 + $0x420] sm:$0xff] }
 0x1f3   :  { %5286 = vmatprep.mubr.bf16.mxu0 %v9558_v57  ;;  %5409 = vmatprep.mubr.bf16.mxu1 %v9558_v57  ;;  %v273_v17 = vld [vmem:[#allocation2 + $0x460] sm:$0xff] }
 0x1f4   :  { %v7911_v30 = vcombine.low %v265_v16, %v273_v17 }
 0x1f5   :  { %5257 = vmatpush1.bf16.msra.mxu0 %v7799_v22  ;;  %5380 = vmatpush1.bf16.msra.mxu1 %v7801_v53  ;;  %v7912_v22 = vcombine.high %v265_v16, %v273_v17  ;;  %v7914_v53 = vcombine.high %v266_v18, %v274_v19  ;;  %v377_v18 = vld [vmem:[#allocation2 + $0x7a0] sm:$0xff] }
 0x1f6   :  { %5258 = vmatprep.subr.bf16.mxu0 %v7816_v26  ;;  %5381 = vmatprep.subr.bf16.mxu1 %v7818_v27  ;;  %v281_v26 = vld [vmem:[#allocation2 + $0x4a0] sm:$0xff] }
 0x1f7   :  { %v289_v27 = vld [vmem:[#allocation2 + $0x4e0] sm:$0xff] }
 0x1f8   :  { %v7927_v39 = vcombine.low %v281_v26, %v289_v27  ;;  %v385_v19 = vld [vmem:[#allocation2 + $0x7e0] sm:$0xff] }
 0x1f9   :  { %5259 = vmatpush1.bf16.msra.mxu0 %v7815_v32  ;;  %5382 = vmatpush1.bf16.msra.mxu1 %v7817_v33  ;;  %v7928_v32 = vcombine.high %v281_v26, %v289_v27  ;;  %v7930_v33 = vcombine.high %v282_v28, %v290_v29  ;;  %v8024_v26 = vcombine.high %v377_v18, %v385_v19  ;;  %v393_v28 = vld [vmem:[#allocation2 + $0x820] sm:$0xff] }
 0x1fa   :  { %5260 = vmatprep.subr.bf16.mxu0 %v7832_v15  ;;  %5383 = vmatprep.subr.bf16.mxu1 %v7834_v35  ;;  %v297_v15 = vld [vmem:[#allocation2 + $0x520] sm:$0xff] }
 0x1fb   :  { %v305_v35 = vld [vmem:[#allocation2 + $0x560] sm:$0xff] }
 0x1fc   :  { %v7943_v47 = vcombine.low %v297_v15, %v305_v35  ;;  %v401_v29 = vld [vmem:[#allocation2 + $0x860] sm:$0xff] }
 0x1fd   :  { %5261 = vmatpush1.bf16.msra.mxu0 %v7831_v41  ;;  %5384 = vmatpush1.bf16.msra.mxu1 %v7833_v42  ;;  %v7944_v41 = vcombine.high %v297_v15, %v305_v35  ;;  %v7946_v42 = vcombine.high %v298_v36, %v306_v37  ;;  %v8040_v15 = vcombine.high %v393_v28, %v401_v29  ;;  %v409_v36 = vld [vmem:[#allocation2 + $0x8a0] sm:$0xff] }
 0x1fe   :  { %5262 = vmatprep.subr.bf16.mxu0 %v7848_v43  ;;  %5385 = vmatprep.subr.bf16.mxu1 %v7850_v44  ;;  %v313_v43 = vld [vmem:[#allocation2 + $0x5a0] sm:$0xff] }
 0x1ff   :  { %v321_v44 = vld [vmem:[#allocation2 + $0x5e0] sm:$0xff] }
 0x200   :  { %v7959_v55 = vcombine.low %v313_v43, %v321_v44  ;;  %v417_v37 = vld [vmem:[#allocation2 + $0x8e0] sm:$0xff] }
 0x201   :  { %5263 = vmatpush1.bf16.msra.mxu0 %v7847_v48  ;;  %5386 = vmatpush1.bf16.msra.mxu1 %v7849_v49  ;;  %v7960_v48 = vcombine.high %v313_v43, %v321_v44  ;;  %v7962_v49 = vcombine.high %v314_v45, %v322_v46  ;;  %v8056_v43 = vcombine.high %v409_v36, %v417_v37  ;;  %v425_v45 = vld [vmem:[#allocation2 + $0x920] sm:$0xff] }
 0x202   :  { %5264 = vmatprep.subr.bf16.mxu0 %v7864_v50  ;;  %5387 = vmatprep.subr.bf16.mxu1 %v7866_v51  ;;  %v329_v50 = vld [vmem:[#allocation2 + $0x620] sm:$0xff] }
 0x203   :  { %v9616_v61 = vpop.f32.mrb[0].mxu0  ;;  %v9618_v1 = vpop.f32.mrb[0].mxu1  ;;  %v337_v51 = vld [vmem:[#allocation2 + $0x660] sm:$0xff] }
 0x204   :  { %v9620_v2 = vpop.f32.mrb[1].mxu0  ;;  %v9622_v5 = vpop.f32.mrb[1].mxu1  ;;  %v7975_v3 = vcombine.low %v329_v50, %v337_v51  ;;  %v433_v46 = vld [vmem:[#allocation2 + $0x960] sm:$0xff] }
 0x205   :  { %v4882_v6 = vpop.f32.mrb[2].mxu0  ;;  %5265 = vmatpush1.bf16.msra.mxu0 %v7863_v58  ;;  %v5005_v8 = vpop.f32.mrb[2].mxu1  ;;  %5388 = vmatpush1.bf16.msra.mxu1 %v7865_v59  ;;  %v7976_v58 = vcombine.high %v329_v50, %v337_v51  ;;  %v7978_v59 = vcombine.high %v330_v52, %v338_v54  ;;  %v8072_v50 = vcombine.high %v425_v45, %v433_v46  ;;  %v441_v52 = vld [vmem:[#allocation2 + $0x9a0] sm:$0xff] }
 0x206   :  { %v4883_v9 = vpop.f32.mrb[3].mxu0  ;;  %5266 = vmatprep.subr.bf16.mxu0 %v7880_v60  ;;  %v5006_v13 = vpop.f32.mrb[3].mxu1  ;;  %5389 = vmatprep.subr.bf16.mxu1 %v7882_v62  ;;  %v345_v60 = vld [vmem:[#allocation2 + $0x6a0] sm:$0xff] }
 0x207   :  { %v353_v62 = vld [vmem:[#allocation2 + $0x6e0] sm:$0xff] }
 0x208   :  { %v7992_v6 = vcombine.high %v345_v60, %v353_v62  ;;  %v361_v8 = vld [vmem:[#allocation2 + $0x720] sm:$0xff]  ;;  %v7991_v13 = vcombine.low %v345_v60, %v353_v62 }
 0x209   :  { %5267 = vmatpush1.bf16.msra.mxu0 %v7879_v7  ;;  %5390 = vmatpush1.bf16.msra.mxu1 %v7881_v10  ;;  %v7994_v7 = vcombine.high %v346_v63, %v354_v0  ;;  %v369_v9 = vld [vmem:[#allocation2 + $0x760] sm:$0xff]  ;;  %v362_v10 = vld [vmem:[#allocation2 + $0x728] sm:$0xff] }
 0x20a   :  { %5268 = vmatprep.subr.bf16.mxu0 %v7896_v11  ;;  %5391 = vmatprep.subr.bf16.mxu1 %v7898_v14  ;;  %v370_v11 = vld [vmem:[#allocation2 + $0x768] sm:$0xff]  ;;  %v7993_v14 = vcombine.low %v346_v63, %v354_v0  ;;  %v8008_v16 = vcombine.high %v361_v8, %v369_v9  ;;  %v449_v54 = vld [vmem:[#allocation2 + $0x9e0] sm:$0xff] }
 0x20b   :  { %v8010_v17 = vcombine.high %v362_v10, %v370_v11  ;;  %v8088_v60 = vcombine.high %v441_v52, %v449_v54  ;;  %v457_v63 = vld [vmem:[#allocation2 + $0xa20] sm:$0xff] }
 0x20c   :  { %v465_v0 = vld [vmem:[#allocation2 + $0xa60] sm:$0xff] }
 0x20d   :  { %5269 = vmatpush1.bf16.msra.mxu0 %v7895_v20  ;;  %5392 = vmatpush1.bf16.msra.mxu1 %v7897_v21  ;;  %v378_v20 = vld [vmem:[#allocation2 + $0x7a8] sm:$0xff] }
 0x20e   :  { %5270 = vmatprep.subr.bf16.mxu0 %v7912_v22  ;;  %5393 = vmatprep.subr.bf16.mxu1 %v7914_v53  ;;  %v386_v21 = vld [vmem:[#allocation2 + $0x7e8] sm:$0xff]  ;;  %v8007_v22 = vcombine.low %v361_v8, %v369_v9  ;;  %v8009_v53 = vcombine.low %v362_v10, %v370_v11  ;;  %v8104_v8 = vcombine.high %v457_v63, %v465_v0  ;;  %v473_v10 = vld [vmem:[#allocation2 + $0xaa0] sm:$0xff] }
 0x20f   :  { %v8026_v27 = vcombine.high %v378_v20, %v386_v21  ;;  %v481_v11 = vld [vmem:[#allocation2 + $0xae0] sm:$0xff] }
 0x211   :  { %5271 = vmatpush1.bf16.msra.mxu0 %v7911_v30  ;;  %5394 = vmatpush1.bf16.msra.mxu1 %v7913_v31  ;;  %v394_v30 = vld [vmem:[#allocation2 + $0x828] sm:$0xff] }
 0x212   :  { %5272 = vmatprep.subr.bf16.mxu0 %v7928_v32  ;;  %5395 = vmatprep.subr.bf16.mxu1 %v7930_v33  ;;  %v402_v31 = vld [vmem:[#allocation2 + $0x868] sm:$0xff]  ;;  %v8023_v32 = vcombine.low %v377_v18, %v385_v19  ;;  %v8025_v33 = vcombine.low %v378_v20, %v386_v21  ;;  %v8120_v18 = vcombine.high %v473_v10, %v481_v11  ;;  %v489_v20 = vld [vmem:[#allocation2 + $0xb20] sm:$0xff] }
 0x213   :  { %v8042_v35 = vcombine.high %v394_v30, %v402_v31  ;;  %v497_v21 = vld [vmem:[#allocation2 + $0xb60] sm:$0xff] }
 0x215   :  { %5273 = vmatpush1.bf16.msra.mxu0 %v7927_v39  ;;  %5396 = vmatpush1.bf16.msra.mxu1 %v7929_v40  ;;  %v410_v39 = vld [vmem:[#allocation2 + $0x8a8] sm:$0xff] }
 0x216   :  { %5274 = vmatprep.subr.bf16.mxu0 %v7944_v41  ;;  %5397 = vmatprep.subr.bf16.mxu1 %v7946_v42  ;;  %v418_v40 = vld [vmem:[#allocation2 + $0x8e8] sm:$0xff]  ;;  %v8039_v41 = vcombine.low %v393_v28, %v401_v29  ;;  %v8041_v42 = vcombine.low %v394_v30, %v402_v31  ;;  %v8136_v28 = vcombine.high %v489_v20, %v497_v21  ;;  %v505_v30 = vld [vmem:[#allocation2 + $0xba0] sm:$0xff] }
 0x217   :  { %v8058_v44 = vcombine.high %v410_v39, %v418_v40  ;;  %v513_v31 = vld [vmem:[#allocation2 + $0xbe0] sm:$0xff] }
 0x219   :  { %5275 = vmatpush1.bf16.msra.mxu0 %v7943_v47  ;;  %5398 = vmatpush1.bf16.msra.mxu1 %v7945_v24  ;;  %v426_v47 = vld [vmem:[#allocation2 + $0x928] sm:$0xff] }
 0x21a   :  { %5276 = vmatprep.subr.bf16.mxu0 %v7960_v48  ;;  %5399 = vmatprep.subr.bf16.mxu1 %v7962_v49  ;;  %v434_v24 = vld [vmem:[#allocation2 + $0x968] sm:$0xff]  ;;  %v8055_v48 = vcombine.low %v409_v36, %v417_v37  ;;  %v8057_v49 = vcombine.low %v410_v39, %v418_v40  ;;  %v8152_v36 = vcombine.high %v505_v30, %v513_v31  ;;  %v521_v39 = vld [vmem:[#allocation2 + $0xc20] sm:$0xff] }
 0x21b   :  { %v8074_v51 = vcombine.high %v426_v47, %v434_v24  ;;  %v529_v40 = vld [vmem:[#allocation2 + $0xc60] sm:$0xff] }
 0x21d   :  { %5277 = vmatpush1.bf16.msra.mxu0 %v7959_v55  ;;  %5400 = vmatpush1.bf16.msra.mxu1 %v7961_v56  ;;  %v442_v55 = vld [vmem:[#allocation2 + $0x9a8] sm:$0xff] }
 0x21e   :  { %5278 = vmatprep.subr.bf16.mxu0 %v7976_v58  ;;  %5401 = vmatprep.subr.bf16.mxu1 %v7978_v59  ;;  %v450_v56 = vld [vmem:[#allocation2 + $0x9e8] sm:$0xff]  ;;  %v8071_v58 = vcombine.low %v425_v45, %v433_v46  ;;  %v8073_v59 = vcombine.low %v426_v47, %v434_v24  ;;  %v8168_v45 = vcombine.high %v521_v39, %v529_v40  ;;  %v537_v47 = vld [vmem:[#allocation2 + $0xca0] sm:$0xff] }
 0x21f   :  { %v8090_v62 = vcombine.high %v442_v55, %v450_v56  ;;  %v545_v24 = vld [vmem:[#allocation2 + $0xce0] sm:$0xff] }
 0x221   :  { %5279 = vmatpush1.bf16.msra.mxu0 %v7975_v3  ;;  %5402 = vmatpush1.bf16.msra.mxu1 %v7977_v4  ;;  %v458_v3 = vld [vmem:[#allocation2 + $0xa28] sm:$0xff] }
 0x222   :  { %5280 = vmatprep.subr.bf16.mxu0 %v7992_v6  ;;  %5403 = vmatprep.subr.bf16.mxu1 %v7994_v7  ;;  %v466_v4 = vld [vmem:[#allocation2 + $0xa68] sm:$0xff]  ;;  %v8087_v6 = vcombine.low %v441_v52, %v449_v54  ;;  %v8089_v7 = vcombine.low %v442_v55, %v450_v56  ;;  %v8184_v52 = vcombine.high %v537_v47, %v545_v24  ;;  %v553_v55 = vld [vmem:[#allocation2 + $0xd20] sm:$0xff] }
 0x223   :  { %v8106_v9 = vcombine.high %v458_v3, %v466_v4  ;;  %v561_v56 = vld [vmem:[#allocation2 + $0xd60] sm:$0xff] }
 0x225   :  { %5281 = vmatpush1.bf16.msra.mxu0 %v7991_v13  ;;  %5404 = vmatpush1.bf16.msra.mxu1 %v7993_v14  ;;  %v474_v13 = vld [vmem:[#allocation2 + $0xaa8] sm:$0xff] }
 0x226   :  { %5282 = vmatprep.subr.bf16.mxu0 %v8008_v16  ;;  %5405 = vmatprep.subr.bf16.mxu1 %v8010_v17  ;;  %v482_v14 = vld [vmem:[#allocation2 + $0xae8] sm:$0xff]  ;;  %v8103_v16 = vcombine.low %v457_v63, %v465_v0  ;;  %v8105_v17 = vcombine.low %v458_v3, %v466_v4  ;;  %v8200_v63 = vcombine.high %v553_v55, %v561_v56  ;;  %v569_v3 = vld [vmem:[#allocation2 + $0xda0] sm:$0xff] }
 0x227   :  { %v8122_v19 = vcombine.high %v474_v13, %v482_v14  ;;  %v577_v4 = vld [vmem:[#allocation2 + $0xde0] sm:$0xff] }
 0x229   :  { %5283 = vmatpush1.bf16.msra.mxu0 %v8007_v22  ;;  %5406 = vmatpush1.bf16.msra.mxu1 %v8009_v53  ;;  %v490_v22 = vld [vmem:[#allocation2 + $0xb28] sm:$0xff] }
 0x22a   :  { %5284 = vmatprep.subr.bf16.mxu0 %v8024_v26  ;;  %5407 = vmatprep.subr.bf16.mxu1 %v8026_v27  ;;  %v498_v53 = vld [vmem:[#allocation2 + $0xb68] sm:$0xff]  ;;  %v8119_v26 = vcombine.low %v473_v10, %v481_v11  ;;  %v8121_v27 = vcombine.low %v474_v13, %v482_v14  ;;  %v8216_v10 = vcombine.high %v569_v3, %v577_v4  ;;  %v585_v13 = vld [vmem:[#allocation2 + $0xe20] sm:$0xff] }
 0x22b   :  { %v8138_v29 = vcombine.high %v490_v22, %v498_v53  ;;  %v593_v14 = vld [vmem:[#allocation2 + $0xe60] sm:$0xff] }
 0x22d   :  { %5285 = vmatpush1.bf16.msra.mxu0 %v8023_v32  ;;  %5408 = vmatpush1.bf16.msra.mxu1 %v8025_v33  ;;  %v506_v32 = vld [vmem:[#allocation2 + $0xba8] sm:$0xff] }
 0x22e   :  { %5295 = vmatprep.subr.bf16.mxu0 %v8040_v15  ;;  %5418 = vmatprep.subr.bf16.mxu1 %v8042_v35  ;;  %v514_v33 = vld [vmem:[#allocation2 + $0xbe8] sm:$0xff]  ;;  %v8135_v15 = vcombine.low %v489_v20, %v497_v21  ;;  %v8137_v35 = vcombine.low %v490_v22, %v498_v53  ;;  %v8232_v20 = vcombine.high %v585_v13, %v593_v14  ;;  %v601_v22 = vld [vmem:[#allocation2 + $0xea0] sm:$0xff] }
 0x22f   :  { %v8154_v37 = vcombine.high %v506_v32, %v514_v33  ;;  %v609_v53 = vld [vmem:[#allocation2 + $0xee0] sm:$0xff] }
 0x230   :  { %5287 = vmatmul.mubr.bf16.vlgmr.msra.gmra.mrb[8].mxu0 %v9564_v12  ;;  %5410 = vmatmul.mubr.bf16.vlgmr.msra.gmra.mrb[8].mxu1 %v9564_v12 }
 0x231   :  { %5296 = vmatpush1.bf16.msra.mxu0 %v8039_v41  ;;  %5419 = vmatpush1.bf16.msra.mxu1 %v8041_v42  ;;  %v522_v41 = vld [vmem:[#allocation2 + $0xc28] sm:$0xff] }
 0x232   :  { %5297 = vmatprep.subr.bf16.mxu0 %v8056_v43  ;;  %5420 = vmatprep.subr.bf16.mxu1 %v8058_v44  ;;  %v530_v42 = vld [vmem:[#allocation2 + $0xc68] sm:$0xff]  ;;  %v8151_v43 = vcombine.low %v505_v30, %v513_v31  ;;  %v8153_v44 = vcombine.low %v506_v32, %v514_v33  ;;  %v8248_v30 = vcombine.high %v601_v22, %v609_v53  ;;  %v617_v32 = vld [vmem:[#allocation2 + $0xf20] sm:$0xff] }
 0x233   :  { %5327 = vmatprep.mubr.bf16.mxu0 %v9573_v23  ;;  %5450 = vmatprep.mubr.bf16.mxu1 %v9573_v23  ;;  %v8170_v46 = vcombine.high %v522_v41, %v530_v42  ;;  %v625_v33 = vld [vmem:[#allocation2 + $0xf60] sm:$0xff] }
 0x235   :  { %5298 = vmatpush1.bf16.msra.mxu0 %v8055_v48  ;;  %5421 = vmatpush1.bf16.msra.mxu1 %v8057_v49  ;;  %v538_v48 = vld [vmem:[#allocation2 + $0xca8] sm:$0xff] }
 0x236   :  { %5299 = vmatprep.subr.bf16.mxu0 %v8072_v50  ;;  %5422 = vmatprep.subr.bf16.mxu1 %v8074_v51  ;;  %v546_v49 = vld [vmem:[#allocation2 + $0xce8] sm:$0xff]  ;;  %v8167_v50 = vcombine.low %v521_v39, %v529_v40  ;;  %v8169_v51 = vcombine.low %v522_v41, %v530_v42  ;;  %v8264_v39 = vcombine.high %v617_v32, %v625_v33  ;;  %v633_v41 = vld [vmem:[#allocation2 + $0xfa0] sm:$0xff] }
 0x237   :  { %v8186_v54 = vcombine.high %v538_v48, %v546_v49  ;;  %v641_v42 = vld [vmem:[#allocation2 + $0xfe0] sm:$0xff] }
 0x239   :  { %5300 = vmatpush1.bf16.msra.mxu0 %v8071_v58  ;;  %5423 = vmatpush1.bf16.msra.mxu1 %v8073_v59  ;;  %v554_v58 = vld [vmem:[#allocation2 + $0xd28] sm:$0xff] }
 0x23a   :  { %5301 = vmatprep.subr.bf16.mxu0 %v8088_v60  ;;  %5424 = vmatprep.subr.bf16.mxu1 %v8090_v62  ;;  %v562_v59 = vld [vmem:[#allocation2 + $0xd68] sm:$0xff]  ;;  %v8183_v60 = vcombine.low %v537_v47, %v545_v24  ;;  %v8185_v62 = vcombine.low %v538_v48, %v546_v49  ;;  %v8280_v47 = vcombine.high %v633_v41, %v641_v42  ;;  %v649_v48 = vld [vmem:[#allocation2 + $0x1020] sm:$0xff] }
 0x23b   :  { %v8202_v0 = vcombine.high %v554_v58, %v562_v59  ;;  %v657_v49 = vld [vmem:[#allocation2 + $0x1060] sm:$0xff] }
 0x23d   :  { %5302 = vmatpush1.bf16.msra.mxu0 %v8087_v6  ;;  %5425 = vmatpush1.bf16.msra.mxu1 %v8089_v7  ;;  %v570_v6 = vld [vmem:[#allocation2 + $0xda8] sm:$0xff] }
 0x23e   :  { %5303 = vmatprep.subr.bf16.mxu0 %v8104_v8  ;;  %5426 = vmatprep.subr.bf16.mxu1 %v8106_v9  ;;  %v578_v7 = vld [vmem:[#allocation2 + $0xde8] sm:$0xff]  ;;  %v8199_v8 = vcombine.low %v553_v55, %v561_v56  ;;  %v8201_v9 = vcombine.low %v554_v58, %v562_v59  ;;  %v8296_v55 = vcombine.high %v649_v48, %v657_v49  ;;  %v665_v58 = vld [vmem:[#allocation2 + $0x10a0] sm:$0xff] }
 0x23f   :  { %v8218_v11 = vcombine.high %v570_v6, %v578_v7  ;;  %v673_v59 = vld [vmem:[#allocation2 + $0x10e0] sm:$0xff] }
 0x241   :  { %5304 = vmatpush1.bf16.msra.mxu0 %v8103_v16  ;;  %5427 = vmatpush1.bf16.msra.mxu1 %v8105_v17  ;;  %v586_v16 = vld [vmem:[#allocation2 + $0xe28] sm:$0xff] }
 0x242   :  { %5305 = vmatprep.subr.bf16.mxu0 %v8120_v18  ;;  %5428 = vmatprep.subr.bf16.mxu1 %v8122_v19  ;;  %v594_v17 = vld [vmem:[#allocation2 + $0xe68] sm:$0xff]  ;;  %v8215_v18 = vcombine.low %v569_v3, %v577_v4  ;;  %v8217_v19 = vcombine.low %v570_v6, %v578_v7  ;;  %v8312_v3 = vcombine.high %v665_v58, %v673_v59  ;;  %v681_v6 = vld [vmem:[#allocation2 + $0x1120] sm:$0xff] }
 0x243   :  { %v8234_v21 = vcombine.high %v586_v16, %v594_v17  ;;  %v689_v7 = vld [vmem:[#allocation2 + $0x1160] sm:$0xff] }
 0x245   :  { %5306 = vmatpush1.bf16.msra.mxu0 %v8119_v26  ;;  %5429 = vmatpush1.bf16.msra.mxu1 %v8121_v27  ;;  %v602_v26 = vld [vmem:[#allocation2 + $0xea8] sm:$0xff] }
 0x246   :  { %5307 = vmatprep.subr.bf16.mxu0 %v8136_v28  ;;  %5430 = vmatprep.subr.bf16.mxu1 %v8138_v29  ;;  %v610_v27 = vld [vmem:[#allocation2 + $0xee8] sm:$0xff]  ;;  %v8231_v28 = vcombine.low %v585_v13, %v593_v14  ;;  %v8233_v29 = vcombine.low %v586_v16, %v594_v17  ;;  %v8328_v13 = vcombine.high %v681_v6, %v689_v7  ;;  %v697_v16 = vld [vmem:[#allocation2 + $0x11a0] sm:$0xff] }
 0x247   :  { %v8250_v31 = vcombine.high %v602_v26, %v610_v27  ;;  %v705_v17 = vld [vmem:[#allocation2 + $0x11e0] sm:$0xff] }
 0x249   :  { %5308 = vmatpush1.bf16.msra.mxu0 %v8135_v15  ;;  %5431 = vmatpush1.bf16.msra.mxu1 %v8137_v35  ;;  %v618_v15 = vld [vmem:[#allocation2 + $0xf28] sm:$0xff] }
 0x24a   :  { %5309 = vmatprep.subr.bf16.mxu0 %v8152_v36  ;;  %5432 = vmatprep.subr.bf16.mxu1 %v8154_v37  ;;  %v626_v35 = vld [vmem:[#allocation2 + $0xf68] sm:$0xff]  ;;  %v8247_v36 = vcombine.low %v601_v22, %v609_v53  ;;  %v8249_v37 = vcombine.low %v602_v26, %v610_v27  ;;  %v8344_v22 = vcombine.high %v697_v16, %v705_v17  ;;  %v713_v26 = vld [vmem:[#allocation2 + $0x1220] sm:$0xff] }
 0x24b   :  { %v8266_v40 = vcombine.high %v618_v15, %v626_v35  ;;  %v721_v27 = vld [vmem:[#allocation2 + $0x1260] sm:$0xff] }
 0x24d   :  { %5310 = vmatpush1.bf16.msra.mxu0 %v8151_v43  ;;  %5433 = vmatpush1.bf16.msra.mxu1 %v8153_v44  ;;  %v634_v43 = vld [vmem:[#allocation2 + $0xfa8] sm:$0xff] }
 0x24e   :  { %5311 = vmatprep.subr.bf16.mxu0 %v8168_v45  ;;  %5434 = vmatprep.subr.bf16.mxu1 %v8170_v46  ;;  %v642_v44 = vld [vmem:[#allocation2 + $0xfe8] sm:$0xff]  ;;  %v8263_v45 = vcombine.low %v617_v32, %v625_v33  ;;  %v8265_v46 = vcombine.low %v618_v15, %v626_v35  ;;  %v8360_v32 = vcombine.high %v713_v26, %v721_v27  ;;  %v729_v15 = vld [vmem:[#allocation2 + $0x12a0] sm:$0xff] }
 0x24f   :  { %v8282_v24 = vcombine.high %v634_v43, %v642_v44  ;;  %v737_v35 = vld [vmem:[#allocation2 + $0x12e0] sm:$0xff] }
 0x251   :  { %5312 = vmatpush1.bf16.msra.mxu0 %v8167_v50  ;;  %5435 = vmatpush1.bf16.msra.mxu1 %v8169_v51  ;;  %v650_v50 = vld [vmem:[#allocation2 + $0x1028] sm:$0xff] }
 0x252   :  { %5313 = vmatprep.subr.bf16.mxu0 %v8184_v52  ;;  %5436 = vmatprep.subr.bf16.mxu1 %v8186_v54  ;;  %v658_v51 = vld [vmem:[#allocation2 + $0x1068] sm:$0xff]  ;;  %v8279_v52 = vcombine.low %v633_v41, %v641_v42  ;;  %v8281_v54 = vcombine.low %v634_v43, %v642_v44  ;;  %v8376_v41 = vcombine.high %v729_v15, %v737_v35  ;;  %v745_v43 = vld [vmem:[#allocation2 + $0x1320] sm:$0xff] }
 0x253   :  { %v8298_v56 = vcombine.high %v650_v50, %v658_v51  ;;  %v753_v44 = vld [vmem:[#allocation2 + $0x1360] sm:$0xff] }
 0x255   :  { %5314 = vmatpush1.bf16.msra.mxu0 %v8183_v60  ;;  %5437 = vmatpush1.bf16.msra.mxu1 %v8185_v62  ;;  %v666_v60 = vld [vmem:[#allocation2 + $0x10a8] sm:$0xff] }
 0x256   :  { %5315 = vmatprep.subr.bf16.mxu0 %v8200_v63  ;;  %5438 = vmatprep.subr.bf16.mxu1 %v8202_v0  ;;  %v674_v62 = vld [vmem:[#allocation2 + $0x10e8] sm:$0xff]  ;;  %v8295_v63 = vcombine.low %v649_v48, %v657_v49  ;;  %v8297_v0 = vcombine.low %v650_v50, %v658_v51  ;;  %v8392_v48 = vcombine.high %v745_v43, %v753_v44  ;;  %v761_v50 = vld [vmem:[#allocation2 + $0x13a0] sm:$0xff] }
 0x257   :  { %v8314_v4 = vcombine.high %v666_v60, %v674_v62  ;;  %v769_v51 = vld [vmem:[#allocation2 + $0x13e0] sm:$0xff] }
 0x259   :  { %5316 = vmatpush1.bf16.msra.mxu0 %v8199_v8  ;;  %5439 = vmatpush1.bf16.msra.mxu1 %v8201_v9  ;;  %v682_v8 = vld [vmem:[#allocation2 + $0x1128] sm:$0xff] }
 0x25a   :  { %5317 = vmatprep.subr.bf16.mxu0 %v8216_v10  ;;  %5440 = vmatprep.subr.bf16.mxu1 %v8218_v11  ;;  %v690_v9 = vld [vmem:[#allocation2 + $0x1168] sm:$0xff]  ;;  %v8311_v10 = vcombine.low %v665_v58, %v673_v59  ;;  %v8313_v11 = vcombine.low %v666_v60, %v674_v62  ;;  %v8408_v58 = vcombine.high %v761_v50, %v769_v51  ;;  %v777_v60 = vld [vmem:[#allocation2 + $0x1420] sm:$0xff] }
 0x25b   :  { %v8330_v14 = vcombine.high %v682_v8, %v690_v9  ;;  %v785_v62 = vld [vmem:[#allocation2 + $0x1460] sm:$0xff] }
 0x25d   :  { %5318 = vmatpush1.bf16.msra.mxu0 %v8215_v18  ;;  %5441 = vmatpush1.bf16.msra.mxu1 %v8217_v19  ;;  %v698_v18 = vld [vmem:[#allocation2 + $0x11a8] sm:$0xff] }
 0x25e   :  { %5319 = vmatprep.subr.bf16.mxu0 %v8232_v20  ;;  %5442 = vmatprep.subr.bf16.mxu1 %v8234_v21  ;;  %v706_v19 = vld [vmem:[#allocation2 + $0x11e8] sm:$0xff]  ;;  %v8327_v20 = vcombine.low %v681_v6, %v689_v7  ;;  %v8329_v21 = vcombine.low %v682_v8, %v690_v9  ;;  %v8424_v6 = vcombine.high %v777_v60, %v785_v62  ;;  %v793_v8 = vld [vmem:[#allocation2 + $0x14a0] sm:$0xff] }
 0x25f   :  { %v8346_v53 = vcombine.high %v698_v18, %v706_v19  ;;  %v801_v9 = vld [vmem:[#allocation2 + $0x14e0] sm:$0xff] }
 0x261   :  { %5320 = vmatpush1.bf16.msra.mxu0 %v8231_v28  ;;  %5443 = vmatpush1.bf16.msra.mxu1 %v8233_v29  ;;  %v714_v28 = vld [vmem:[#allocation2 + $0x1228] sm:$0xff] }
 0x262   :  { %5321 = vmatprep.subr.bf16.mxu0 %v8248_v30  ;;  %5444 = vmatprep.subr.bf16.mxu1 %v8250_v31  ;;  %v722_v29 = vld [vmem:[#allocation2 + $0x1268] sm:$0xff]  ;;  %v8343_v30 = vcombine.low %v697_v16, %v705_v17  ;;  %v8345_v31 = vcombine.low %v698_v18, %v706_v19  ;;  %v8440_v16 = vcombine.high %v793_v8, %v801_v9  ;;  %v809_v18 = vld [vmem:[#allocation2 + $0x1520] sm:$0xff] }
 0x263   :  { %v8362_v33 = vcombine.high %v714_v28, %v722_v29  ;;  %v817_v19 = vld [vmem:[#allocation2 + $0x1560] sm:$0xff] }
 0x265   :  { %5322 = vmatpush1.bf16.msra.mxu0 %v8247_v36  ;;  %5445 = vmatpush1.bf16.msra.mxu1 %v8249_v37  ;;  %v730_v36 = vld [vmem:[#allocation2 + $0x12a8] sm:$0xff] }
 0x266   :  { %5323 = vmatprep.subr.bf16.mxu0 %v8264_v39  ;;  %5446 = vmatprep.subr.bf16.mxu1 %v8266_v40  ;;  %v738_v37 = vld [vmem:[#allocation2 + $0x12e8] sm:$0xff]  ;;  %v8359_v39 = vcombine.low %v713_v26, %v721_v27  ;;  %v8361_v40 = vcombine.low %v714_v28, %v722_v29  ;;  %v8456_v26 = vcombine.high %v809_v18, %v817_v19  ;;  %v825_v28 = vld [vmem:[#allocation2 + $0x15a0] sm:$0xff] }
 0x267   :  { %v8378_v42 = vcombine.high %v730_v36, %v738_v37  ;;  %v833_v29 = vld [vmem:[#allocation2 + $0x15e0] sm:$0xff] }
 0x269   :  { %5324 = vmatpush1.bf16.msra.mxu0 %v8263_v45  ;;  %5447 = vmatpush1.bf16.msra.mxu1 %v8265_v46  ;;  %v746_v45 = vld [vmem:[#allocation2 + $0x1328] sm:$0xff] }
 0x26a   :  { %5325 = vmatprep.subr.bf16.mxu0 %v8280_v47  ;;  %5448 = vmatprep.subr.bf16.mxu1 %v8282_v24  ;;  %v754_v46 = vld [vmem:[#allocation2 + $0x1368] sm:$0xff]  ;;  %v8375_v47 = vcombine.low %v729_v15, %v737_v35  ;;  %v8377_v24 = vcombine.low %v730_v36, %v738_v37  ;;  %v8472_v15 = vcombine.high %v825_v28, %v833_v29  ;;  %v841_v36 = vld [vmem:[#allocation2 + $0x1620] sm:$0xff] }
 0x26b   :  { %v8394_v49 = vcombine.high %v746_v45, %v754_v46  ;;  %v849_v37 = vld [vmem:[#allocation2 + $0x1660] sm:$0xff] }
 0x26d   :  { %5326 = vmatpush1.bf16.msra.mxu0 %v8279_v52  ;;  %5449 = vmatpush1.bf16.msra.mxu1 %v8281_v54  ;;  %v762_v52 = vld [vmem:[#allocation2 + $0x13a8] sm:$0xff] }
 0x26e   :  { %5336 = vmatprep.subr.bf16.mxu0 %v8296_v55  ;;  %5459 = vmatprep.subr.bf16.mxu1 %v8298_v56  ;;  %v770_v54 = vld [vmem:[#allocation2 + $0x13e8] sm:$0xff]  ;;  %v8391_v55 = vcombine.low %v745_v43, %v753_v44  ;;  %v8393_v56 = vcombine.low %v746_v45, %v754_v46  ;;  %v8488_v43 = vcombine.high %v841_v36, %v849_v37  ;;  %v857_v45 = vld [vmem:[#allocation2 + $0x16a0] sm:$0xff] }
 0x26f   :  { %v8410_v59 = vcombine.high %v762_v52, %v770_v54  ;;  %v865_v46 = vld [vmem:[#allocation2 + $0x16e0] sm:$0xff] }
 0x270   :  { %5328 = vmatmul.mubr.bf16.vlgmr.msra.gmra.mrb[8].mxu0 %v9586_v25  ;;  %5451 = vmatmul.mubr.bf16.vlgmr.msra.gmra.mrb[8].mxu1 %v9586_v25 }
 0x271   :  { %5337 = vmatpush1.bf16.msra.mxu0 %v8295_v63  ;;  %5460 = vmatpush1.bf16.msra.mxu1 %v8297_v0  ;;  %v778_v63 = vld [vmem:[#allocation2 + $0x1428] sm:$0xff] }
 0x272   :  { %5338 = vmatprep.subr.bf16.mxu0 %v8312_v3  ;;  %5461 = vmatprep.subr.bf16.mxu1 %v8314_v4  ;;  %v786_v0 = vld [vmem:[#allocation2 + $0x1468] sm:$0xff]  ;;  %v8407_v3 = vcombine.low %v761_v50, %v769_v51  ;;  %v8409_v4 = vcombine.low %v762_v52, %v770_v54  ;;  %v8504_v50 = vcombine.high %v857_v45, %v865_v46  ;;  %v873_v52 = vld [vmem:[#allocation2 + $0x1720] sm:$0xff] }
 0x273   :  { %5368 = vmatprep.mubr.bf16.mxu0 %v9590_v34  ;;  %5491 = vmatprep.mubr.bf16.mxu1 %v9590_v34  ;;  %v8426_v7 = vcombine.high %v778_v63, %v786_v0  ;;  %v881_v54 = vld [vmem:[#allocation2 + $0x1760] sm:$0xff] }
 0x275   :  { %5339 = vmatpush1.bf16.msra.mxu0 %v8311_v10  ;;  %5462 = vmatpush1.bf16.msra.mxu1 %v8313_v11  ;;  %v794_v10 = vld [vmem:[#allocation2 + $0x14a8] sm:$0xff] }
 0x276   :  { %5340 = vmatprep.subr.bf16.mxu0 %v8328_v13  ;;  %5463 = vmatprep.subr.bf16.mxu1 %v8330_v14  ;;  %v802_v11 = vld [vmem:[#allocation2 + $0x14e8] sm:$0xff]  ;;  %v8423_v13 = vcombine.low %v777_v60, %v785_v62  ;;  %v8425_v14 = vcombine.low %v778_v63, %v786_v0  ;;  %v8520_v60 = vcombine.high %v873_v52, %v881_v54  ;;  %v889_v63 = vld [vmem:[#allocation2 + $0x17a0] sm:$0xff] }
 0x277   :  { %v8442_v17 = vcombine.high %v794_v10, %v802_v11  ;;  %v897_v0 = vld [vmem:[#allocation2 + $0x17e0] sm:$0xff] }
 0x279   :  { %5341 = vmatpush1.bf16.msra.mxu0 %v8327_v20  ;;  %5464 = vmatpush1.bf16.msra.mxu1 %v8329_v21  ;;  %v810_v20 = vld [vmem:[#allocation2 + $0x1528] sm:$0xff] }
 0x27a   :  { %5342 = vmatprep.subr.bf16.mxu0 %v8344_v22  ;;  %5465 = vmatprep.subr.bf16.mxu1 %v8346_v53  ;;  %v818_v21 = vld [vmem:[#allocation2 + $0x1568] sm:$0xff]  ;;  %v8439_v22 = vcombine.low %v793_v8, %v801_v9  ;;  %v8441_v53 = vcombine.low %v794_v10, %v802_v11  ;;  %v8536_v8 = vcombine.high %v889_v63, %v897_v0  ;;  %v139_v10 = vld [vmem:[#allocation2 + $0x30] sm:$0xff] }
 0x27b   :  { %v8458_v27 = vcombine.high %v810_v20, %v818_v21  ;;  %v147_v11 = vld [vmem:[#allocation2 + $0x70] sm:$0xff] }
 0x27d   :  { %5343 = vmatpush1.bf16.msra.mxu0 %v8343_v30  ;;  %5466 = vmatpush1.bf16.msra.mxu1 %v8345_v31  ;;  %v826_v30 = vld [vmem:[#allocation2 + $0x15a8] sm:$0xff] }
 0x27e   :  { %5344 = vmatprep.subr.bf16.mxu0 %v8360_v32  ;;  %5467 = vmatprep.subr.bf16.mxu1 %v8362_v33  ;;  %v834_v31 = vld [vmem:[#allocation2 + $0x15e8] sm:$0xff]  ;;  %v8455_v32 = vcombine.low %v809_v18, %v817_v19  ;;  %v8457_v33 = vcombine.low %v810_v20, %v818_v21  ;;  %v7788_v18 = vcombine.high %v139_v10, %v147_v11  ;;  %v155_v20 = vld [vmem:[#allocation2 + $0xb0] sm:$0xff] }
 0x27f   :  { %v8474_v35 = vcombine.high %v826_v30, %v834_v31  ;;  %v163_v21 = vld [vmem:[#allocation2 + $0xf0] sm:$0xff] }
 0x281   :  { %5345 = vmatpush1.bf16.msra.mxu0 %v8359_v39  ;;  %5468 = vmatpush1.bf16.msra.mxu1 %v8361_v40  ;;  %v842_v39 = vld [vmem:[#allocation2 + $0x1628] sm:$0xff] }
 0x282   :  { %5346 = vmatprep.subr.bf16.mxu0 %v8376_v41  ;;  %5469 = vmatprep.subr.bf16.mxu1 %v8378_v42  ;;  %v850_v40 = vld [vmem:[#allocation2 + $0x1668] sm:$0xff]  ;;  %v8471_v41 = vcombine.low %v825_v28, %v833_v29  ;;  %v8473_v42 = vcombine.low %v826_v30, %v834_v31  ;;  %v7804_v28 = vcombine.high %v155_v20, %v163_v21  ;;  %v171_v30 = vld [vmem:[#allocation2 + $0x130] sm:$0xff] }
 0x283   :  { %v8490_v44 = vcombine.high %v842_v39, %v850_v40  ;;  %v179_v31 = vld [vmem:[#allocation2 + $0x170] sm:$0xff] }
 0x285   :  { %5347 = vmatpush1.bf16.msra.mxu0 %v8375_v47  ;;  %5470 = vmatpush1.bf16.msra.mxu1 %v8377_v24  ;;  %v858_v47 = vld [vmem:[#allocation2 + $0x16a8] sm:$0xff] }
 0x286   :  { %5348 = vmatprep.subr.bf16.mxu0 %v8392_v48  ;;  %5471 = vmatprep.subr.bf16.mxu1 %v8394_v49  ;;  %v866_v24 = vld [vmem:[#allocation2 + $0x16e8] sm:$0xff]  ;;  %v8487_v48 = vcombine.low %v841_v36, %v849_v37  ;;  %v8489_v49 = vcombine.low %v842_v39, %v850_v40  ;;  %v7820_v36 = vcombine.high %v171_v30, %v179_v31  ;;  %v187_v39 = vld [vmem:[#allocation2 + $0x1b0] sm:$0xff] }
 0x287   :  { %v8506_v51 = vcombine.high %v858_v47, %v866_v24  ;;  %v195_v40 = vld [vmem:[#allocation2 + $0x1f0] sm:$0xff] }
 0x289   :  { %5349 = vmatpush1.bf16.msra.mxu0 %v8391_v55  ;;  %5472 = vmatpush1.bf16.msra.mxu1 %v8393_v56  ;;  %v874_v55 = vld [vmem:[#allocation2 + $0x1728] sm:$0xff] }
 0x28a   :  { %5350 = vmatprep.subr.bf16.mxu0 %v8408_v58  ;;  %5473 = vmatprep.subr.bf16.mxu1 %v8410_v59  ;;  %v882_v56 = vld [vmem:[#allocation2 + $0x1768] sm:$0xff]  ;;  %v8503_v58 = vcombine.low %v857_v45, %v865_v46  ;;  %v8505_v59 = vcombine.low %v858_v47, %v866_v24  ;;  %v7836_v45 = vcombine.high %v187_v39, %v195_v40  ;;  %v203_v47 = vld [vmem:[#allocation2 + $0x230] sm:$0xff] }
 0x28b   :  { %v8522_v62 = vcombine.high %v874_v55, %v882_v56  ;;  %v211_v24 = vld [vmem:[#allocation2 + $0x270] sm:$0xff] }
 0x28d   :  { %5351 = vmatpush1.bf16.msra.mxu0 %v8407_v3  ;;  %5474 = vmatpush1.bf16.msra.mxu1 %v8409_v4  ;;  %v890_v3 = vld [vmem:[#allocation2 + $0x17a8] sm:$0xff] }
 0x28e   :  { %5352 = vmatprep.subr.bf16.mxu0 %v8424_v6  ;;  %5475 = vmatprep.subr.bf16.mxu1 %v8426_v7  ;;  %v898_v4 = vld [vmem:[#allocation2 + $0x17e8] sm:$0xff]  ;;  %v8519_v6 = vcombine.low %v873_v52, %v881_v54  ;;  %v8521_v7 = vcombine.low %v874_v55, %v882_v56  ;;  %v7852_v52 = vcombine.high %v203_v47, %v211_v24  ;;  %v219_v54 = vld [vmem:[#allocation2 + $0x2b0] sm:$0xff]  ;;  %v220_v56 = vld [vmem:[#allocation2 + $0x2b8] sm:$0xff] }
 0x28f   :  { %v8538_v9 = vcombine.high %v890_v3, %v898_v4  ;;  %v227_v55 = vld [vmem:[#allocation2 + $0x2f0] sm:$0xff] }
 0x291   :  { %5353 = vmatpush1.bf16.msra.mxu0 %v8423_v13  ;;  %5476 = vmatpush1.bf16.msra.mxu1 %v8425_v14  ;;  %v140_v13 = vld [vmem:[#allocation2 + $0x38] sm:$0xff] }
 0x292   :  { %5354 = vmatprep.subr.bf16.mxu0 %v8440_v16  ;;  %5477 = vmatprep.subr.bf16.mxu1 %v8442_v17  ;;  %v148_v14 = vld [vmem:[#allocation2 + $0x78] sm:$0xff]  ;;  %v8535_v16 = vcombine.low %v889_v63, %v897_v0  ;;  %v8537_v17 = vcombine.low %v890_v3, %v898_v4  ;;  %v235_v0 = vld [vmem:[#allocation2 + $0x330] sm:$0xff] }
 0x293   :  { %v7790_v19 = vcombine.high %v140_v13, %v148_v14  ;;  %v243_v3 = vld [vmem:[#allocation2 + $0x370] sm:$0xff]  ;;  %v236_v4 = vld [vmem:[#allocation2 + $0x338] sm:$0xff] }
 0x295   :  { %5355 = vmatpush1.bf16.msra.mxu0 %v8439_v22  ;;  %5478 = vmatpush1.bf16.msra.mxu1 %v8441_v53  ;;  %v156_v22 = vld [vmem:[#allocation2 + $0xb8] sm:$0xff] }
 0x296   :  { %5356 = vmatprep.subr.bf16.mxu0 %v8456_v26  ;;  %5479 = vmatprep.subr.bf16.mxu1 %v8458_v27  ;;  %v164_v53 = vld [vmem:[#allocation2 + $0xf8] sm:$0xff]  ;;  %v7787_v26 = vcombine.low %v139_v10, %v147_v11  ;;  %v7789_v27 = vcombine.low %v140_v13, %v148_v14  ;;  %v251_v13 = vld [vmem:[#allocation2 + $0x3b0] sm:$0xff] }
 0x297   :  { %v7806_v29 = vcombine.high %v156_v22, %v164_v53  ;;  %v259_v14 = vld [vmem:[#allocation2 + $0x3f0] sm:$0xff] }
 0x299   :  { %5357 = vmatpush1.bf16.msra.mxu0 %v8455_v32  ;;  %5480 = vmatpush1.bf16.msra.mxu1 %v8457_v33  ;;  %v172_v32 = vld [vmem:[#allocation2 + $0x138] sm:$0xff] }
 0x29a   :  { %5358 = vmatprep.subr.bf16.mxu0 %v8472_v15  ;;  %5481 = vmatprep.subr.bf16.mxu1 %v8474_v35  ;;  %v180_v33 = vld [vmem:[#allocation2 + $0x178] sm:$0xff]  ;;  %v7803_v15 = vcombine.low %v155_v20, %v163_v21  ;;  %v7805_v35 = vcombine.low %v156_v22, %v164_v53  ;;  %v7883_v22 = vcombine.low %v235_v0, %v243_v3 }
 0x29b   :  { %v7822_v37 = vcombine.high %v172_v32, %v180_v33 }
 0x29d   :  { %5359 = vmatpush1.bf16.msra.mxu0 %v8471_v41  ;;  %5482 = vmatpush1.bf16.msra.mxu1 %v8473_v42  ;;  %v188_v41 = vld [vmem:[#allocation2 + $0x1b8] sm:$0xff] }
 0x29e   :  { %5360 = vmatprep.subr.bf16.mxu0 %v8488_v43  ;;  %5483 = vmatprep.subr.bf16.mxu1 %v8490_v44  ;;  %v196_v42 = vld [vmem:[#allocation2 + $0x1f8] sm:$0xff]  ;;  %v7819_v43 = vcombine.low %v171_v30, %v179_v31  ;;  %v7821_v44 = vcombine.low %v172_v32, %v180_v33  ;;  %v267_v31 = vld [vmem:[#allocation2 + $0x430] sm:$0xff] }
 0x29f   :  { %v7838_v46 = vcombine.high %v188_v41, %v196_v42  ;;  %v275_v32 = vld [vmem:[#allocation2 + $0x470] sm:$0xff]  ;;  %v268_v33 = vld [vmem:[#allocation2 + $0x438] sm:$0xff] }
 0x2a1   :  { %5361 = vmatpush1.bf16.msra.mxu0 %v8487_v48  ;;  %5484 = vmatpush1.bf16.msra.mxu1 %v8489_v49  ;;  %v204_v48 = vld [vmem:[#allocation2 + $0x238] sm:$0xff] }
 0x2a2   :  { %5362 = vmatprep.subr.bf16.mxu0 %v8504_v50  ;;  %5485 = vmatprep.subr.bf16.mxu1 %v8506_v51  ;;  %v212_v49 = vld [vmem:[#allocation2 + $0x278] sm:$0xff]  ;;  %v7835_v50 = vcombine.low %v187_v39, %v195_v40  ;;  %v7837_v51 = vcombine.low %v188_v41, %v196_v42  ;;  %v283_v40 = vld [vmem:[#allocation2 + $0x4b0] sm:$0xff] }
 0x2a3   :  { %v291_v41 = vld [vmem:[#allocation2 + $0x4f0] sm:$0xff]  ;;  %v284_v42 = vld [vmem:[#allocation2 + $0x4b8] sm:$0xff] }
 0x2a5   :  { %5363 = vmatpush1.bf16.msra.mxu0 %v8503_v58  ;;  %5486 = vmatpush1.bf16.msra.mxu1 %v8505_v59  ;;  %v228_v58 = vld [vmem:[#allocation2 + $0x2f8] sm:$0xff]  ;;  %v7851_v59 = vcombine.low %v203_v47, %v211_v24  ;;  %v299_v24 = vld [vmem:[#allocation2 + $0x530] sm:$0xff] }
 0x2a6   :  { %5364 = vmatprep.subr.bf16.mxu0 %v8520_v60  ;;  %5487 = vmatprep.subr.bf16.mxu1 %v8522_v62  ;;  %v7853_v60 = vcombine.low %v204_v48, %v212_v49  ;;  %v7868_v62 = vcombine.high %v219_v54, %v227_v55  ;;  %v7870_v63 = vcombine.high %v220_v56, %v228_v58 }
 0x2a9   :  { %5365 = vmatpush1.bf16.msra.mxu0 %v8519_v6  ;;  %5488 = vmatpush1.bf16.msra.mxu1 %v8521_v7  ;;  %v244_v6 = vld [vmem:[#allocation2 + $0x378] sm:$0xff]  ;;  %v7867_v7 = vcombine.low %v219_v54, %v227_v55  ;;  %v315_v55 = vld [vmem:[#allocation2 + $0x5b0] sm:$0xff] }
 0x2aa   :  { %5366 = vmatprep.subr.bf16.mxu0 %v8536_v8  ;;  %5489 = vmatprep.subr.bf16.mxu1 %v8538_v9  ;;  %v7869_v8 = vcombine.low %v220_v56, %v228_v58  ;;  %v7884_v9 = vcombine.high %v235_v0, %v243_v3  ;;  %v7886_v11 = vcombine.high %v236_v4, %v244_v6  ;;  %v323_v56 = vld [vmem:[#allocation2 + $0x5f0] sm:$0xff]  ;;  %v316_v58 = vld [vmem:[#allocation2 + $0x5b8] sm:$0xff] }
 0x2ab   :  { %v331_v3 = vld [vmem:[#allocation2 + $0x630] sm:$0xff] }
 0x2ad   :  { %5367 = vmatpush1.bf16.msra.mxu0 %v8535_v16  ;;  %5490 = vmatpush1.bf16.msra.mxu1 %v8537_v17 }
 0x2ae   :  { %5500 = vmatprep.subr.bf16.mxu0 %v7788_v18  ;;  %5623 = vmatprep.subr.bf16.mxu1 %v7790_v19  ;;  %v252_v18 = vld [vmem:[#allocation2 + $0x3b8] sm:$0xff] }
 0x2af   :  { %v260_v19 = vld [vmem:[#allocation2 + $0x3f8] sm:$0xff] }
 0x2b0   :  { %5369 = vmatmul.mubr.bf16.vlgmr.msra.gmra.mrb[8].mxu0 %v9598_v38  ;;  %5492 = vmatmul.mubr.bf16.vlgmr.msra.gmra.mrb[8].mxu1 %v9598_v38  ;;  %v7902_v30 = vcombine.high %v252_v18, %v260_v19 }
 0x2b1   :  { %5501 = vmatpush1.bf16.msra.mxu0 %v7787_v26  ;;  %5624 = vmatpush1.bf16.msra.mxu1 %v7789_v27  ;;  %v7885_v27 = vcombine.low %v236_v4, %v244_v6  ;;  %v339_v4 = vld [vmem:[#allocation2 + $0x670] sm:$0xff]  ;;  %v332_v6 = vld [vmem:[#allocation2 + $0x638] sm:$0xff] }
 0x2b2   :  { %5502 = vmatprep.subr.bf16.mxu0 %v7804_v28  ;;  %5625 = vmatprep.subr.bf16.mxu1 %v7806_v29  ;;  %v7900_v28 = vcombine.high %v251_v13, %v259_v14 }
 0x2b3   :  { %5532 = vmatprep.mubr.bf16.mxu0 %v9558_v57  ;;  %5655 = vmatprep.mubr.bf16.mxu1 %v9558_v57  ;;  %v7854_v57 = vcombine.high %v204_v48, %v212_v49  ;;  %v307_v48 = vld [vmem:[#allocation2 + $0x570] sm:$0xff]  ;;  %v300_v49 = vld [vmem:[#allocation2 + $0x538] sm:$0xff] }
 0x2b5   :  { %5503 = vmatpush1.bf16.msra.mxu0 %v7803_v15  ;;  %5626 = vmatpush1.bf16.msra.mxu1 %v7805_v35  ;;  %v276_v15 = vld [vmem:[#allocation2 + $0x478] sm:$0xff]  ;;  %v7899_v35 = vcombine.low %v251_v13, %v259_v14  ;;  %v347_v14 = vld [vmem:[#allocation2 + $0x6b0] sm:$0xff] }
 0x2b6   :  { %5504 = vmatprep.subr.bf16.mxu0 %v7820_v36  ;;  %5627 = vmatprep.subr.bf16.mxu1 %v7822_v37  ;;  %v7901_v36 = vcombine.low %v252_v18, %v260_v19  ;;  %v7916_v37 = vcombine.high %v267_v31, %v275_v32  ;;  %v7918_v39 = vcombine.high %v268_v33, %v276_v15  ;;  %v355_v18 = vld [vmem:[#allocation2 + $0x6f0] sm:$0xff]  ;;  %v348_v19 = vld [vmem:[#allocation2 + $0x6b8] sm:$0xff] }
 0x2b9   :  { %5505 = vmatpush1.bf16.msra.mxu0 %v7819_v43  ;;  %5628 = vmatpush1.bf16.msra.mxu1 %v7821_v44  ;;  %v292_v43 = vld [vmem:[#allocation2 + $0x4f8] sm:$0xff]  ;;  %v7915_v44 = vcombine.low %v267_v31, %v275_v32  ;;  %v7995_v32 = vcombine.low %v347_v14, %v355_v18 }
 0x2ba   :  { %5506 = vmatprep.subr.bf16.mxu0 %v7836_v45  ;;  %5629 = vmatprep.subr.bf16.mxu1 %v7838_v46  ;;  %v7917_v45 = vcombine.low %v268_v33, %v276_v15  ;;  %v7932_v46 = vcombine.high %v283_v40, %v291_v41  ;;  %v7934_v47 = vcombine.high %v284_v42, %v292_v43  ;;  %v372_v31 = vld [vmem:[#allocation2 + $0x778] sm:$0xff] }
 0x2bd   :  { %5507 = vmatpush1.bf16.msra.mxu0 %v7835_v50  ;;  %5630 = vmatpush1.bf16.msra.mxu1 %v7837_v51  ;;  %v308_v50 = vld [vmem:[#allocation2 + $0x578] sm:$0xff]  ;;  %v7931_v51 = vcombine.low %v283_v40, %v291_v41 }
 0x2be   :  { %5508 = vmatprep.subr.bf16.mxu0 %v7852_v52  ;;  %5631 = vmatprep.subr.bf16.mxu1 %v7854_v57  ;;  %v7933_v52 = vcombine.low %v284_v42, %v292_v43  ;;  %v7948_v57 = vcombine.high %v299_v24, %v307_v48  ;;  %v7950_v54 = vcombine.high %v300_v49, %v308_v50  ;;  %v388_v40 = vld [vmem:[#allocation2 + $0x7f8] sm:$0xff] }
 0x2c1   :  { %5509 = vmatpush1.bf16.msra.mxu0 %v7851_v59  ;;  %5632 = vmatpush1.bf16.msra.mxu1 %v7853_v60  ;;  %v324_v59 = vld [vmem:[#allocation2 + $0x5f8] sm:$0xff]  ;;  %v7947_v60 = vcombine.low %v299_v24, %v307_v48 }
 0x2c2   :  { %5510 = vmatprep.subr.bf16.mxu0 %v7868_v62  ;;  %5633 = vmatprep.subr.bf16.mxu1 %v7870_v63  ;;  %v7949_v62 = vcombine.low %v300_v49, %v308_v50  ;;  %v7964_v63 = vcombine.high %v315_v55, %v323_v56  ;;  %v7966_v0 = vcombine.high %v316_v58, %v324_v59  ;;  %v404_v24 = vld [vmem:[#allocation2 + $0x878] sm:$0xff] }
 0x2c3   :  { %v9636_v10 = vpop.f32.mrb[4].mxu0  ;;  %v9638_v16 = vpop.f32.mrb[4].mxu1 }
 0x2c4   :  { %v9640_v17 = vpop.f32.mrb[5].mxu0  ;;  %v9642_v20 = vpop.f32.mrb[5].mxu1 }
 0x2c5   :  { %v5128_v21 = vpop.f32.mrb[6].mxu0  ;;  %5511 = vmatpush1.bf16.msra.mxu0 %v7867_v7  ;;  %v5251_v53 = vpop.f32.mrb[6].mxu1  ;;  %5634 = vmatpush1.bf16.msra.mxu1 %v7869_v8  ;;  %v340_v7 = vld [vmem:[#allocation2 + $0x678] sm:$0xff]  ;;  %v7963_v8 = vcombine.low %v315_v55, %v323_v56 }
 0x2c6   :  { %v5129_v26 = vpop.f32.mrb[7].mxu0  ;;  %5512 = vmatprep.subr.bf16.mxu0 %v7884_v9  ;;  %v5252_v29 = vpop.f32.mrb[7].mxu1  ;;  %5635 = vmatprep.subr.bf16.mxu1 %v7886_v11  ;;  %v7965_v9 = vcombine.low %v316_v58, %v324_v59  ;;  %v7980_v11 = vcombine.high %v331_v3, %v339_v4  ;;  %v7982_v13 = vcombine.high %v332_v6, %v340_v7  ;;  %v356_v21 = vld [vmem:[#allocation2 + $0x6f8] sm:$0xff] }
 0x2c7   :  { %v7981_v53 = vcombine.low %v332_v6, %v340_v7  ;;  %v7996_v26 = vcombine.high %v347_v14, %v355_v18  ;;  %v371_v29 = vld [vmem:[#allocation2 + $0x770] sm:$0xff]  ;;  %v7997_v33 = vcombine.low %v348_v19, %v356_v21  ;;  %v420_v55 = vld [vmem:[#allocation2 + $0x8f8] sm:$0xff] }
 0x2c8   :  { %v452_v14 = vld [vmem:[#allocation2 + $0x9f8] sm:$0xff] }
 0x2c9   :  { %5513 = vmatpush1.bf16.msra.mxu0 %v7883_v22  ;;  %5636 = vmatpush1.bf16.msra.mxu1 %v7885_v27  ;;  %v7979_v22 = vcombine.low %v331_v3, %v339_v4  ;;  %v7998_v27 = vcombine.high %v348_v19, %v356_v21  ;;  %v436_v3 = vld [vmem:[#allocation2 + $0x978] sm:$0xff] }
 0x2ca   :  { %5514 = vmatprep.subr.bf16.mxu0 %v7900_v28  ;;  %5637 = vmatprep.subr.bf16.mxu1 %v7902_v30  ;;  %v363_v28 = vld [vmem:[#allocation2 + $0x730] sm:$0xff]  ;;  %v364_v30 = vld [vmem:[#allocation2 + $0x738] sm:$0xff] }
 0x2cb   :  { %v8012_v15 = vcombine.high %v363_v28, %v371_v29  ;;  %v8011_v41 = vcombine.low %v363_v28, %v371_v29  ;;  %v8013_v42 = vcombine.low %v364_v30, %v372_v31 }
 0x2cd   :  { %5515 = vmatpush1.bf16.msra.mxu0 %v7899_v35  ;;  %5638 = vmatpush1.bf16.msra.mxu1 %v7901_v36  ;;  %v8014_v35 = vcombine.high %v364_v30, %v372_v31  ;;  %v379_v36 = vld [vmem:[#allocation2 + $0x7b0] sm:$0xff] }
 0x2ce   :  { %5516 = vmatprep.subr.bf16.mxu0 %v7916_v37  ;;  %5639 = vmatprep.subr.bf16.mxu1 %v7918_v39  ;;  %v387_v37 = vld [vmem:[#allocation2 + $0x7f0] sm:$0xff]  ;;  %v380_v39 = vld [vmem:[#allocation2 + $0x7b8] sm:$0xff] }
 0x2cf   :  { %v8028_v43 = vcombine.high %v379_v36, %v387_v37  ;;  %v8027_v48 = vcombine.low %v379_v36, %v387_v37  ;;  %v8029_v49 = vcombine.low %v380_v39, %v388_v40  ;;  %v475_v31 = vld [vmem:[#allocation2 + $0xab0] sm:$0xff] }
 0x2d1   :  { %5517 = vmatpush1.bf16.msra.mxu0 %v7915_v44  ;;  %5640 = vmatpush1.bf16.msra.mxu1 %v7917_v45  ;;  %v8030_v44 = vcombine.high %v380_v39, %v388_v40  ;;  %v395_v45 = vld [vmem:[#allocation2 + $0x830] sm:$0xff] }
 0x2d2   :  { %5518 = vmatprep.subr.bf16.mxu0 %v7932_v46  ;;  %5641 = vmatprep.subr.bf16.mxu1 %v7934_v47  ;;  %v403_v46 = vld [vmem:[#allocation2 + $0x870] sm:$0xff]  ;;  %v396_v47 = vld [vmem:[#allocation2 + $0x838] sm:$0xff] }
 0x2d3   :  { %v8044_v50 = vcombine.high %v395_v45, %v403_v46  ;;  %v8043_v56 = vcombine.low %v395_v45, %v403_v46  ;;  %v8045_v58 = vcombine.low %v396_v47, %v404_v24  ;;  %v491_v40 = vld [vmem:[#allocation2 + $0xb30] sm:$0xff] }
 0x2d5   :  { %5519 = vmatpush1.bf16.msra.mxu0 %v7931_v51  ;;  %5642 = vmatpush1.bf16.msra.mxu1 %v7933_v52  ;;  %v8046_v51 = vcombine.high %v396_v47, %v404_v24  ;;  %v411_v52 = vld [vmem:[#allocation2 + $0x8b0] sm:$0xff] }
 0x2d6   :  { %5520 = vmatprep.subr.bf16.mxu0 %v7948_v57  ;;  %5643 = vmatprep.subr.bf16.mxu1 %v7950_v54  ;;  %v419_v57 = vld [vmem:[#allocation2 + $0x8f0] sm:$0xff]  ;;  %v412_v54 = vld [vmem:[#allocation2 + $0x8b8] sm:$0xff] }
 0x2d7   :  { %v8060_v59 = vcombine.high %v411_v52, %v419_v57  ;;  %v8059_v4 = vcombine.low %v411_v52, %v419_v57  ;;  %v8061_v6 = vcombine.low %v412_v54, %v420_v55  ;;  %v507_v24 = vld [vmem:[#allocation2 + $0xbb0] sm:$0xff] }
 0x2d9   :  { %5521 = vmatpush1.bf16.msra.mxu0 %v7947_v60  ;;  %5644 = vmatpush1.bf16.msra.mxu1 %v7949_v62  ;;  %v8062_v60 = vcombine.high %v412_v54, %v420_v55  ;;  %v427_v62 = vld [vmem:[#allocation2 + $0x930] sm:$0xff] }
 0x2da   :  { %5522 = vmatprep.subr.bf16.mxu0 %v7964_v63  ;;  %5645 = vmatprep.subr.bf16.mxu1 %v7966_v0  ;;  %v435_v63 = vld [vmem:[#allocation2 + $0x970] sm:$0xff]  ;;  %v428_v0 = vld [vmem:[#allocation2 + $0x938] sm:$0xff] }
 0x2db   :  { %v8076_v7 = vcombine.high %v427_v62, %v435_v63  ;;  %v8075_v18 = vcombine.low %v427_v62, %v435_v63  ;;  %v523_v55 = vld [vmem:[#allocation2 + $0xc30] sm:$0xff] }
 0x2dd   :  { %5523 = vmatpush1.bf16.msra.mxu0 %v7963_v8  ;;  %5646 = vmatpush1.bf16.msra.mxu1 %v7965_v9  ;;  %v8078_v8 = vcombine.high %v428_v0, %v436_v3  ;;  %v443_v9 = vld [vmem:[#allocation2 + $0x9b0] sm:$0xff] }
 0x2de   :  { %5524 = vmatprep.subr.bf16.mxu0 %v7980_v11  ;;  %5647 = vmatprep.subr.bf16.mxu1 %v7982_v13  ;;  %v451_v11 = vld [vmem:[#allocation2 + $0x9f0] sm:$0xff]  ;;  %v444_v13 = vld [vmem:[#allocation2 + $0x9b8] sm:$0xff] }
 0x2df   :  { %v8092_v19 = vcombine.high %v443_v9, %v451_v11  ;;  %v8094_v21 = vcombine.high %v444_v13, %v452_v14  ;;  %v8091_v28 = vcombine.low %v443_v9, %v451_v11  ;;  %v8093_v29 = vcombine.low %v444_v13, %v452_v14  ;;  %v555_v14 = vld [vmem:[#allocation2 + $0xd30] sm:$0xff] }
 0x2e1   :  { %5525 = vmatpush1.bf16.msra.mxu0 %v7979_v22  ;;  %5648 = vmatpush1.bf16.msra.mxu1 %v7981_v53  ;;  %v459_v22 = vld [vmem:[#allocation2 + $0xa30] sm:$0xff] }
 0x2e2   :  { %5526 = vmatprep.subr.bf16.mxu0 %v7996_v26  ;;  %5649 = vmatprep.subr.bf16.mxu1 %v7998_v27  ;;  %v467_v53 = vld [vmem:[#allocation2 + $0xa70] sm:$0xff]  ;;  %v460_v26 = vld [vmem:[#allocation2 + $0xa38] sm:$0xff] }
 0x2e3   :  { %v468_v27 = vld [vmem:[#allocation2 + $0xa78] sm:$0xff]  ;;  %v8108_v30 = vcombine.high %v459_v22, %v467_v53 }
 0x2e4   :  { %v8109_v36 = vcombine.low %v460_v26, %v468_v27 }
 0x2e5   :  { %5527 = vmatpush1.bf16.msra.mxu0 %v7995_v32  ;;  %5650 = vmatpush1.bf16.msra.mxu1 %v7997_v33  ;;  %v483_v32 = vld [vmem:[#allocation2 + $0xaf0] sm:$0xff]  ;;  %v476_v33 = vld [vmem:[#allocation2 + $0xab8] sm:$0xff] }
 0x2e6   :  { %5528 = vmatprep.subr.bf16.mxu0 %v8012_v15  ;;  %5651 = vmatprep.subr.bf16.mxu1 %v8014_v35  ;;  %v484_v15 = vld [vmem:[#allocation2 + $0xaf8] sm:$0xff]  ;;  %v8107_v35 = vcombine.low %v459_v22, %v467_v53  ;;  %v8124_v37 = vcombine.high %v475_v31, %v483_v32 }
 0x2e7   :  { %v8126_v39 = vcombine.high %v476_v33, %v484_v15  ;;  %v8125_v45 = vcombine.low %v476_v33, %v484_v15  ;;  %v587_v15 = vld [vmem:[#allocation2 + $0xe30] sm:$0xff] }
 0x2e9   :  { %5529 = vmatpush1.bf16.msra.mxu0 %v8011_v41  ;;  %5652 = vmatpush1.bf16.msra.mxu1 %v8013_v42  ;;  %v499_v41 = vld [vmem:[#allocation2 + $0xb70] sm:$0xff]  ;;  %v492_v42 = vld [vmem:[#allocation2 + $0xb38] sm:$0xff] }
 0x2ea   :  { %5530 = vmatprep.subr.bf16.mxu0 %v8028_v43  ;;  %5653 = vmatprep.subr.bf16.mxu1 %v8030_v44  ;;  %v500_v43 = vld [vmem:[#allocation2 + $0xb78] sm:$0xff]  ;;  %v8123_v44 = vcombine.low %v475_v31, %v483_v32  ;;  %v8140_v46 = vcombine.high %v491_v40, %v499_v41 }
 0x2eb   :  { %v8142_v47 = vcombine.high %v492_v42, %v500_v43  ;;  %v8141_v52 = vcombine.low %v492_v42, %v500_v43  ;;  %v603_v43 = vld [vmem:[#allocation2 + $0xeb0] sm:$0xff] }
 0x2ed   :  { %5531 = vmatpush1.bf16.msra.mxu0 %v8027_v48  ;;  %5654 = vmatpush1.bf16.msra.mxu1 %v8029_v49  ;;  %v515_v48 = vld [vmem:[#allocation2 + $0xbf0] sm:$0xff]  ;;  %v508_v49 = vld [vmem:[#allocation2 + $0xbb8] sm:$0xff] }
 0x2ee   :  { %5541 = vmatprep.subr.bf16.mxu0 %v8044_v50  ;;  %5664 = vmatprep.subr.bf16.mxu1 %v8046_v51  ;;  %v516_v50 = vld [vmem:[#allocation2 + $0xbf8] sm:$0xff]  ;;  %v8139_v51 = vcombine.low %v491_v40, %v499_v41  ;;  %v8156_v57 = vcombine.high %v507_v24, %v515_v48 }
 0x2ef   :  { %v8158_v54 = vcombine.high %v508_v49, %v516_v50  ;;  %v8157_v62 = vcombine.low %v508_v49, %v516_v50  ;;  %v619_v50 = vld [vmem:[#allocation2 + $0xf30] sm:$0xff] }
 0x2f0   :  { %5533 = vmatmul.mubr.bf16.vlgmr.msra.gmra.mrb[12].mxu0 %v9564_v12  ;;  %5656 = vmatmul.mubr.bf16.vlgmr.msra.gmra.mrb[12].mxu1 %v9564_v12  ;;  %v8077_v12 = vcombine.low %v428_v0, %v436_v3  ;;  %v539_v3 = vld [vmem:[#allocation2 + $0xcb0] sm:$0xff] }
 0x2f1   :  { %5542 = vmatpush1.bf16.msra.mxu0 %v8043_v56  ;;  %5665 = vmatpush1.bf16.msra.mxu1 %v8045_v58  ;;  %v531_v56 = vld [vmem:[#allocation2 + $0xc70] sm:$0xff]  ;;  %v524_v58 = vld [vmem:[#allocation2 + $0xc38] sm:$0xff] }
 0x2f2   :  { %5543 = vmatprep.subr.bf16.mxu0 %v8060_v59  ;;  %5666 = vmatprep.subr.bf16.mxu1 %v8062_v60  ;;  %v532_v59 = vld [vmem:[#allocation2 + $0xc78] sm:$0xff]  ;;  %v8155_v60 = vcombine.low %v507_v24, %v515_v48  ;;  %v8172_v63 = vcombine.high %v523_v55, %v531_v56 }
 0x2f3   :  { %5573 = vmatprep.mubr.bf16.mxu0 %v9573_v23  ;;  %5696 = vmatprep.mubr.bf16.mxu1 %v9573_v23  ;;  %v8110_v23 = vcombine.high %v460_v26, %v468_v27  ;;  %v8174_v0 = vcombine.high %v524_v58, %v532_v59  ;;  %v8173_v9 = vcombine.low %v524_v58, %v532_v59  ;;  %v571_v27 = vld [vmem:[#allocation2 + $0xdb0] sm:$0xff] }
 0x2f4   :  { %v635_v59 = vld [vmem:[#allocation2 + $0xfb0] sm:$0xff] }
 0x2f5   :  { %5544 = vmatpush1.bf16.msra.mxu0 %v8059_v4  ;;  %5667 = vmatpush1.bf16.msra.mxu1 %v8061_v6  ;;  %v547_v4 = vld [vmem:[#allocation2 + $0xcf0] sm:$0xff]  ;;  %v540_v6 = vld [vmem:[#allocation2 + $0xcb8] sm:$0xff] }
 0x2f6   :  { %5545 = vmatprep.subr.bf16.mxu0 %v8076_v7  ;;  %5668 = vmatprep.subr.bf16.mxu1 %v8078_v8  ;;  %v548_v7 = vld [vmem:[#allocation2 + $0xcf8] sm:$0xff]  ;;  %v8171_v8 = vcombine.low %v523_v55, %v531_v56  ;;  %v8188_v11 = vcombine.high %v539_v3, %v547_v4 }
 0x2f7   :  { %v8190_v13 = vcombine.high %v540_v6, %v548_v7  ;;  %v8189_v22 = vcombine.low %v540_v6, %v548_v7  ;;  %v651_v7 = vld [vmem:[#allocation2 + $0x1030] sm:$0xff] }
 0x2f9   :  { %5546 = vmatpush1.bf16.msra.mxu0 %v8075_v18  ;;  %5669 = vmatpush1.bf16.msra.mxu1 %v8077_v12  ;;  %v563_v18 = vld [vmem:[#allocation2 + $0xd70] sm:$0xff]  ;;  %v556_v12 = vld [vmem:[#allocation2 + $0xd38] sm:$0xff] }
 0x2fa   :  { %5547 = vmatprep.subr.bf16.mxu0 %v8092_v19  ;;  %5670 = vmatprep.subr.bf16.mxu1 %v8094_v21  ;;  %v564_v19 = vld [vmem:[#allocation2 + $0xd78] sm:$0xff]  ;;  %v8187_v21 = vcombine.low %v539_v3, %v547_v4  ;;  %v8204_v53 = vcombine.high %v555_v14, %v563_v18 }
 0x2fb   :  { %v8206_v26 = vcombine.high %v556_v12, %v564_v19  ;;  %v8205_v31 = vcombine.low %v556_v12, %v564_v19  ;;  %v667_v19 = vld [vmem:[#allocation2 + $0x10b0] sm:$0xff] }
 0x2fd   :  { %5548 = vmatpush1.bf16.msra.mxu0 %v8091_v28  ;;  %5671 = vmatpush1.bf16.msra.mxu1 %v8093_v29  ;;  %v579_v28 = vld [vmem:[#allocation2 + $0xdf0] sm:$0xff]  ;;  %v572_v29 = vld [vmem:[#allocation2 + $0xdb8] sm:$0xff] }
 0x2fe   :  { %5549 = vmatprep.subr.bf16.mxu0 %v8108_v30  ;;  %5672 = vmatprep.subr.bf16.mxu1 %v8110_v23  ;;  %v580_v30 = vld [vmem:[#allocation2 + $0xdf8] sm:$0xff]  ;;  %v8203_v23 = vcombine.low %v555_v14, %v563_v18  ;;  %v8220_v32 = vcombine.high %v571_v27, %v579_v28 }
 0x2ff   :  { %v8222_v33 = vcombine.high %v572_v29, %v580_v30  ;;  %v8221_v40 = vcombine.low %v572_v29, %v580_v30  ;;  %v683_v30 = vld [vmem:[#allocation2 + $0x1130] sm:$0xff] }
 0x301   :  { %5550 = vmatpush1.bf16.msra.mxu0 %v8107_v35  ;;  %5673 = vmatpush1.bf16.msra.mxu1 %v8109_v36  ;;  %v595_v35 = vld [vmem:[#allocation2 + $0xe70] sm:$0xff]  ;;  %v588_v36 = vld [vmem:[#allocation2 + $0xe38] sm:$0xff] }
 0x302   :  { %5551 = vmatprep.subr.bf16.mxu0 %v8124_v37  ;;  %5674 = vmatprep.subr.bf16.mxu1 %v8126_v39  ;;  %v596_v37 = vld [vmem:[#allocation2 + $0xe78] sm:$0xff]  ;;  %v8219_v39 = vcombine.low %v571_v27, %v579_v28  ;;  %v8236_v41 = vcombine.high %v587_v15, %v595_v35 }
 0x303   :  { %v8238_v42 = vcombine.high %v588_v36, %v596_v37  ;;  %v8237_v24 = vcombine.low %v588_v36, %v596_v37  ;;  %v699_v37 = vld [vmem:[#allocation2 + $0x11b0] sm:$0xff] }
 0x305   :  { %5552 = vmatpush1.bf16.msra.mxu0 %v8123_v44  ;;  %5675 = vmatpush1.bf16.msra.mxu1 %v8125_v45  ;;  %v611_v44 = vld [vmem:[#allocation2 + $0xef0] sm:$0xff]  ;;  %v604_v45 = vld [vmem:[#allocation2 + $0xeb8] sm:$0xff] }
 0x306   :  { %5553 = vmatprep.subr.bf16.mxu0 %v8140_v46  ;;  %5676 = vmatprep.subr.bf16.mxu1 %v8142_v47  ;;  %v612_v46 = vld [vmem:[#allocation2 + $0xef8] sm:$0xff]  ;;  %v8235_v47 = vcombine.low %v587_v15, %v595_v35  ;;  %v8252_v48 = vcombine.high %v603_v43, %v611_v44 }
 0x307   :  { %v8254_v49 = vcombine.high %v604_v45, %v612_v46  ;;  %v8253_v55 = vcombine.low %v604_v45, %v612_v46  ;;  %v715_v45 = vld [vmem:[#allocation2 + $0x1230] sm:$0xff] }
 0x308   :  { %v723_v46 = vld [vmem:[#allocation2 + $0x1270] sm:$0xff] }
 0x309   :  { %5554 = vmatpush1.bf16.msra.mxu0 %v8139_v51  ;;  %5677 = vmatpush1.bf16.msra.mxu1 %v8141_v52  ;;  %v627_v51 = vld [vmem:[#allocation2 + $0xf70] sm:$0xff]  ;;  %v620_v52 = vld [vmem:[#allocation2 + $0xf38] sm:$0xff] }
 0x30a   :  { %5555 = vmatprep.subr.bf16.mxu0 %v8156_v57  ;;  %5678 = vmatprep.subr.bf16.mxu1 %v8158_v54  ;;  %v628_v57 = vld [vmem:[#allocation2 + $0xf78] sm:$0xff]  ;;  %v8251_v54 = vcombine.low %v603_v43, %v611_v44  ;;  %v8268_v56 = vcombine.high %v619_v50, %v627_v51 }
 0x30b   :  { %v8270_v58 = vcombine.high %v620_v52, %v628_v57  ;;  %v8269_v3 = vcombine.low %v620_v52, %v628_v57  ;;  %v739_v52 = vld [vmem:[#allocation2 + $0x12f0] sm:$0xff]  ;;  %v732_v57 = vld [vmem:[#allocation2 + $0x12b8] sm:$0xff] }
 0x30d   :  { %5556 = vmatpush1.bf16.msra.mxu0 %v8155_v60  ;;  %5679 = vmatpush1.bf16.msra.mxu1 %v8157_v62  ;;  %v643_v60 = vld [vmem:[#allocation2 + $0xff0] sm:$0xff]  ;;  %v636_v62 = vld [vmem:[#allocation2 + $0xfb8] sm:$0xff] }
 0x30e   :  { %5557 = vmatprep.subr.bf16.mxu0 %v8172_v63  ;;  %5680 = vmatprep.subr.bf16.mxu1 %v8174_v0  ;;  %v644_v63 = vld [vmem:[#allocation2 + $0xff8] sm:$0xff]  ;;  %v8267_v0 = vcombine.low %v619_v50, %v627_v51  ;;  %v8284_v4 = vcombine.high %v635_v59, %v643_v60  ;;  %v8364_v50 = vcombine.high %v715_v45, %v723_v46  ;;  %v731_v51 = vld [vmem:[#allocation2 + $0x12b0] sm:$0xff] }
 0x30f   :  { %v8286_v6 = vcombine.high %v636_v62, %v644_v63  ;;  %v8285_v14 = vcombine.low %v636_v62, %v644_v63  ;;  %v755_v62 = vld [vmem:[#allocation2 + $0x1370] sm:$0xff]  ;;  %v748_v63 = vld [vmem:[#allocation2 + $0x1338] sm:$0xff] }
 0x311   :  { %5558 = vmatpush1.bf16.msra.mxu0 %v8171_v8  ;;  %5681 = vmatpush1.bf16.msra.mxu1 %v8173_v9  ;;  %v659_v8 = vld [vmem:[#allocation2 + $0x1070] sm:$0xff]  ;;  %v652_v9 = vld [vmem:[#allocation2 + $0x1038] sm:$0xff] }
 0x312   :  { %5559 = vmatprep.subr.bf16.mxu0 %v8188_v11  ;;  %5682 = vmatprep.subr.bf16.mxu1 %v8190_v13  ;;  %v660_v11 = vld [vmem:[#allocation2 + $0x1078] sm:$0xff]  ;;  %v8283_v13 = vcombine.low %v635_v59, %v643_v60  ;;  %v8300_v18 = vcombine.high %v651_v7, %v659_v8  ;;  %v747_v60 = vld [vmem:[#allocation2 + $0x1330] sm:$0xff] }
 0x313   :  { %v8302_v12 = vcombine.high %v652_v9, %v660_v11  ;;  %v8301_v27 = vcombine.low %v652_v9, %v660_v11  ;;  %v771_v9 = vld [vmem:[#allocation2 + $0x13f0] sm:$0xff]  ;;  %v764_v11 = vld [vmem:[#allocation2 + $0x13b8] sm:$0xff] }
 0x315   :  { %5560 = vmatpush1.bf16.msra.mxu0 %v8187_v21  ;;  %5683 = vmatpush1.bf16.msra.mxu1 %v8189_v22  ;;  %v675_v21 = vld [vmem:[#allocation2 + $0x10f0] sm:$0xff]  ;;  %v668_v22 = vld [vmem:[#allocation2 + $0x10b8] sm:$0xff] }
 0x316   :  { %5561 = vmatprep.subr.bf16.mxu0 %v8204_v53  ;;  %5684 = vmatprep.subr.bf16.mxu1 %v8206_v26  ;;  %v676_v53 = vld [vmem:[#allocation2 + $0x10f8] sm:$0xff]  ;;  %v8299_v26 = vcombine.low %v651_v7, %v659_v8  ;;  %v8316_v28 = vcombine.high %v667_v19, %v675_v21  ;;  %v763_v8 = vld [vmem:[#allocation2 + $0x13b0] sm:$0xff] }
 0x317   :  { %v8318_v29 = vcombine.high %v668_v22, %v676_v53  ;;  %v8317_v15 = vcombine.low %v668_v22, %v676_v53  ;;  %v787_v22 = vld [vmem:[#allocation2 + $0x1470] sm:$0xff]  ;;  %v780_v53 = vld [vmem:[#allocation2 + $0x1438] sm:$0xff] }
 0x319   :  { %5562 = vmatpush1.bf16.msra.mxu0 %v8203_v23  ;;  %5685 = vmatpush1.bf16.msra.mxu1 %v8205_v31  ;;  %v691_v23 = vld [vmem:[#allocation2 + $0x1170] sm:$0xff]  ;;  %v684_v31 = vld [vmem:[#allocation2 + $0x1138] sm:$0xff] }
 0x31a   :  { %5563 = vmatprep.subr.bf16.mxu0 %v8220_v32  ;;  %5686 = vmatprep.subr.bf16.mxu1 %v8222_v33  ;;  %v692_v32 = vld [vmem:[#allocation2 + $0x1178] sm:$0xff]  ;;  %v8315_v33 = vcombine.low %v667_v19, %v675_v21  ;;  %v8332_v35 = vcombine.high %v683_v30, %v691_v23  ;;  %v779_v21 = vld [vmem:[#allocation2 + $0x1430] sm:$0xff] }
 0x31b   :  { %v8334_v36 = vcombine.high %v684_v31, %v692_v32 }
 0x31d   :  { %5564 = vmatpush1.bf16.msra.mxu0 %v8219_v39  ;;  %5687 = vmatpush1.bf16.msra.mxu1 %v8221_v40  ;;  %v707_v39 = vld [vmem:[#allocation2 + $0x11f0] sm:$0xff]  ;;  %v700_v40 = vld [vmem:[#allocation2 + $0x11b8] sm:$0xff] }
 0x31e   :  { %5565 = vmatprep.subr.bf16.mxu0 %v8236_v41  ;;  %5688 = vmatprep.subr.bf16.mxu1 %v8238_v42  ;;  %v708_v41 = vld [vmem:[#allocation2 + $0x11f8] sm:$0xff]  ;;  %v8331_v42 = vcombine.low %v683_v30, %v691_v23  ;;  %v8348_v43 = vcombine.high %v699_v37, %v707_v39  ;;  %v795_v23 = vld [vmem:[#allocation2 + $0x14b0] sm:$0xff] }
 0x31f   :  { %v8350_v44 = vcombine.high %v700_v40, %v708_v41 }
 0x321   :  { %5566 = vmatpush1.bf16.msra.mxu0 %v8235_v47  ;;  %5689 = vmatpush1.bf16.msra.mxu1 %v8237_v24  ;;  %v716_v47 = vld [vmem:[#allocation2 + $0x1238] sm:$0xff] }
 0x322   :  { %5567 = vmatprep.subr.bf16.mxu0 %v8252_v48  ;;  %5690 = vmatprep.subr.bf16.mxu1 %v8254_v49  ;;  %v724_v24 = vld [vmem:[#allocation2 + $0x1278] sm:$0xff]  ;;  %v8347_v48 = vcombine.low %v699_v37, %v707_v39  ;;  %v8349_v49 = vcombine.low %v700_v40, %v708_v41  ;;  %v811_v39 = vld [vmem:[#allocation2 + $0x1530] sm:$0xff] }
 0x323   :  { %v819_v40 = vld [vmem:[#allocation2 + $0x1570] sm:$0xff]  ;;  %v812_v41 = vld [vmem:[#allocation2 + $0x1538] sm:$0xff] }
 0x325   :  { %5568 = vmatpush1.bf16.msra.mxu0 %v8251_v54  ;;  %5691 = vmatpush1.bf16.msra.mxu1 %v8253_v55  ;;  %v740_v54 = vld [vmem:[#allocation2 + $0x12f8] sm:$0xff]  ;;  %v8363_v55 = vcombine.low %v715_v45, %v723_v46  ;;  %v827_v46 = vld [vmem:[#allocation2 + $0x15b0] sm:$0xff] }
 0x326   :  { %5569 = vmatprep.subr.bf16.mxu0 %v8268_v56  ;;  %5692 = vmatprep.subr.bf16.mxu1 %v8270_v58  ;;  %v8365_v56 = vcombine.low %v716_v47, %v724_v24  ;;  %v8380_v58 = vcombine.high %v731_v51, %v739_v52  ;;  %v8382_v59 = vcombine.high %v732_v57, %v740_v54 }
 0x329   :  { %5570 = vmatpush1.bf16.msra.mxu0 %v8267_v0  ;;  %5693 = vmatpush1.bf16.msra.mxu1 %v8269_v3  ;;  %v756_v0 = vld [vmem:[#allocation2 + $0x1378] sm:$0xff]  ;;  %v8379_v3 = vcombine.low %v731_v51, %v739_v52  ;;  %v843_v52 = vld [vmem:[#allocation2 + $0x1630] sm:$0xff] }
 0x32a   :  { %5571 = vmatprep.subr.bf16.mxu0 %v8284_v4  ;;  %5694 = vmatprep.subr.bf16.mxu1 %v8286_v6  ;;  %v8381_v4 = vcombine.low %v732_v57, %v740_v54  ;;  %v8396_v6 = vcombine.high %v747_v60, %v755_v62  ;;  %v8398_v7 = vcombine.high %v748_v63, %v756_v0  ;;  %v851_v57 = vld [vmem:[#allocation2 + $0x1670] sm:$0xff]  ;;  %v844_v54 = vld [vmem:[#allocation2 + $0x1638] sm:$0xff] }
 0x32d   :  { %5572 = vmatpush1.bf16.msra.mxu0 %v8283_v13  ;;  %5695 = vmatpush1.bf16.msra.mxu1 %v8285_v14  ;;  %v772_v13 = vld [vmem:[#allocation2 + $0x13f8] sm:$0xff]  ;;  %v8395_v14 = vcombine.low %v747_v60, %v755_v62  ;;  %v859_v62 = vld [vmem:[#allocation2 + $0x16b0] sm:$0xff] }
 0x32e   :  { %5582 = vmatprep.subr.bf16.mxu0 %v8300_v18  ;;  %5705 = vmatprep.subr.bf16.mxu1 %v8302_v12  ;;  %v8397_v18 = vcombine.low %v748_v63, %v756_v0  ;;  %v8412_v12 = vcombine.high %v763_v8, %v771_v9  ;;  %v8414_v19 = vcombine.high %v764_v11, %v772_v13  ;;  %v867_v63 = vld [vmem:[#allocation2 + $0x16f0] sm:$0xff]  ;;  %v860_v0 = vld [vmem:[#allocation2 + $0x16b8] sm:$0xff] }
 0x330   :  { %5574 = vmatmul.mubr.bf16.vlgmr.msra.gmra.mrb[12].mxu0 %v9586_v25  ;;  %5697 = vmatmul.mubr.bf16.vlgmr.msra.gmra.mrb[12].mxu1 %v9586_v25  ;;  %v8333_v25 = vcombine.low %v684_v31, %v692_v32  ;;  %v803_v31 = vld [vmem:[#allocation2 + $0x14f0] sm:$0xff]  ;;  %v796_v32 = vld [vmem:[#allocation2 + $0x14b8] sm:$0xff] }
 0x331   :  { %5583 = vmatpush1.bf16.msra.mxu0 %v8299_v26  ;;  %5706 = vmatpush1.bf16.msra.mxu1 %v8301_v27  ;;  %v788_v26 = vld [vmem:[#allocation2 + $0x1478] sm:$0xff]  ;;  %v8411_v27 = vcombine.low %v763_v8, %v771_v9  ;;  %v875_v9 = vld [vmem:[#allocation2 + $0x1730] sm:$0xff] }
 0x332   :  { %5584 = vmatprep.subr.bf16.mxu0 %v8316_v28  ;;  %5707 = vmatprep.subr.bf16.mxu1 %v8318_v29  ;;  %v8413_v28 = vcombine.low %v764_v11, %v772_v13  ;;  %v8428_v29 = vcombine.high %v779_v21, %v787_v22  ;;  %v8430_v30 = vcombine.high %v780_v53, %v788_v26  ;;  %v883_v11 = vld [vmem:[#allocation2 + $0x1770] sm:$0xff]  ;;  %v876_v13 = vld [vmem:[#allocation2 + $0x1738] sm:$0xff] }
 0x333   :  { %5614 = vmatprep.mubr.bf16.mxu0 %v9590_v34  ;;  %5737 = vmatprep.mubr.bf16.mxu1 %v9590_v34  ;;  %v8366_v34 = vcombine.high %v716_v47, %v724_v24  ;;  %v835_v47 = vld [vmem:[#allocation2 + $0x15f0] sm:$0xff]  ;;  %v828_v24 = vld [vmem:[#allocation2 + $0x15b8] sm:$0xff] }
 0x335   :  { %5585 = vmatpush1.bf16.msra.mxu0 %v8315_v33  ;;  %5708 = vmatpush1.bf16.msra.mxu1 %v8317_v15  ;;  %v804_v33 = vld [vmem:[#allocation2 + $0x14f8] sm:$0xff]  ;;  %v8427_v15 = vcombine.low %v779_v21, %v787_v22  ;;  %v891_v22 = vld [vmem:[#allocation2 + $0x17b0] sm:$0xff] }
 0x336   :  { %5586 = vmatprep.subr.bf16.mxu0 %v8332_v35  ;;  %5709 = vmatprep.subr.bf16.mxu1 %v8334_v36  ;;  %v8429_v35 = vcombine.low %v780_v53, %v788_v26  ;;  %v8444_v36 = vcombine.high %v795_v23, %v803_v31  ;;  %v8446_v37 = vcombine.high %v796_v32, %v804_v33  ;;  %v899_v53 = vld [vmem:[#allocation2 + $0x17f0] sm:$0xff]  ;;  %v892_v26 = vld [vmem:[#allocation2 + $0x17b8] sm:$0xff] }
 0x339   :  { %5587 = vmatpush1.bf16.msra.mxu0 %v8331_v42  ;;  %5710 = vmatpush1.bf16.msra.mxu1 %v8333_v25  ;;  %v820_v42 = vld [vmem:[#allocation2 + $0x1578] sm:$0xff]  ;;  %v8443_v25 = vcombine.low %v795_v23, %v803_v31  ;;  %v8539_v31 = vcombine.low %v891_v22, %v899_v53 }
 0x33a   :  { %5588 = vmatprep.subr.bf16.mxu0 %v8348_v43  ;;  %5711 = vmatprep.subr.bf16.mxu1 %v8350_v44  ;;  %v8445_v43 = vcombine.low %v796_v32, %v804_v33  ;;  %v8460_v44 = vcombine.high %v811_v39, %v819_v40  ;;  %v8462_v45 = vcombine.high %v812_v41, %v820_v42  ;;  %v9079_v33 = vld [vmem:[#allocation4 + $0x40] sm:$0xff]  }
 0x33d   :  { %5589 = vmatpush1.bf16.msra.mxu0 %v8347_v48  ;;  %5712 = vmatpush1.bf16.msra.mxu1 %v8349_v49  ;;  %v836_v48 = vld [vmem:[#allocation2 + $0x15f8] sm:$0xff]  ;;  %v8459_v49 = vcombine.low %v811_v39, %v819_v40  ;;  %v9082_v39 = vld [vmem:[#allocation4 + $0x80] sm:$0xff]   ;;  %v9083_v40 = vld [vmem:[#allocation4 + $0x48] sm:$0xff]  }
 0x33e   :  { %5590 = vmatprep.subr.bf16.mxu0 %v8364_v50  ;;  %5713 = vmatprep.subr.bf16.mxu1 %v8366_v34  ;;  %v8461_v50 = vcombine.low %v812_v41, %v820_v42  ;;  %v8476_v34 = vcombine.high %v827_v46, %v835_v47  ;;  %v8478_v51 = vcombine.high %v828_v24, %v836_v48  ;;  %v9084_v42 = vld [vmem:[#allocation4 + $0xc8] sm:$0xff]  }
 0x341   :  { %5591 = vmatpush1.bf16.msra.mxu0 %v8363_v55  ;;  %5714 = vmatpush1.bf16.msra.mxu1 %v8365_v56  ;;  %v852_v55 = vld [vmem:[#allocation2 + $0x1678] sm:$0xff]  ;;  %v8475_v56 = vcombine.low %v827_v46, %v835_v47  ;;  %v9090_v46 = vld [vmem:[#allocation4 + $0x90] sm:$0xff]  }
 0x342   :  { %5592 = vmatprep.subr.bf16.mxu0 %v8380_v58  ;;  %5715 = vmatprep.subr.bf16.mxu1 %v8382_v59  ;;  %v8477_v58 = vcombine.low %v828_v24, %v836_v48  ;;  %v8492_v59 = vcombine.high %v843_v52, %v851_v57  ;;  %v8494_v60 = vcombine.high %v844_v54, %v852_v55  ;;  %v9091_v47 = vld [vmem:[#allocation4 + $0x58] sm:$0xff]  }
 0x343   :  { %v9092_v24 = vld [vmem:[#allocation4 + $0xd8] sm:$0xff]  }
 0x344   :  { %v9094_v48 = vld [vmem:[#allocation4 + $0x98] sm:$0xff]  }
 0x345   :  { %5593 = vmatpush1.bf16.msra.mxu0 %v8379_v3  ;;  %5716 = vmatpush1.bf16.msra.mxu1 %v8381_v4  ;;  %v868_v3 = vld [vmem:[#allocation2 + $0x16f8] sm:$0xff]  ;;  %v8491_v4 = vcombine.low %v843_v52, %v851_v57  ;;  %v9099_v52 = vld [vmem:[#allocation4 + $0x68] sm:$0xff]  }
 0x346   :  { %5594 = vmatprep.subr.bf16.mxu0 %v8396_v6  ;;  %5717 = vmatprep.subr.bf16.mxu1 %v8398_v7  ;;  %v8493_v6 = vcombine.low %v844_v54, %v852_v55  ;;  %v8508_v7 = vcombine.high %v859_v62, %v867_v63  ;;  %v8510_v8 = vcombine.high %v860_v0, %v868_v3  ;;  %v9100_v57 = vld [vmem:[#allocation4 + $0xe8] sm:$0xff]  }
 0x347   :  { %v9101_v54 = vld [vmem:[#allocation4 + $0x28] sm:$0xff]  }
 0x348   :  { %v9102_v55 = vld [vmem:[#allocation4 + $0xa8] sm:$0xff]  }
 0x349   :  { %5595 = vmatpush1.bf16.msra.mxu0 %v8395_v14  ;;  %5718 = vmatpush1.bf16.msra.mxu1 %v8397_v18  ;;  %v884_v14 = vld [vmem:[#allocation2 + $0x1778] sm:$0xff]  ;;  %v8507_v18 = vcombine.low %v859_v62, %v867_v63 }
 0x34a   :  { %5596 = vmatprep.subr.bf16.mxu0 %v8412_v12  ;;  %5719 = vmatprep.subr.bf16.mxu1 %v8414_v19  ;;  %v8509_v12 = vcombine.low %v860_v0, %v868_v3  ;;  %v8524_v19 = vcombine.high %v875_v9, %v883_v11  ;;  %v8526_v21 = vcombine.high %v876_v13, %v884_v14  ;;  %v9105_v3 = vld [vmem:[#allocation4 + $0x30] sm:$0xff]  }
 0x34d   :  { %5597 = vmatpush1.bf16.msra.mxu0 %v8411_v27  ;;  %5720 = vmatpush1.bf16.msra.mxu1 %v8413_v28  ;;  %v900_v27 = vld [vmem:[#allocation2 + $0x17f8] sm:$0xff]  ;;  %v8523_v28 = vcombine.low %v875_v9, %v883_v11 }
 0x34e   :  { %5598 = vmatprep.subr.bf16.mxu0 %v8428_v29  ;;  %5721 = vmatprep.subr.bf16.mxu1 %v8430_v30  ;;  %v8525_v29 = vcombine.low %v876_v13, %v884_v14  ;;  %v8540_v30 = vcombine.high %v891_v22, %v899_v53  ;;  %v8542_v23 = vcombine.high %v892_v26, %v900_v27  ;;  %v9108_v11 = vld [vmem:[#allocation4 + $0xf8] sm:$0xff]   ;;  %v5746_v14 = vmax.f32 %v9616_v61, 0.0  ;;  %v9115_v61 = vld [vmem:[#allocation4 + $0x148] sm:$0xff]  }
 0x34f   :  { %v8541_v32 = vcombine.low %v892_v26, %v900_v27  ;;  %v9109_v13 = vld [vmem:[#allocation4 + $0x38] sm:$0xff]   ;;  %v5751_v22 = vmax.f32 %v9640_v17, 0.0  ;;  %v5753_v53 = vmax.f32 %v9642_v20, 0.0  ;;  %v9113_v26 = vld [vmem:[#allocation4 + $0x100] sm:$0xff]   ;;  %v9118_v17 = vld [vmem:[#allocation4 + $0x188] sm:$0xff]  }
 0x350   :  { %v5762_v27 = vpack.c.bf16 %v5746_v14, %v5746_v14  ;;  %v9119_v20 = vld [vmem:[#allocation4 + $0x150] sm:$0xff]   ;;  %v9156_v14 = vld [vmem:[#allocation4 + $0x2d8] sm:$0xff]  }
 0x351   :  { %5599 = vmatpush1.bf16.msra.mxu0 %v8427_v15  ;;  %5722 = vmatpush1.bf16.msra.mxu1 %v8429_v35  ;;  %v9080_v15 = vld [vmem:[#allocation4 + $0xc0] sm:$0xff]   ;;  %v5747_v35 = vmax.f32 %v9620_v2, 0.0  ;;  %v9086_v2 = vld [vmem:[#allocation4 + $0x88] sm:$0xff]  }
 0x352   :  { %5600 = vmatprep.subr.bf16.mxu0 %v8444_v36  ;;  %5723 = vmatprep.subr.bf16.mxu1 %v8446_v37  ;;  %v5749_v36 = vmax.f32 %v9622_v5, 0.0  ;;  %v9081_v37 = vld [vmem:[#allocation4] sm:$0xff]   ;;  %v9087_v5 = vld [vmem:[#allocation4 + $0x50] sm:$0xff]  }
 0x353   :  { %v5763_v41 = vpack.c.bf16 %v5747_v35, %v5747_v35  ;;  %v9123_v35 = vld [vmem:[#allocation4 + $0x158] sm:$0xff]  }
 0x355   :  { %5601 = vmatpush1.bf16.msra.mxu0 %v8443_v25  ;;  %5724 = vmatpush1.bf16.msra.mxu1 %v8445_v43  ;;  %v5765_v25 = vpack.c.bf16 %v5749_v36, %v5749_v36  ;;  %v9085_v43 = vld [vmem:[#allocation4 + $0x8] sm:$0xff]   ;;  %v9124_v36 = vld [vmem:[#allocation4 + $0x1d8] sm:$0xff]  }
 0x356   :  { %5602 = vmatprep.subr.bf16.mxu0 %v8460_v44  ;;  %5725 = vmatprep.subr.bf16.mxu1 %v8462_v45  ;;  %v9088_v44 = vld [vmem:[#allocation4 + $0xd0] sm:$0xff]  }
 0x357   :  { %v9089_v45 = vld [vmem:[#allocation4 + $0x10] sm:$0xff]  }
 0x359   :  { %5603 = vmatpush1.bf16.msra.mxu0 %v8459_v49  ;;  %5726 = vmatpush1.bf16.msra.mxu1 %v8461_v50  ;;  %v9095_v49 = vld [vmem:[#allocation4 + $0x60] sm:$0xff]  }
 0x35a   :  { %5604 = vmatprep.subr.bf16.mxu0 %v8476_v34  ;;  %5727 = vmatprep.subr.bf16.mxu1 %v8478_v51  ;;  %v9096_v50 = vld [vmem:[#allocation4 + $0xe0] sm:$0xff]  }
 0x35b   :  { %v9097_v34 = vld [vmem:[#allocation4 + $0x20] sm:$0xff]  }
 0x35c   :  { %v9098_v51 = vld [vmem:[#allocation4 + $0xa0] sm:$0xff]  }
 0x35d   :  { %5605 = vmatpush1.bf16.msra.mxu0 %v8475_v56  ;;  %5728 = vmatpush1.bf16.msra.mxu1 %v8477_v58  ;;  %v9103_v56 = vld [vmem:[#allocation4 + $0x70] sm:$0xff]  }
 0x35e   :  { %5606 = vmatprep.subr.bf16.mxu0 %v8492_v59  ;;  %5729 = vmatprep.subr.bf16.mxu1 %v8494_v60  ;;  %v9104_v59 = vld [vmem:[#allocation4 + $0xf0] sm:$0xff]  }
 0x361   :  { %5607 = vmatpush1.bf16.msra.mxu0 %v8491_v4  ;;  %5730 = vmatpush1.bf16.msra.mxu1 %v8493_v6 }
 0x362   :  { %5608 = vmatprep.subr.bf16.mxu0 %v8508_v7  ;;  %5731 = vmatprep.subr.bf16.mxu1 %v8510_v8  ;;  %v9106_v7 = vld [vmem:[#allocation4 + $0xb0] sm:$0xff]   ;;  %v9107_v8 = vld [vmem:[#allocation4 + $0x78] sm:$0xff]  }
 0x365   :  { %5609 = vmatpush1.bf16.msra.mxu0 %v8507_v18  ;;  %5732 = vmatpush1.bf16.msra.mxu1 %v8509_v12  ;;  %v9110_v18 = vld [vmem:[#allocation4 + $0xb8] sm:$0xff]   ;;  %v9111_v12 = vld [vmem:[#allocation4 + $0x140] sm:$0xff]  }
 0x366   :  { %5610 = vmatprep.subr.bf16.mxu0 %v8524_v19  ;;  %5733 = vmatprep.subr.bf16.mxu1 %v8526_v21  ;;  %v5748_v19 = vmax.f32 %v9618_v1, 0.0  ;;  %v9112_v21 = vld [vmem:[#allocation4 + $0x1c0] sm:$0xff]   ;;  %v9117_v1 = vld [vmem:[#allocation4 + $0x108] sm:$0xff]  }
 0x369   :  { %5611 = vmatpush1.bf16.msra.mxu0 %v8523_v28  ;;  %5734 = vmatpush1.bf16.msra.mxu1 %v8525_v29  ;;  %v9114_v28 = vld [vmem:[#allocation4 + $0x180] sm:$0xff]   ;;  %v5764_v29 = vpack.c.bf16 %v5748_v19, %v5748_v19 }
 0x36a   :  { %5612 = vmatprep.subr.bf16.mxu0 %v8540_v30  ;;  %5735 = vmatprep.subr.bf16.mxu1 %v8542_v23  ;;  %v5767_v30 = vpack.c.bf16 %v5751_v22, %v5751_v22  ;;  %v9116_v23 = vld [vmem:[#allocation4 + $0x1c8] sm:$0xff]   ;;  %v9159_v19 = vld [vmem:[#allocation4 + $0x260] sm:$0xff]  }
 0x36b   :  { %v9161_v22 = vld [vmem:[#allocation4 + $0x220] sm:$0xff]  }
 0x36d   :  { %5613 = vmatpush1.bf16.msra.mxu0 %v8539_v31  ;;  %5736 = vmatpush1.bf16.msra.mxu1 %v8541_v32  ;;  %v5769_v31 = vpack.c.bf16 %v5753_v53, %v5753_v53  ;;  %v9120_v32 = vld [vmem:[#allocation4 + $0x1d0] sm:$0xff]   ;;  %v9162_v53 = vld [vmem:[#allocation4 + $0x2a0] sm:$0xff]  }
 0x36e   :  { %8703 = vmatprep.subr.bf16.mxu0 %v9079_v33  ;;  %8725 = vmatprep.subr.bf16.mxu1 %v9080_v15  ;;  %v9121_v33 = vld [vmem:[#allocation4 + $0x110] sm:$0xff]  }
 0x36f   :  { %v9122_v15 = vld [vmem:[#allocation4 + $0x190] sm:$0xff]  }
 0x370   :  { %5615 = vmatmul.mubr.bf16.vlgmr.msra.gmra.mrb[12].mxu0 %v9598_v38  ;;  %5738 = vmatmul.mubr.bf16.vlgmr.msra.gmra.mrb[12].mxu1 %v9598_v38  ;;  %v9093_v38 = vld [vmem:[#allocation4 + $0x18] sm:$0xff]  }
 0x371   :  { %8704 = vmatpush3.bf16.msra.mxu0 %v9081_v37  ;;  %6838 = vmatprep.mubr.bf16.mxu0 %v5763_v41  ;;  %v9125_v37 = vld [vmem:[#allocation4 + $0x118] sm:$0xff]   ;;  %v9128_v41 = vld [vmem:[#allocation4 + $0x1e0] sm:$0xff]  }
 0x372   :  { %8726 = vmatpush3.bf16.msra.mxu1 %v9082_v39  ;;  %6878 = vmatprep.mubr.bf16.mxu1 %v5765_v25  ;;  %v9126_v39 = vld [vmem:[#allocation4 + $0x198] sm:$0xff]   ;;  %v9130_v25 = vld [vmem:[#allocation4 + $0x1a0] sm:$0xff]  }
 0x373   :  { %8705 = vmatprep.subr.bf16.mxu0 %v9083_v40  ;;  %8727 = vmatprep.subr.bf16.mxu1 %v9084_v42  ;;  %v9127_v40 = vld [vmem:[#allocation4 + $0x160] sm:$0xff]  }
 0x374   :  { %v9129_v42 = vld [vmem:[#allocation4 + $0x120] sm:$0xff]  }
 0x375   :  { %8706 = vmatpush3.bf16.msra.mxu0 %v9085_v43  ;;  %v9131_v43 = vld [vmem:[#allocation4 + $0x168] sm:$0xff]  }
 0x376   :  { %8728 = vmatpush3.bf16.msra.mxu1 %v9086_v2  ;;  %8707 = vmatprep.subr.bf16.mxu0 %v9087_v5  ;;  %v9132_v2 = vld [vmem:[#allocation4 + $0x1e8] sm:$0xff]  }
 0x377   :  { %8729 = vmatprep.subr.bf16.mxu1 %v9088_v44  ;;  %v9133_v5 = vld [vmem:[#allocation4 + $0x128] sm:$0xff]  }
 0x378   :  { %v9134_v44 = vld [vmem:[#allocation4 + $0x1a8] sm:$0xff]  }
 0x379   :  { %8708 = vmatpush3.bf16.msra.mxu0 %v9089_v45  ;;  %v9135_v45 = vld [vmem:[#allocation4 + $0x170] sm:$0xff]  }
 0x37a   :  { %8730 = vmatpush3.bf16.msra.mxu1 %v9090_v46  ;;  %8709 = vmatprep.subr.bf16.mxu0 %v9091_v47  ;;  %v9136_v46 = vld [vmem:[#allocation4 + $0x1f0] sm:$0xff]  }
 0x37b   :  { %8731 = vmatprep.subr.bf16.mxu1 %v9092_v24  ;;  %v9137_v47 = vld [vmem:[#allocation4 + $0x130] sm:$0xff]  }
 0x37c   :  { %v9138_v24 = vld [vmem:[#allocation4 + $0x1b0] sm:$0xff]  }
 0x37d   :  { %8710 = vmatpush3.bf16.msra.mxu0 %v9093_v38  ;;  %v9139_v38 = vld [vmem:[#allocation4 + $0x178] sm:$0xff]  }
 0x37e   :  { %8732 = vmatpush3.bf16.msra.mxu1 %v9094_v48  ;;  %8711 = vmatprep.subr.bf16.mxu0 %v9095_v49  ;;  %v9140_v48 = vld [vmem:[#allocation4 + $0x1f8] sm:$0xff]  }
 0x37f   :  { %8733 = vmatprep.subr.bf16.mxu1 %v9096_v50  ;;  %v9141_v49 = vld [vmem:[#allocation4 + $0x138] sm:$0xff]   ;;  %v5750_v50 = vmax.f32 %v9636_v10, 0.0  ;;  %v9147_v10 = vld [vmem:[#allocation4 + $0x248] sm:$0xff]  }
 0x381   :  { %8712 = vmatpush3.bf16.msra.mxu0 %v9097_v34  ;;  %v9142_v34 = vld [vmem:[#allocation4 + $0x1b8] sm:$0xff]  }
 0x382   :  { %8734 = vmatpush3.bf16.msra.mxu1 %v9098_v51  ;;  %8713 = vmatprep.subr.bf16.mxu0 %v9099_v52  ;;  %v9143_v51 = vld [vmem:[#allocation4 + $0x240] sm:$0xff]   ;;  %v5752_v52 = vmax.f32 %v9638_v16, 0.0  ;;  %v9149_v16 = vld [vmem:[#allocation4 + $0x208] sm:$0xff]  }
 0x383   :  { %v9656_v58 = vpop.f32.mrb[8].mxu0  ;;  %8735 = vmatprep.subr.bf16.mxu1 %v9100_v57  ;;  %v9658_v60 = vpop.f32.mrb[8].mxu1  ;;  %v9144_v57 = vld [vmem:[#allocation4 + $0x2c0] sm:$0xff]  }
 0x384   :  { %v9660_v62 = vpop.f32.mrb[9].mxu0  ;;  %v9662_v63 = vpop.f32.mrb[9].mxu1 }
 0x385   :  { %v5374_v0 = vpop.f32.mrb[10].mxu0  ;;  %8714 = vmatpush3.bf16.msra.mxu0 %v9101_v54  ;;  %v5497_v4 = vpop.f32.mrb[10].mxu1  ;;  %v5755_v54 = vmax.f32 %v9660_v62, 0.0  ;;  %v9150_v62 = vld [vmem:[#allocation4 + $0x288] sm:$0xff]  }
 0x386   :  { %8736 = vmatpush3.bf16.msra.mxu1 %v9102_v55  ;;  %v5375_v6 = vpop.f32.mrb[11].mxu0  ;;  %8715 = vmatprep.subr.bf16.mxu0 %v9103_v56  ;;  %v5498_v9 = vpop.f32.mrb[11].mxu1  ;;  %v5757_v55 = vmax.f32 %v9662_v63, 0.0  ;;  %v9145_v56 = vld [vmem:[#allocation4 + $0x200] sm:$0xff]   ;;  %v9151_v63 = vld [vmem:[#allocation4 + $0x250] sm:$0xff]  }
 0x387   :  { %8737 = vmatprep.subr.bf16.mxu1 %v9104_v59  ;;  %v5766_v59 = vpack.c.bf16 %v5750_v50, %v5750_v50  ;;  %v9146_v0 = vld [vmem:[#allocation4 + $0x280] sm:$0xff]   ;;  %v5771_v4 = vpack.c.bf16 %v5755_v54, %v5755_v54  ;;  %v9148_v6 = vld [vmem:[#allocation4 + $0x2c8] sm:$0xff]   ;;  %v9153_v9 = vld [vmem:[#allocation4 + $0x210] sm:$0xff]  }
 0x388   :  { %v9194_v50 = vld [vmem:[#allocation4 + $0x3a0] sm:$0xff]   ;;  %v9199_v54 = vld [vmem:[#allocation4 + $0x370] sm:$0xff]  }
 0x389   :  { %8716 = vmatpush3.bf16.msra.mxu0 %v9105_v3  ;;  %v5768_v3 = vpack.c.bf16 %v5752_v52, %v5752_v52  ;;  %v9197_v52 = vld [vmem:[#allocation4 + $0x328] sm:$0xff]  }
 0x38a   :  { %8738 = vmatpush3.bf16.msra.mxu1 %v9106_v7  ;;  %8717 = vmatprep.subr.bf16.mxu0 %v9107_v8  ;;  %v5773_v7 = vpack.c.bf16 %v5757_v55, %v5757_v55  ;;  %v9152_v8 = vld [vmem:[#allocation4 + $0x2d0] sm:$0xff]  }
 0x38b   :  { %8739 = vmatprep.subr.bf16.mxu1 %v9108_v11  ;;  %v9154_v11 = vld [vmem:[#allocation4 + $0x290] sm:$0xff]  }
 0x38c   :  { %v9200_v55 = vld [vmem:[#allocation4 + $0x3f0] sm:$0xff]  }
 0x38d   :  { %8718 = vmatpush3.bf16.msra.mxu0 %v9109_v13  ;;  %v9155_v13 = vld [vmem:[#allocation4 + $0x258] sm:$0xff]  }
 0x38e   :  { %8740 = vmatpush3.bf16.msra.mxu1 %v9110_v18  ;;  %8747 = vmatprep.subr.bf16.mxu0 %v9111_v12  ;;  %v9157_v18 = vld [vmem:[#allocation4 + $0x218] sm:$0xff]  }
 0x38f   :  { %8769 = vmatprep.subr.bf16.mxu1 %v9112_v21  ;;  %v9158_v12 = vld [vmem:[#allocation4 + $0x298] sm:$0xff]   ;;  %v9160_v21 = vld [vmem:[#allocation4 + $0x2e0] sm:$0xff]  }
 0x390   :  { %6839 = vmatmul.mubr.bf16.vlgmr.msra.gmra.mrb[16].mxu0 %v5762_v27  ;;  %v9164_v27 = vld [vmem:[#allocation4 + $0x2e8] sm:$0xff]  }
 0x391   :  { %6879 = vmatmul.mubr.bf16.vlgmr.msra.gmra.mrb[16].mxu1 %v5764_v29  ;;  %8748 = vmatpush3.bf16.msra.mxu0 %v9113_v26  ;;  %v9163_v26 = vld [vmem:[#allocation4 + $0x268] sm:$0xff]  }
 0x392   :  { %6918 = vmatprep.mubr.bf16.mxu0 %v5767_v30  ;;  %8770 = vmatpush3.bf16.msra.mxu1 %v9114_v28  ;;  %v9165_v28 = vld [vmem:[#allocation4 + $0x228] sm:$0xff]   ;;  %v9168_v30 = vld [vmem:[#allocation4 + $0x2f0] sm:$0xff]  }
 0x393   :  { %6958 = vmatprep.mubr.bf16.mxu1 %v5769_v31  ;;  %8749 = vmatprep.subr.bf16.mxu0 %v9115_v61  ;;  %v9166_v29 = vld [vmem:[#allocation4 + $0x2a8] sm:$0xff]   ;;  %v9167_v61 = vld [vmem:[#allocation4 + $0x270] sm:$0xff]  }
 0x394   :  { %8771 = vmatprep.subr.bf16.mxu1 %v9116_v23  ;;  %v9169_v23 = vld [vmem:[#allocation4 + $0x230] sm:$0xff]  }
 0x395   :  { %8750 = vmatpush3.bf16.msra.mxu0 %v9117_v1  ;;  %v9170_v31 = vld [vmem:[#allocation4 + $0x2b0] sm:$0xff]   ;;  %v9171_v1 = vld [vmem:[#allocation4 + $0x278] sm:$0xff]  }
 0x396   :  { %8772 = vmatpush3.bf16.msra.mxu1 %v9118_v17  ;;  %8751 = vmatprep.subr.bf16.mxu0 %v9119_v20  ;;  %v9172_v17 = vld [vmem:[#allocation4 + $0x2f8] sm:$0xff]  }
 0x397   :  { %8773 = vmatprep.subr.bf16.mxu1 %v9120_v32  ;;  %v9173_v20 = vld [vmem:[#allocation4 + $0x238] sm:$0xff]   ;;  %v5754_v32 = vmax.f32 %v9656_v58, 0.0  ;;  %v9181_v58 = vld [vmem:[#allocation4 + $0x308] sm:$0xff]  }
 0x399   :  { %8752 = vmatpush3.bf16.msra.mxu0 %v9121_v33  ;;  %v9174_v33 = vld [vmem:[#allocation4 + $0x2b8] sm:$0xff]  }
 0x39a   :  { %8774 = vmatpush3.bf16.msra.mxu1 %v9122_v15  ;;  %8753 = vmatprep.subr.bf16.mxu0 %v9123_v35  ;;  %v9175_v15 = vld [vmem:[#allocation4 + $0x340] sm:$0xff]   ;;  %v5756_v35 = vmax.f32 %v9658_v60, 0.0  ;;  %v9183_v60 = vld [vmem:[#allocation4 + $0x350] sm:$0xff]  }
 0x39b   :  { %8775 = vmatprep.subr.bf16.mxu1 %v9124_v36  ;;  %v9176_v36 = vld [vmem:[#allocation4 + $0x3c0] sm:$0xff]  }
 0x39d   :  { %8754 = vmatpush3.bf16.msra.mxu0 %v9125_v37  ;;  %v9177_v37 = vld [vmem:[#allocation4 + $0x300] sm:$0xff]  }
 0x39e   :  { %8776 = vmatpush3.bf16.msra.mxu1 %v9126_v39  ;;  %8755 = vmatprep.subr.bf16.mxu0 %v9127_v40  ;;  %v5770_v39 = vpack.c.bf16 %v5754_v32, %v5754_v32  ;;  %v9178_v40 = vld [vmem:[#allocation4 + $0x380] sm:$0xff]  }
 0x39f   :  { %8777 = vmatprep.subr.bf16.mxu1 %v9128_v41  ;;  %v9179_v41 = vld [vmem:[#allocation4 + $0x348] sm:$0xff]  }
 0x3a1   :  { %8756 = vmatpush3.bf16.msra.mxu0 %v9129_v42  ;;  %v5772_v42 = vpack.c.bf16 %v5756_v35, %v5756_v35 }
 0x3a2   :  { %8778 = vmatpush3.bf16.msra.mxu1 %v9130_v25  ;;  %8757 = vmatprep.subr.bf16.mxu0 %v9131_v43  ;;  %v9180_v25 = vld [vmem:[#allocation4 + $0x3c8] sm:$0xff]  }
 0x3a3   :  { %8779 = vmatprep.subr.bf16.mxu1 %v9132_v2  ;;  %v9182_v43 = vld [vmem:[#allocation4 + $0x388] sm:$0xff]   ;;  %v9184_v2 = vld [vmem:[#allocation4 + $0x3d0] sm:$0xff]  }
 0x3a5   :  { %8758 = vmatpush3.bf16.msra.mxu0 %v9133_v5  ;;  %v9185_v5 = vld [vmem:[#allocation4 + $0x310] sm:$0xff]  }
 0x3a6   :  { %8780 = vmatpush3.bf16.msra.mxu1 %v9134_v44  ;;  %8759 = vmatprep.subr.bf16.mxu0 %v9135_v45  ;;  %v9186_v44 = vld [vmem:[#allocation4 + $0x390] sm:$0xff]   ;;  %v9187_v45 = vld [vmem:[#allocation4 + $0x358] sm:$0xff]  }
 0x3a7   :  { %8781 = vmatprep.subr.bf16.mxu1 %v9136_v46  ;;  %v9188_v46 = vld [vmem:[#allocation4 + $0x3d8] sm:$0xff]  }
 0x3a9   :  { %8760 = vmatpush3.bf16.msra.mxu0 %v9137_v47  ;;  %v9189_v47 = vld [vmem:[#allocation4 + $0x318] sm:$0xff]  }
 0x3aa   :  { %8782 = vmatpush3.bf16.msra.mxu1 %v9138_v24  ;;  %8761 = vmatprep.subr.bf16.mxu0 %v9139_v38  ;;  %v9190_v24 = vld [vmem:[#allocation4 + $0x398] sm:$0xff]   ;;  %v9191_v38 = vld [vmem:[#allocation4 + $0x360] sm:$0xff]  }
 0x3ab   :  { %8783 = vmatprep.subr.bf16.mxu1 %v9140_v48  ;;  %v9192_v48 = vld [vmem:[#allocation4 + $0x3e0] sm:$0xff]  }
 0x3ad   :  { %8762 = vmatpush3.bf16.msra.mxu0 %v9141_v49  ;;  %v9193_v49 = vld [vmem:[#allocation4 + $0x320] sm:$0xff]  }
 0x3ae   :  { %8784 = vmatpush3.bf16.msra.mxu1 %v9142_v34  ;;  %8791 = vmatprep.subr.bf16.mxu0 %v9143_v51  ;;  %v9195_v34 = vld [vmem:[#allocation4 + $0x368] sm:$0xff]  }
 0x3af   :  { %8813 = vmatprep.subr.bf16.mxu1 %v9144_v57  ;;  %v9196_v51 = vld [vmem:[#allocation4 + $0x3e8] sm:$0xff]  }
 0x3b0   :  { %6919 = vmatmul.mubr.bf16.vlgmr.msra.gmra.mrb[20].mxu0 %v5766_v59  ;;  %v9198_v57 = vld [vmem:[#allocation4 + $0x3a8] sm:$0xff]   ;;  %v9202_v59 = vld [vmem:[#allocation4 + $0x3b0] sm:$0xff]  }
 0x3b1   :  { %6959 = vmatmul.mubr.bf16.vlgmr.msra.gmra.mrb[20].mxu1 %v5768_v3  ;;  %8792 = vmatpush3.bf16.msra.mxu0 %v9145_v56  ;;  %v9201_v56 = vld [vmem:[#allocation4 + $0x330] sm:$0xff]   ;;  %v9204_v3 = vld [vmem:[#allocation4 + $0x3f8] sm:$0xff]  }
 0x3b2   :  { %6998 = vmatprep.mubr.bf16.mxu0 %v5771_v4  ;;  %8814 = vmatpush3.bf16.msra.mxu1 %v9146_v0  ;;  %v9203_v0 = vld [vmem:[#allocation4 + $0x378] sm:$0xff]  }
 0x3b3   :  { %7038 = vmatprep.mubr.bf16.mxu1 %v5773_v7  ;;  %8793 = vmatprep.subr.bf16.mxu0 %v9147_v10  ;;  %v9205_v10 = vld [vmem:[#allocation4 + $0x338] sm:$0xff]  }
 0x3b4   :  { %8815 = vmatprep.subr.bf16.mxu1 %v9148_v6  ;;  %v9206_v4 = vld [vmem:[#allocation4 + $0x3b8] sm:$0xff]   ;;  %v9385_v6 = vmov 0.0  }
 0x3b5   :  { %8794 = vmatpush3.bf16.msra.mxu0 %v9149_v16 }
 0x3b6   :  { %8816 = vmatpush3.bf16.msra.mxu1 %v9150_v62  ;;  %8795 = vmatprep.subr.bf16.mxu0 %v9151_v63 }
 0x3b7   :  { %8817 = vmatprep.subr.bf16.mxu1 %v9152_v8 }
 0x3b9   :  { %8796 = vmatpush3.bf16.msra.mxu0 %v9153_v9 }
 0x3ba   :  { %8818 = vmatpush3.bf16.msra.mxu1 %v9154_v11  ;;  %8797 = vmatprep.subr.bf16.mxu0 %v9155_v13 }
 0x3bb   :  { %8819 = vmatprep.subr.bf16.mxu1 %v9156_v14 }
 0x3bd   :  { %8798 = vmatpush3.bf16.msra.mxu0 %v9157_v18 }
 0x3be   :  { %8820 = vmatpush3.bf16.msra.mxu1 %v9158_v12  ;;  %8799 = vmatprep.subr.bf16.mxu0 %v9159_v19 }
 0x3bf   :  { %8821 = vmatprep.subr.bf16.mxu1 %v9160_v21 }
 0x3c1   :  { %8800 = vmatpush3.bf16.msra.mxu0 %v9161_v22  ;;  %v9207_v22 = vld [vmem:[%s9820_s4] sm:$0xff]  }
 0x3c2   :  { %8822 = vmatpush3.bf16.msra.mxu1 %v9162_v53  ;;  %8801 = vmatprep.subr.bf16.mxu0 %v9163_v26 }
 0x3c3   :  { %8823 = vmatprep.subr.bf16.mxu1 %v9164_v27 }
 0x3c5   :  { %8802 = vmatpush3.bf16.msra.mxu0 %v9165_v28  ;;  %v9208_v28 = vld [vmem:[%s9820_s4 + $0x8] sm:$0xff]  }
 0x3c6   :  { %8824 = vmatpush3.bf16.msra.mxu1 %v9166_v29  ;;  %8803 = vmatprep.subr.bf16.mxu0 %v9167_v61  ;;  %v9209_v29 = vld [vmem:[%s9820_s4 + $0x10] sm:$0xff]   ;;  %v9210_v61 = vld [vmem:[%s9820_s4 + $0x18] sm:$0xff]  }
 0x3c7   :  { %8825 = vmatprep.subr.bf16.mxu1 %v9168_v30  ;;  %v6034_v30 = vlaneseq }
 0x3c9   :  { %8804 = vmatpush3.bf16.msra.mxu0 %v9169_v23  ;;  %v9211_v23 = vld [vmem:[%s9820_s4 + $0x20] sm:$0xff]  }
 0x3ca   :  { %8826 = vmatpush3.bf16.msra.mxu1 %v9170_v31  ;;  %8805 = vmatprep.subr.bf16.mxu0 %v9171_v1  ;;  %v9695_v31 = vshrl.u32 %v6034_v30, 7 }
 0x3cb   :  { %8827 = vmatprep.subr.bf16.mxu1 %v9172_v17  ;;  %v9699_v17 = vld [vmem:[#allocation10] sm:$0xff] }
 0x3cc   :  { %v6036_v1 = vsub.s32 0, %v9695_v31  ;;  %v7146_v30 = vsub.s32 1, %v9695_v31 }
 0x3cd   :  { %8806 = vmatpush3.bf16.msra.mxu0 %v9173_v20 }
 0x3ce   :  { %8828 = vmatpush3.bf16.msra.mxu1 %v9174_v33  ;;  %8835 = vmatprep.subr.bf16.mxu0 %v9175_v15  ;;  %v6037_v32 = vrot.slane %v9699_v17, %v6036_v1 }
 0x3cf   :  { %8857 = vmatprep.subr.bf16.mxu1 %v9176_v36 }
 0x3d0   :  { %6999 = vmatmul.mubr.bf16.vlgmr.msra.gmra.mrb[24].mxu0 %v5770_v39 }
 0x3d1   :  { %7039 = vmatmul.mubr.bf16.vlgmr.msra.gmra.mrb[24].mxu1 %v5772_v42  ;;  %8836 = vmatpush3.bf16.msra.mxu0 %v9177_v37 }
 0x3d2   :  { %8858 = vmatpush3.bf16.msra.mxu1 %v9178_v40  ;;  %8837 = vmatprep.subr.bf16.mxu0 %v9179_v41 }
 0x3d3   :  { %8859 = vmatprep.subr.bf16.mxu1 %v9180_v25 }
 0x3d5   :  { %8838 = vmatpush3.bf16.msra.mxu0 %v9181_v58 }
 0x3d6   :  { %8860 = vmatpush3.bf16.msra.mxu1 %v9182_v43  ;;  %8839 = vmatprep.subr.bf16.mxu0 %v9183_v60 }
 0x3d7   :  { %8861 = vmatprep.subr.bf16.mxu1 %v9184_v2 }
 0x3d9   :  { %8840 = vmatpush3.bf16.msra.mxu0 %v9185_v5 }
 0x3da   :  { %8862 = vmatpush3.bf16.msra.mxu1 %v9186_v44  ;;  %8841 = vmatprep.subr.bf16.mxu0 %v9187_v45 }
 0x3db   :  { %8863 = vmatprep.subr.bf16.mxu1 %v9188_v46 }
 0x3dd   :  { %8842 = vmatpush3.bf16.msra.mxu0 %v9189_v47 }
 0x3de   :  { %8864 = vmatpush3.bf16.msra.mxu1 %v9190_v24  ;;  %8843 = vmatprep.subr.bf16.mxu0 %v9191_v38 }
 0x3df   :  { %8865 = vmatprep.subr.bf16.mxu1 %v9192_v48 }
 0x3e1   :  { %8844 = vmatpush3.bf16.msra.mxu0 %v9193_v49 }
 0x3e2   :  { %8866 = vmatpush3.bf16.msra.mxu1 %v9194_v50  ;;  %8845 = vmatprep.subr.bf16.mxu0 %v9195_v34  ;;  %v9212_v50 = vld [vmem:[%s9820_s4 + $0x28] sm:$0xff]   ;;  %v9213_v34 = vld [vmem:[%s9820_s4 + $0x30] sm:$0xff]  }
 0x3e3   :  { %8867 = vmatprep.subr.bf16.mxu1 %v9196_v51 }
 0x3e5   :  { %8846 = vmatpush3.bf16.msra.mxu0 %v9197_v52 }
 0x3e6   :  { %8868 = vmatpush3.bf16.msra.mxu1 %v9198_v57  ;;  %8847 = vmatprep.subr.bf16.mxu0 %v9199_v54 }
 0x3e7   :  { %8869 = vmatprep.subr.bf16.mxu1 %v9200_v55 }
 0x3e9   :  { %8848 = vmatpush3.bf16.msra.mxu0 %v9201_v56 }
 0x3ea   :  { %8870 = vmatpush3.bf16.msra.mxu1 %v9202_v59  ;;  %8849 = vmatprep.subr.bf16.mxu0 %v9203_v0 }
 0x3eb   :  { %8871 = vmatprep.subr.bf16.mxu1 %v9204_v3 }
 0x3ed   :  { %8850 = vmatpush3.bf16.msra.mxu0 %v9205_v10  ;;  %v9214_v10 = vld [vmem:[%s9820_s4 + $0x38] sm:$0xff]  }
 0x3ee   :  { %8872 = vmatpush3.bf16.msra.mxu1 %v9206_v4  ;;  %8912 = vmatprep.subr.bf16.mxu0 %v9385_v6 }
 0x3ef   :  { %8932 = vmatprep.subr.bf16.mxu1 %v9385_v6 }
 0x443   :  { %v5616_v7 = vpop.f32.mrb[12].mxu0  ;;  %v5739_v62 = vpop.f32.mrb[12].mxu1 }
 0x444   :  { %v5758_v16 = vmax.f32 %v5616_v7, 0.0  ;;  %v5618_v63 = vpop.f32.mrb[13].mxu0  ;;  %v5760_v8 = vmax.f32 %v5739_v62, 0.0  ;;  %v5741_v11 = vpop.f32.mrb[13].mxu1  ;;  %v9215_v62 = vld [vmem:[%s9821_s5] sm:$0xff]  }
 0x445   :  { %v5759_v9 = vmax.f32 %v5618_v63, 0.0  ;;  %v5620_v13 = vpop.f32.mrb[14].mxu0  ;;  %v5761_v14 = vmax.f32 %v5741_v11, 0.0  ;;  %v5743_v18 = vpop.f32.mrb[14].mxu1  ;;  %v9216_v63 = vld [vmem:[%s9821_s5 + $0x8] sm:$0xff]  }
 0x446   :  { %v5621_v12 = vpop.f32.mrb[15].mxu0  ;;  %v5744_v21 = vpop.f32.mrb[15].mxu1  ;;  %v5774_v53 = vpack.c.bf16 %v5758_v16, %v5758_v16  ;;  %v5776_v27 = vpack.c.bf16 %v5760_v8, %v5760_v8 }
 0x447   :  { %v5775_v19 = vpack.c.bf16 %v5759_v9, %v5759_v9  ;;  %v5777_v26 = vpack.c.bf16 %v5761_v14, %v5761_v14 }
 0x449   :  { %7078 = vmatprep.mubr.bf16.mxu0 %v5775_v19  ;;  %7118 = vmatprep.mubr.bf16.mxu1 %v5777_v26 }
 0x44a   :  { %7079 = vmatmul.mubr.bf16.vlgmr.msra.gmra.mrb[28].mxu0 %v5774_v53  ;;  %7119 = vmatmul.mubr.bf16.vlgmr.msra.gmra.mrb[28].mxu1 %v5776_v27 }
 0x44b   :  { %8913 = vmatpush3.bf16.msra.mxu0 %v9207_v22  ;;  %8928 = vmatprep.mubr.msk.bf16.mxu0 %vm9386_vm0, %v9385_v6 }
 0x44c   :  { %8914 = vmatprep.subr.bf16.mxu0 %v9385_v6  ;;  %8940 = vmatprep.mubr.msk.bf16.mxu1 %vm9386_vm0, %v9385_v6 }
 0x44d   :  { %8933 = vmatpush3.bf16.msra.mxu1 %v9215_v62  ;;  %v9228_v62 = vld [vmem:[#allocation7] sm:$0xff]  }
 0x44e   :  { %8934 = vmatprep.subr.bf16.mxu1 %v9385_v6 }
 0x44f   :  { %8915 = vmatpush3.bf16.msra.mxu0 %v9208_v28 }
 0x450   :  { %8916 = vmatprep.subr.bf16.mxu0 %v9385_v6 }
 0x451   :  { %8935 = vmatpush3.bf16.msra.mxu1 %v9216_v63  ;;  %v7451_v63 = vsub.s32 5, %v9695_v31 }
 0x452   :  { %8936 = vmatprep.subr.bf16.mxu1 %v9385_v6 }
 0x453   :  { %8917 = vmatpush3.bf16.msra.mxu0 %v9209_v29  ;;  %v9217_v29 = vld [vmem:[%s9821_s5 + $0x10] sm:$0xff]  }
 0x454   :  { %8918 = vmatprep.subr.bf16.mxu0 %v9385_v6 }
 0x455   :  { %8937 = vmatpush3.bf16.msra.mxu1 %v9217_v29  ;;  %v7528_v29 = vsub.s32 6, %v9695_v31 }
 0x456   :  { %8938 = vmatprep.subr.bf16.mxu1 %v9385_v6 }
 0x457   :  { %8919 = vmatpush3.bf16.msra.mxu0 %v9210_v61  ;;  %v9218_v61 = vld [vmem:[%s9821_s5 + $0x18] sm:$0xff]  }
 0x458   :  { %8920 = vmatprep.subr.bf16.mxu0 %v9385_v6 }
 0x459   :  { %8939 = vmatpush3.bf16.msra.mxu1 %v9218_v61  ;;  %v7529_v61 = vrot.slane %v9699_v17, %v7528_v29 }
 0x45a   :  { %8944 = vmatprep.subr.bf16.mxu1 %v9385_v6 }
 0x45b   :  { %8921 = vmatpush3.bf16.msra.mxu0 %v9211_v23  ;;  %v7147_v23 = vrot.slane %v9699_v17, %v7146_v30 }
 0x45c   :  { %8922 = vmatprep.subr.bf16.mxu0 %v9385_v6 }
 0x45f   :  { %8923 = vmatpush3.bf16.msra.mxu0 %v9212_v50  ;;  %v9225_v50 = vld [vmem:[%s9825_s9] sm:$0xff]  }
 0x460   :  { %8924 = vmatprep.subr.bf16.mxu0 %v9385_v6 }
 0x463   :  { %v8719_v20 = vpop.f32.mrb[16].mxu0  ;;  %8925 = vmatpush3.bf16.msra.mxu0 %v9213_v34 }
 0x464   :  { %v8741_v33 = vpop.f32.mrb[16].mxu1  ;;  %v8720_v15 = vpop.f32.mrb[17].mxu0  ;;  %8926 = vmatprep.subr.bf16.mxu0 %v9385_v6 }
 0x465   :  { %v8721_v35 = vadd.f32 %v8720_v15, %v8719_v20  ;;  %v8742_v36 = vpop.f32.mrb[17].mxu1  ;;  %v8722_v37 = vpop.f32.mrb[18].mxu0 }
 0x466   :  { %v8743_v39 = vadd.f32 %v8742_v36, %v8741_v33  ;;  %v8744_v40 = vpop.f32.mrb[18].mxu1  ;;  %v8723_v41 = vpop.f32.mrb[19].mxu0  ;;  %v9219_v37 = vld [vmem:[%s9822_s6] sm:$0xff]  }
 0x467   :  { %v6841_v42 = vadd.f32 %v8721_v35, %v6037_v32  ;;  %v8745_v25 = vpop.f32.mrb[19].mxu1  ;;  %8927 = vmatpush3.bf16.msra.mxu0 %v9214_v10  ;;  %v9220_v40 = vld [vmem:[%s9822_s6 + $0x8] sm:$0xff]   ;;  %v7248_v41 = vsub.s32 2, %v9695_v31 }
 0x468   :  { %8958 = vmatprep.subr.bf16.mxu0 %v9385_v6 }
 0x469   :  { %v6881_v58 = vadd.f32 %v8743_v39, %v6841_v42  ;;  %v7249_v42 = vrot.slane %v9699_v17, %v7248_v41  ;;  %v7693_v41 = vsub.s32 7, %v9695_v31 }
 0x483   :  { %v8763_v43 = vpop.f32.mrb[20].mxu0 }
 0x484   :  { %v8785_v60 = vpop.f32.mrb[20].mxu1  ;;  %v8764_v2 = vpop.f32.mrb[21].mxu0 }
 0x485   :  { %v8765_v5 = vadd.f32 %v8764_v2, %v8763_v43  ;;  %v8786_v44 = vpop.f32.mrb[21].mxu1  ;;  %v8766_v45 = vpop.f32.mrb[22].mxu0  ;;  %v7386_v2 = vld [vmem:[#allocation6] sm:$0xf] }
 0x486   :  { %v8787_v46 = vadd.f32 %v8786_v44, %v8785_v60  ;;  %v8788_v47 = vpop.f32.mrb[22].mxu1  ;;  %v8767_v24 = vpop.f32.mrb[23].mxu0 }
 0x487   :  { %v6921_v38 = vadd.f32 %v8765_v5, %v6881_v58  ;;  %v8789_v48 = vpop.f32.mrb[23].mxu1  ;;  %v7385_v47 = vld [vmem:[%s9816_s0] sm:$0xf] }
 0x488   :  { %v9221_v24 = vld [vmem:[%s9824_s8] sm:$0xff]   ;;  %v9223_v48 = vld [vmem:[%s9824_s8 + $0x10] sm:$0xff]  }
 0x489   :  { %v6961_v49 = vadd.f32 %v8787_v46, %v6921_v38  ;;  %v7397_v46 = vsel %vm7395_vm2, %v7386_v2, 0  ;;  %v9222_v38 = vld [vmem:[%s9824_s8 + $0x8] sm:$0xff]  }
 0x4a3   :  { %v8807_v51 = vpop.f32.mrb[24].mxu0 }
 0x4a4   :  { %v8829_v52 = vpop.f32.mrb[24].mxu1  ;;  %v8808_v57 = vpop.f32.mrb[25].mxu0 }
 0x4a5   :  { %v8809_v54 = vadd.f32 %v8808_v57, %v8807_v51  ;;  %v8830_v55 = vpop.f32.mrb[25].mxu1  ;;  %v8810_v56 = vpop.f32.mrb[26].mxu0 }
 0x4a6   :  { %v8831_v59 = vadd.f32 %v8830_v55, %v8829_v52  ;;  %v8832_v0 = vpop.f32.mrb[26].mxu1  ;;  %v8811_v3 = vpop.f32.mrb[27].mxu0  ;;  %v7389_v52 = vsub.s32 4, %v9695_v31 }
 0x4a7   :  { %v7001_v4 = vadd.f32 %v8809_v54, %v6961_v49  ;;  %v8833_v7 = vpop.f32.mrb[27].mxu1  ;;  %v9224_v49 = vld [vmem:[%s9824_s8 + $0x18] sm:$0xff]  }
 0x4a8   :  { %v7390_v55 = vrot.slane %v9699_v17, %v7389_v52 }
 0x4a9   :  { %v7041_v16 = vadd.f32 %v8831_v59, %v7001_v4 }
 0x51d   :  { %v8851_v8 = vpop.f32.mrb[28].mxu0  ;;  %v8873_v9 = vpop.f32.mrb[28].mxu1 }
 0x51e   :  { %v8852_v11 = vpop.f32.mrb[29].mxu0  ;;  %v8874_v14 = vpop.f32.mrb[29].mxu1 }
 0x51f   :  { %v8853_v13 = vadd.f32 %v8852_v11, %v8851_v8  ;;  %v8854_v18 = vpop.f32.mrb[30].mxu0  ;;  %v8875_v12 = vadd.f32 %v8874_v14, %v8873_v9  ;;  %v8876_v19 = vpop.f32.mrb[30].mxu1  ;;  %v7326_v8 = vsub.s32 3, %v9695_v31  ;;  %v7452_v9 = vrot.slane %v9699_v17, %v7451_v63 }
 0x520   :  { %v8855_v21 = vpop.f32.mrb[31].mxu0  ;;  %v8877_v53 = vpop.f32.mrb[31].mxu1 }
 0x521   :  { %v7081_v22 = vadd.f32 %v8853_v13, %v7041_v16  ;;  %v9226_v16 = vld [vmem:[%s9825_s9 + $0x8] sm:$0xff]   ;;  %v7327_v13 = vrot.slane %v9699_v17, %v7326_v8 }
 0x523   :  { %v7121_v26 = vadd.f32 %v8875_v12, %v7081_v22  ;;  %v9227_v22 = vld [vmem:[#allocation9] sm:$0xff]  }
 0x525   :  { %v7126_v27 = vmax.f32 %v7121_v26, 0.0 }
 0x527   :  { %v7127_v28 = vpack.c.bf16 %v7126_v27, %v7126_v27 }
 0x529   :  { %8929 = vmatmul.mubr.bf16.vlgmr.msra.gmra.mrb[32].mxu0 %v7127_v28 }
 0x52a   :  { %8966 = vmatprep.mubr.msk.bf16.mxu0 %vm9386_vm0, %v9385_v6  ;;  %8959 = vmatpush3.bf16.msra.mxu0 %v9221_v24 }
 0x52b   :  { %8960 = vmatprep.subr.bf16.mxu0 %v9385_v6 }
 0x52e   :  { %8961 = vmatpush3.bf16.msra.mxu0 %v9222_v38 }
 0x52f   :  { %8962 = vmatprep.subr.bf16.mxu0 %v9385_v6 }
 0x532   :  { %8963 = vmatpush3.bf16.msra.mxu0 %v9223_v48 }
 0x533   :  { %8964 = vmatprep.subr.bf16.mxu0 %v9385_v6 }
 0x536   :  { %8965 = vmatpush3.bf16.msra.mxu0 %v9224_v49 }
 0x537   :  { %8984 = vmatprep.subr.bf16.mxu0 %v9385_v6 }
 0x5fc   :  { %v7230_v20 = vpop.f32.mrb[32].mxu0 }
 0x5fd   :  { %v7231_v32 = vadd.f32 %v7230_v20, %v7147_v23  ;;  %v8930_v33 = vpop.f32.mrb[33].mxu0 }
 0x5fe   :  { %v7233_v15 = vpop.f32.mrb[34].mxu0 }
 0x5ff   :  { %v7236_v35 = vmax.f32 %v7231_v32, 0.0  ;;  %v8931_v36 = vpop.f32.mrb[35].mxu0 }
 0x601   :  { %v7237_v39 = vpack.c.bf16 %v7236_v35, %v7236_v35 }
 0x603   :  { %8941 = vmatmul.mubr.msk.bf16.vlgmr.msra.gmra.mrb[32].mxu1 %vm7274_vm1, %v7237_v39 }
 0x604   :  { %8945 = vmatpush3.bf16.msra.mxu1 %v9219_v37  ;;  %8948 = vmatprep.mubr.msk.bf16.mxu1 %vm9386_vm0, %v9385_v6 }
 0x605   :  { %8946 = vmatprep.subr.bf16.mxu1 %v9385_v6 }
 0x608   :  { %8947 = vmatpush3.bf16.msra.mxu1 %v9220_v40 }
 0x609   :  { %8952 = vmatprep.subr.bf16.mxu1 %v9385_v6 }
 0x6d6   :  { %v7312_v25 = vpop.f32.mrb[32].mxu1 }
 0x6d7   :  { %v7313_v58 = vadd.f32 %v7312_v25, %v7249_v42  ;;  %v8942_v43 = vpop.f32.mrb[33].mxu1  ;;  %v7694_v42 = vrot.slane %v9699_v17, %v7693_v41 }
 0x6d8   :  { %v7315_v60 = vpop.f32.mrb[34].mxu1 }
 0x6d9   :  { %v7318_v5 = vmax.f32 %v7313_v58, 0.0  ;;  %v8943_v44 = vpop.f32.mrb[35].mxu1 }
 0x6db   :  { %v7319_v45 = vpack.c.bf16 %v7318_v5, %v7318_v5 }
 0x6dd   :  { %8949 = vmatmul.mubr.msk.bf16.vlgmr.msra.gmra.mrb[36].mxu1 %vm7340_vm3, %v7319_v45 }
 0x6de   :  { %8953 = vmatpush3.bf16.msra.mxu1 %v7397_v46  ;;  %8954 = vmatprep.mubr.msk.bf16.mxu1 %vm9386_vm0, %v9385_v6  ;;  %v129_v46 = vld [vmem:[#allocation10 + $0x8] sm:$0xff] }
 0x6df   :  { %8970 = vmatprep.subr.bf16.mxu1 %v9385_v6 }
 0x6e5   :  { %8955 = vmatmul.mubr.msk.bf16.vlgmr.msra.gmra.mrb[40].mxu1 %vm7391_vm4, %v7385_v47  ;;  %v7703_v47 = vrot.slane %v129_v46, %v6036_v1 }
 0x6e6   :  { %8974 = vmatprep.mubr.msk.bf16.mxu1 %vm9386_vm0, %v9385_v6  ;;  %8971 = vmatpush3.bf16.msra.mxu1 %v9225_v50 }
 0x6e7   :  { %8972 = vmatprep.subr.bf16.mxu1 %v9385_v6 }
 0x6ea   :  { %8973 = vmatpush3.bf16.msra.mxu1 %v9226_v16 }
 0x6eb   :  { %8978 = vmatprep.subr.bf16.mxu1 %v9385_v6 }
 0x7b0   :  { %v7378_v34 = vpop.f32.mrb[36].mxu1 }
 0x7b1   :  { %v8950_v51 = vpop.f32.mrb[37].mxu1  ;;  %v7379_v53 = vadd.f32 %v7378_v34, %v7327_v13 }
 0x7b2   :  { %v7381_v57 = vpop.f32.mrb[38].mxu1 }
 0x7b3   :  { %v8951_v54 = vpop.f32.mrb[39].mxu1  ;;  %v7384_v27 = vmax.f32 %v7379_v53, 0.0 }
 0x7b5   :  { %v7589_v28 = vpack.c.bf16 %v7384_v27, %v7384_v27 }
 0x7b8   :  { %v7433_v56 = vpop.f32.mrb[40].mxu1 }
 0x7b9   :  { %v7434_v59 = vadd.f32 %v7433_v56, %v7390_v55  ;;  %v8956_v0 = vpop.f32.mrb[41].mxu1 }
 0x7ba   :  { %v7436_v3 = vpop.f32.mrb[42].mxu1 }
 0x7bb   :  { %v7439_v10 = vmax.f32 %v7434_v59, 0.0  ;;  %v8957_v4 = vpop.f32.mrb[43].mxu1 }
 0x7bd   :  { %v7440_v7 = vpack.c.bf16 %v7439_v10, %v7439_v10 }
 0x7bf   :  { %8967 = vmatmul.mubr.msk.bf16.vlgmr.msra.gmra.mrb[36].mxu0 %vm7274_vm1, %v7440_v7 }
 0x7c0   :  { %8986 = vmatprep.mubr.msk.bf16.mxu0 %vm9386_vm0, %v9385_v6  ;;  %8985 = vmatpush3.bf16.msra.mxu0 %v9228_v62 }
 0x892   :  { %v7514_v11 = vpop.f32.mrb[36].mxu0 }
 0x893   :  { %v7515_v14 = vadd.f32 %v7514_v11, %v7452_v9  ;;  %v8968_v18 = vpop.f32.mrb[37].mxu0 }
 0x894   :  { %v7517_v12 = vpop.f32.mrb[38].mxu0 }
 0x895   :  { %v7520_v19 = vmax.f32 %v7515_v14, 0.0  ;;  %v8969_v21 = vpop.f32.mrb[39].mxu0 }
 0x897   :  { %v7521_v26 = vpack.c.bf16 %v7520_v19, %v7520_v19 }
 0x899   :  { %8975 = vmatmul.mubr.msk.bf16.vlgmr.msra.gmra.mrb[44].mxu1 %vm7340_vm3, %v7521_v26 }
 0x89a   :  { %8979 = vmatpush3.bf16.msra.mxu1 %v9227_v22  ;;  %8980 = vmatprep.mubr.msk.bf16.mxu1 %vm9386_vm0, %v9385_v6 }
 0x89b   :  { %8990 = vmatprep.subr.bf16.mxu1 %v9385_v6 }
 0x8a1   :  { %8981 = vmatmul.mubr.msk.bf16.vlgmr.msra.gmra.mrb[48].mxu1 %vm7598_vm5, %v7589_v28 }
 0x8a2   :  { %8992 = vmatprep.mubr.msk.bf16.mxu1 %vm9386_vm0, %v9385_v6  ;;  %v9229_v6 = vld [vmem:[%s9828_s12] sm:$0xff]  }
 0x8a3   :  { %8991 = vmatpush3.bf16.msra.mxu1 %v9229_v6 }
 0x96c   :  { %v7579_v30 = vpop.f32.mrb[44].mxu1 }
 0x96d   :  { %v7580_v23 = vadd.f32 %v7579_v30, %v7529_v61  ;;  %v8976_v20 = vpop.f32.mrb[45].mxu1 }
 0x96e   :  { %v7582_v32 = vpop.f32.mrb[46].mxu1 }
 0x96f   :  { %v7585_v33 = vmax.f32 %v7580_v23, 0.0  ;;  %v8977_v15 = vpop.f32.mrb[47].mxu1 }
 0x971   :  { %v7586_v35 = vpack.c.bf16 %v7585_v33, %v7585_v33 }
 0x973   :  { %8987 = vmatmul.mubr.msk.bf16.vlgmr.msra.gmra.mrb[40].mxu0 %vm7598_vm5, %v7586_v35 }
 0x974   :  { %v7636_v36 = vpop.f32.mrb[48].mxu1 }
 0x975   :  { %v8982_v37 = vpop.f32.mrb[49].mxu1 }
 0x976   :  { %v7639_v39 = vpop.f32.mrb[50].mxu1 }
 0x977   :  { %v8983_v40 = vpop.f32.mrb[51].mxu1 }
 0xa46   :  { %v7685_v25 = vpop.f32.mrb[40].mxu0 }
 0xa47   :  { %v7686_v58 = vadd.f32 %v7685_v25, %v7636_v36  ;;  %v8988_v43 = vpop.f32.mrb[41].mxu0 }
 0xa48   :  { %v7688_v60 = vpop.f32.mrb[42].mxu0 }
 0xa49   :  { %v7695_v2 = vadd.f32 %v7694_v42, %v7686_v58  ;;  %v8989_v5 = vpop.f32.mrb[43].mxu0 }
 0xa4b   :  { %v7696_v44 = vmax.f32 %v7695_v2, 0.0 }
 0xa4d   :  { %v7697_v45 = vpack.c.bf16 %v7696_v44, %v7696_v44 }
 0xa4f   :  { %8993 = vmatmul.mubr.msk.bf16.vlgmr.msra.gmra.mrb[52].mxu1 %vm7598_vm5, %v7697_v45 }
 0xb22   :  { %v7747_v24 = vpop.f32.mrb[52].mxu1 }
 0xb23   :  { %v7748_v38 = vadd.f32 %v7747_v24, %v7703_v47  ;;  %v8994_v48 = vpop.f32.mrb[53].mxu1 }
 0xb24   :  { %v7750_v49 = vpop.f32.mrb[54].mxu1 }
 0xb25   :  { %v8702_v50 = vmul.f32 -1.442695, %v7748_v38  ;;  %v8995_v17 = vpop.f32.mrb[55].mxu1 }
 0xb27   :  { %9230 = vpow2.f32 %v8702_v50 }
 0xb31   :  { %v9231_v34 = vpop.eup %9230 }
 0xb32   :  { %v7756_v51 = vadd.f32 1.0, %v9231_v34 }
 0xb34   :  { %9232 = vrcp.f32 %v7756_v51 }
 0xb3e   :  { %v9233_v52 = vpop.eup %9232 }
 0xb3f   :  { %7760 = vst.msk [vmem:[%s9830_s14] sm:$0xff] %vm7759_vm6, %v9233_v52 }
 0xb40   :  { %7765 = vsyncpa [#allocation3], 1 }
 0xb41   :  { %7766 = vsyncpa [#allocation5], 1 }
 0xb42   :  { %7767 = vsyncpa [#allocation8], 1 }
 0xb43   :  { %7768 = vsyncpa [#allocation11], 1 }

</bundles_post_ra>
